<compile_context>
chip_gen: v5e
topology: v5e:2x2
jax: 0.10.0
libtpu: 0.0.40
codegen_flags: <defaults>
</compile_context>

<pallas_src>
import math

import jax
import jax.numpy as jnp
from jax.experimental import pallas as pl
from jax.experimental.pallas import tpu as pltpu  # noqa: F401  (kept for TPU-specific tweaks)

# ---------------- model config (small but consistent with the module) ----------------
D_MODEL   = 32
D_FF      = 64
N_HEAD    = 4
D_K       = D_MODEL // N_HEAD
N_LAYERS  = 2
OUT_DIM   = 10
BATCH     = 2
SRC_LEN   = 8
TGT_LEN   = 8
ENC_VOCAB = 50   # enco_seq_len (encoder embedding table size)
DEC_VOCAB = 20   # deco_seq_len (decoder embedding table size)
LN_EPS    = 1e-5
NEG_INF   = -1000000000.0

LANE  = 128      # lane width of the packed weight slab
ALIGN = 8        # sublane alignment of every entry in the slab


def _round_up(x, m):
    return (x + m - 1) // m * m


# -------------------- static layout of the single packed weight slab --------------------
def _build_layout():
    """name -> (row offset, rows, cols) for every parameter inside the f32 slab."""
    entries = []
    add = lambda name, r, c: entries.append((name, r, c))
    for l in range(N_LAYERS):                                   # encoder layers
        add(f"e{l}_wqkv", D_MODEL, 3 * D_MODEL); add(f"e{l}_bqkv", 1, 3 * D_MODEL)
        add(f"e{l}_wo",   D_MODEL, D_MODEL);     add(f"e{l}_bo",   1, D_MODEL)
        add(f"e{l}_ln1g", 1, D_MODEL);           add(f"e{l}_ln1b", 1, D_MODEL)
        add(f"e{l}_w1",   D_MODEL, D_FF);        add(f"e{l}_b1",   1, D_FF)
        add(f"e{l}_w2",   D_FF, D_MODEL);        add(f"e{l}_b2",   1, D_MODEL)
        add(f"e{l}_ln2g", 1, D_MODEL);           add(f"e{l}_ln2b", 1, D_MODEL)
    for l in range(N_LAYERS):                                   # decoder layers
        add(f"d{l}_s_wqkv", D_MODEL, 3 * D_MODEL); add(f"d{l}_s_bqkv", 1, 3 * D_MODEL)
        add(f"d{l}_s_wo",   D_MODEL, D_MODEL);     add(f"d{l}_s_bo",   1, D_MODEL)
        add(f"d{l}_s_lng",  1, D_MODEL);           add(f"d{l}_s_lnb",  1, D_MODEL)
        add(f"d{l}_c_wq",   D_MODEL, D_MODEL);     add(f"d{l}_c_bq",   1, D_MODEL)
        add(f"d{l}_c_wo",   D_MODEL, D_MODEL);     add(f"d{l}_c_bo",   1, D_MODEL)
        add(f"d{l}_c_lng",  1, D_MODEL);           add(f"d{l}_c_lnb",  1, D_MODEL)
        add(f"d{l}_f_w1",   D_MODEL, D_FF);        add(f"d{l}_f_b1",   1, D_FF)
        add(f"d{l}_f_w2",   D_FF, D_MODEL);        add(f"d{l}_f_b2",   1, D_MODEL)
        add(f"d{l}_f_lng",  1, D_MODEL);           add(f"d{l}_f_lnb",  1, D_MODEL)
    add("c_wkv_all", D_MODEL, N_LAYERS * 2 * D_MODEL)   # cross-attn K|V, all layers fused
    add("c_bkv_all", 1, N_LAYERS * 2 * D_MODEL)
    add("fc_w", D_MODEL, OUT_DIM); add("fc_b", 1, OUT_DIM)
    add("enc_emb", ENC_VOCAB, D_MODEL)
    add("dec_emb", DEC_VOCAB, D_MODEL)

    offsets, cur = {}, 0
    for name, r, c in entries:
        offsets[name] = (cur, r, c)
        cur += _round_up(r, ALIGN)
    return entries, offsets, cur


_ENTRIES, _OFF, SLAB_ROWS = _build_layout()


# -------------------- in-kernel building blocks (trace-time helpers) --------------------
def _add_layernorm(y, residual, gamma, beta):
    """LayerNorm(y + residual), torch semantics (biased var, eps=1e-5)."""
    z = y + residual
    mu = jnp.mean(z, axis=-1, keepdims=True)
    var = jnp.mean((z - mu) ** 2, axis=-1, keepdims=True)
    return (z - mu) * jax.lax.rsqrt(var + LN_EPS) * gamma + beta


def _attention(q2, k2, v2, lq, lk, wo, bo, future):
    """Head-batched SDPA + single output projection.

    q2:(B*lq, D), k2/v2:(B*lk, D) -> concat_heads(SDPA) @ wo + bo : (B*lq, D).
    Heads are folded into a leading batch dim (H*B) so QK^T and P@V are each
    ONE batched einsum and the softmax runs once; the per-head contexts are
    lane-concatenated and hit the full wo in a single matmul."""
    def split_heads(x2, L):                                     # (B*L, D) -> (H*B, L, DK)
        x3 = x2.reshape(BATCH, L, D_MODEL)
        return jnp.concatenate(
            [x3[:, :, h * D_K:(h + 1) * D_K] for h in range(N_HEAD)], axis=0)

    qh = split_heads(q2, lq)
    kh = split_heads(k2, lk)
    vh = split_heads(v2, lk)

    s = jnp.einsum("bqd,bkd->bqk", qh, kh,
                   preferred_element_type=jnp.float32) * (1.0 / math.sqrt(D_K))
    if future is not None:                                      # causal (pos) mask
        s = jnp.where(future[None, :, :], jnp.float32(NEG_INF), s)
    # softmax once over the whole (H*B, lq, lk) tensor; divide goes to the EUP.
    p = jnp.exp(s - jnp.max(s, axis=-1, keepdims=True))
    p = p * pl.reciprocal(jnp.sum(p, axis=-1, keepdims=True), approx=True)

    ctx = jnp.einsum("bqk,bkd->bqd", p, vh,
                     preferred_element_type=jnp.float32)        # (H*B, lq, DK)
    ctx2 = jnp.concatenate(
        [ctx[h * BATCH:(h + 1) * BATCH].reshape(BATCH * lq, D_K) for h in range(N_HEAD)],
        axis=1)                                                 # (B*lq, D)
    return jnp.dot(ctx2, wo, preferred_element_type=jnp.float32) + bo


def _mha_self_block(x2, seq_len, wqkv, bqkv, wo, bo, g, b, future):
    """Fused QKV projection -> SDPA -> output proj -> residual + LayerNorm."""
    qkv = jnp.dot(x2, wqkv, preferred_element_type=jnp.float32) + bqkv   # (B*L, 3D)
    q = qkv[:, 0 * D_MODEL:1 * D_MODEL]
    k = qkv[:, 1 * D_MODEL:2 * D_MODEL]
    v = qkv[:, 2 * D_MODEL:3 * D_MODEL]
    out = _attention(q, k, v, seq_len, seq_len, wo, bo, future)
    return _add_layernorm(out, x2, g, b)


def _mha_cross_block(xq2, k2, v2, lq, lk, wq, bq, wo, bo, g, b):
    """Decoder-encoder attention; K/V come pre-projected (hoisted out of the layer loop)."""
    q = jnp.dot(xq2, wq, preferred_element_type=jnp.float32) + bq        # (B*lq, D)
    out = _attention(q, k2, v2, lq, lk, wo, bo, future=None)
    return _add_layernorm(out, xq2, g, b)


def _ffn_block(x2, w1, b1, w2, b2, g, b):
    """Linear -> ReLU -> Linear -> residual + LayerNorm (dropout=0.0 is identity)."""
    h = jnp.maximum(jnp.dot(x2, w1, preferred_element_type=jnp.float32) + b1, 0.0)
    y = jnp.dot(h, w2, preferred_element_type=jnp.float32) + b2
    return _add_layernorm(y, x2, g, b)


# ----------------------------------- fused forward kernel -----------------------------------
def _transformer_kernel(enc_tok_ref, dec_tok_ref, w_ref, probs_ref, clss_ref):
    def W(name):                                   # static slice of the packed weight slab
        off, r, c = _OFF[name]
        return w_ref[off:off + r, :c]

    sqrt_d = math.sqrt(D_MODEL)

    # ---- embeddings: one-hot gather on the MXU (token ids are tiny int32 VMEM inputs) ----
    def embed(tok_ref, n_tok, vocab, table_name):
        tok = tok_ref[...]                                             # (n_tok, 1) int32
        iota = jax.lax.broadcasted_iota(jnp.int32, (n_tok, vocab), 1)
        onehot = (iota == tok).astype(jnp.float32)                     # (n_tok, vocab)
        return jnp.dot(onehot, W(table_name),
                       preferred_element_type=jnp.float32) * sqrt_d

    # ---------------- encoder ----------------
    # TODO(synk): get_attn_pad_mask in the reference is computed on the *embedded*
    # float tensor (eq(0) on floats), so it is effectively all-False; encoder
    # self-attn and decoder cross-attn are therefore unmasked, matching that code.
    x = embed(enc_tok_ref, BATCH * SRC_LEN, ENC_VOCAB, "enc_emb")       # (B*SRC_LEN, D)
    for l in range(N_LAYERS):
        x = _mha_self_block(x, SRC_LEN, W(f"e{l}_wqkv"), W(f"e{l}_bqkv"),
                            W(f"e{l}_wo"), W(f"e{l}_bo"),
                            W(f"e{l}_ln1g"), W(f"e{l}_ln1b"), future=None)
        x = _ffn_block(x, W(f"e{l}_w1"), W(f"e{l}_b1"), W(f"e{l}_w2"), W(f"e{l}_b2"),
                       W(f"e{l}_ln2g"), W(f"e{l}_ln2b"))
    enc2 = x                                                            # VMEM-resident

    # Cross-attention K/V for ALL decoder layers in one 128-lane-dense matmul (hoisted).
    kv_all = jnp.dot(enc2, W("c_wkv_all"),
                     preferred_element_type=jnp.float32) + W("c_bkv_all")   # (B*SRC_LEN, 2*D*N)

    # Causal (pos) mask built once for all decoder layers.
    row = jax.lax.broadcasted_iota(jnp.int32, (TGT_LEN, TGT_LEN), 0)
    col = jax.lax.broadcasted_iota(jnp.int32, (TGT_LEN, TGT_LEN), 1)
    future = col > row                                                  # (Lq, Lk) bool

    # ---------------- decoder ----------------
    y = embed(dec_tok_ref, BATCH * TGT_LEN, DEC_VOCAB, "dec_emb")       # (B*TGT_LEN, D)
    for l in range(N_LAYERS):
        y = _mha_self_block(y, TGT_LEN, W(f"d{l}_s_wqkv"), W(f"d{l}_s_bqkv"),
                            W(f"d{l}_s_wo"), W(f"d{l}_s_bo"),
                            W(f"d{l}_s_lng"), W(f"d{l}_s_lnb"), future=future)
        base = l * 2 * D_MODEL
        k_c = kv_all[:, base:base + D_MODEL]
        v_c = kv_all[:, base + D_MODEL:base + 2 * D_MODEL]
        y = _mha_cross_block(y, k_c, v_c, TGT_LEN, SRC_LEN,
                             W(f"d{l}_c_wq"), W(f"d{l}_c_bq"),
                             W(f"d{l}_c_wo"), W(f"d{l}_c_bo"),
                             W(f"d{l}_c_lng"), W(f"d{l}_c_lnb"))        # pad mask is no-op
        y = _ffn_block(y, W(f"d{l}_f_w1"), W(f"d{l}_f_b1"),
                       W(f"d{l}_f_w2"), W(f"d{l}_f_b2"),
                       W(f"d{l}_f_lng"), W(f"d{l}_f_lnb"))

    # --------- classifier: linear + softmax + argmax fused ---------
    logits = jnp.dot(y, W("fc_w"), preferred_element_type=jnp.float32) + W("fc_b")
    mx = jnp.max(logits, axis=-1, keepdims=True)
    e = jnp.exp(logits - mx)
    # Exact divide here (tiny) so output probabilities sum to 1 to float precision.
    probs_ref[...] = e / jnp.sum(e, axis=-1, keepdims=True)
    # argmax(probs) == argmax(logits); manual first-max-index (no lax.argmax lowering risk).
    col_o = jax.lax.broadcasted_iota(jnp.int32, (BATCH * TGT_LEN, OUT_DIM), 1)
    clss_ref[...] = jnp.min(jnp.where(logits == mx, col_o, OUT_DIM),
                            axis=-1, keepdims=True)


# ----------------------------------- wrapper -----------------------------------
def transformer_forward(enco_inputs, y_prevs, slab):
    """parallel=True / classification=True path of Transformer.forward."""
    enc_tok = enco_inputs.reshape(BATCH * SRC_LEN, 1).astype(jnp.int32)
    dec_tok = y_prevs.reshape(BATCH * TGT_LEN, 1).astype(jnp.int32)
    probs2d, clss2d = pl.pallas_call(
        _transformer_kernel,
        out_shape=(jax.ShapeDtypeStruct((BATCH * TGT_LEN, OUT_DIM), jnp.float32),
                   jax.ShapeDtypeStruct((BATCH * TGT_LEN, 1), jnp.int32)),
    )(enc_tok, dec_tok, slab)
    y_probs = probs2d.reshape(BATCH, TGT_LEN, OUT_DIM)
    y_clss = clss2d.reshape(BATCH, TGT_LEN)
    return y_probs, y_clss


# ----------------------------------- parameter init ------------------------------------
def _init_linear(key, fan_in, fan_out):
    k1, k2 = jax.random.split(key)
    bound = 1.0 / math.sqrt(fan_in)
    w = jax.random.uniform(k1, (fan_in, fan_out), jnp.float32, -bound, bound)
    b = jax.random.uniform(k2, (1, fan_out), jnp.float32, -bound, bound)
    return w, b


def _init_mha(key):
    ks = jax.random.split(key, 4)
    wq, bq = _init_linear(ks[0], D_MODEL, D_MODEL)
    wk, bk = _init_linear(ks[1], D_MODEL, D_MODEL)
    wv, bv = _init_linear(ks[2], D_MODEL, D_MODEL)
    wo, bo = _init_linear(ks[3], D_MODEL, D_MODEL)
    return dict(wq=wq, bq=bq, wk=wk, bk=bk, wv=wv, bv=bv, wo=wo, bo=bo,
                ln_g=jnp.ones((1, D_MODEL), jnp.float32),
                ln_b=jnp.zeros((1, D_MODEL), jnp.float32))


def _init_ff(key):
    k1, k2 = jax.random.split(key)
    w1, b1 = _init_linear(k1, D_MODEL, D_FF)
    w2, b2 = _init_linear(k2, D_FF, D_MODEL)
    return dict(w1=w1, b1=b1, w2=w2, b2=b2,
                ln_g=jnp.ones((1, D_MODEL), jnp.float32),
                ln_b=jnp.zeros((1, D_MODEL), jnp.float32))


def init_params(key):
    keys = jax.random.split(key, 3 + 2 * N_LAYERS + 3 * N_LAYERS)
    it = iter(keys)
    params = {
        "enc_emb": jax.random.normal(next(it), (ENC_VOCAB, D_MODEL), jnp.float32),
        "dec_emb": jax.random.normal(next(it), (DEC_VOCAB, D_MODEL), jnp.float32),
        "enc_layers": [],
        "dec_layers": [],
    }
    for _ in range(N_LAYERS):
        params["enc_layers"].append(dict(attn=_init_mha(next(it)), ff=_init_ff(next(it))))
    for _ in range(N_LAYERS):
        params["dec_layers"].append(dict(self_attn=_init_mha(next(it)),
                                         enc_attn=_init_mha(next(it)),
                                         ff=_init_ff(next(it))))
    fc_w, fc_b = _init_linear(next(it), D_MODEL, OUT_DIM)
    params["fc_w"] = fc_w
    params["fc_b"] = fc_b
    return params


def pack_params(params):
    """Fuse Q|K|V (and per-layer cross-attn K|V) weights and pack EVERYTHING into one
    (SLAB_ROWS, 128) f32 slab whose static row offsets the kernel slices. Done once, outside jit."""
    t = {}
    for l, lp in enumerate(params["enc_layers"]):
        a, f = lp["attn"], lp["ff"]
        t[f"e{l}_wqkv"] = jnp.concatenate([a["wq"], a["wk"], a["wv"]], axis=1)
        t[f"e{l}_bqkv"] = jnp.concatenate([a["bq"], a["bk"], a["bv"]], axis=1)
        t[f"e{l}_wo"], t[f"e{l}_bo"] = a["wo"], a["bo"]
        t[f"e{l}_ln1g"], t[f"e{l}_ln1b"] = a["ln_g"], a["ln_b"]
        t[f"e{l}_w1"], t[f"e{l}_b1"] = f["w1"], f["b1"]
        t[f"e{l}_w2"], t[f"e{l}_b2"] = f["w2"], f["b2"]
        t[f"e{l}_ln2g"], t[f"e{l}_ln2b"] = f["ln_g"], f["ln_b"]
    cross_wkv, cross_bkv = [], []
    for l, lp in enumerate(params["dec_layers"]):
        s, c, f = lp["self_attn"], lp["enc_attn"], lp["ff"]
        t[f"d{l}_s_wqkv"] = jnp.concatenate([s["wq"], s["wk"], s["wv"]], axis=1)
        t[f"d{l}_s_bqkv"] = jnp.concatenate([s["bq"], s["bk"], s["bv"]], axis=1)
        t[f"d{l}_s_wo"], t[f"d{l}_s_bo"] = s["wo"], s["bo"]
        t[f"d{l}_s_lng"], t[f"d{l}_s_lnb"] = s["ln_g"], s["ln_b"]
        t[f"d{l}_c_wq"], t[f"d{l}_c_bq"] = c["wq"], c["bq"]
        t[f"d{l}_c_wo"], t[f"d{l}_c_bo"] = c["wo"], c["bo"]
        t[f"d{l}_c_lng"], t[f"d{l}_c_lnb"] = c["ln_g"], c["ln_b"]
        cross_wkv.append(jnp.concatenate([c["wk"], c["wv"]], axis=1))
        cross_bkv.append(jnp.concatenate([c["bk"], c["bv"]], axis=1))
        t[f"d{l}_f_w1"], t[f"d{l}_f_b1"] = f["w1"], f["b1"]
        t[f"d{l}_f_w2"], t[f"d{l}_f_b2"] = f["w2"], f["b2"]
        t[f"d{l}_f_lng"], t[f"d{l}_f_lnb"] = f["ln_g"], f["ln_b"]
    t["c_wkv_all"] = jnp.concatenate(cross_wkv, axis=1)     # (D, N_LAYERS*2D) = (32, 128)
    t["c_bkv_all"] = jnp.concatenate(cross_bkv, axis=1)
    t["fc_w"], t["fc_b"] = params["fc_w"], params["fc_b"]
    t["enc_emb"], t["dec_emb"] = params["enc_emb"], params["dec_emb"]

    blocks = []
    for name, r, c in _ENTRIES:
        a = jnp.asarray(t[name], jnp.float32)
        assert a.shape == (r, c), (name, a.shape, (r, c))
        rp = _round_up(r, ALIGN)
        blocks.append(jnp.pad(a, ((0, rp - r), (0, LANE - c))))
    slab = jnp.concatenate(blocks, axis=0)
    assert slab.shape == (SLAB_ROWS, LANE)
    return slab


# -------------------------------------- main --------------------------------------------
if __name__ == "__main__":
    root = jax.random.PRNGKey(0)
    k_param, k_src, k_tgt = jax.random.split(root, 3)
    params = init_params(k_param)
    slab = pack_params(params)

    enco_inputs = jax.random.randint(k_src, (BATCH, SRC_LEN), 1, ENC_VOCAB, dtype=jnp.int32)
    y_prevs     = jax.random.randint(k_tgt, (BATCH, TGT_LEN), 1, DEC_VOCAB, dtype=jnp.int32)

    fwd = jax.jit(transformer_forward)
    y_probs, y_clss = fwd(enco_inputs, y_prevs, slab)
    jax.block_until_ready((y_probs, y_clss))

    assert y_probs.shape == (BATCH, TGT_LEN, OUT_DIM)
    assert y_clss.shape == (BATCH, TGT_LEN)
    assert bool(jnp.all(jnp.isfinite(y_probs)))
    assert bool(jnp.all(jnp.abs(jnp.sum(y_probs, axis=-1) - 1.0) < 1e-3))
    assert bool(jnp.all(jnp.argmax(y_probs, axis=-1) == y_clss))
    assert bool(jnp.all((y_clss >= 0) & (y_clss < OUT_DIM)))
    print("KERNEL_OK")
</pallas_src>

<mosaic_0001>
module attributes {stable_mosaic.version = 11 : i64} {
  func.func @_transformer_kernel(%arg0: memref<16x1xi32, #tpu.memory_space<vmem>>, %arg1: memref<16x1xi32, #tpu.memory_space<vmem>>, %arg2: memref<1248x128xf32, #tpu.memory_space<vmem>>, %arg3: memref<16x10xf32, #tpu.memory_space<vmem>>, %arg4: memref<16x1xi32, #tpu.memory_space<vmem>>) attributes {dimension_semantics = [], scalar_prefetch = 0 : i64, scratch_operands = 0 : i64, tpu.core_type = #tpu.core_type<tc>} {
    %c0 = arith.constant 0 : index
    %c0_0 = arith.constant 0 : index
    %0 = vector.load %arg0[%c0, %c0_0] : memref<16x1xi32, #tpu.memory_space<vmem>>, vector<16x1xi32>
    %1 = tpu.iota {dimensions = array<i32: 1>} : vector<16x50xi32>
    %2 = vector.broadcast %0 : vector<16x1xi32> to vector<16x50xi32>
    %3 = arith.cmpi eq, %1, %2 : vector<16x50xi32>
    %4 = arith.extui %3 : vector<16x50xi1> to vector<16x50xi32>
    %5 = arith.sitofp %4 : vector<16x50xi32> to vector<16x50xf32>
    %c1168 = arith.constant 1168 : index
    %c0_1 = arith.constant 0 : index
    %6 = vector.load %arg2[%c1168, %c0_1] : memref<1248x128xf32, #tpu.memory_space<vmem>>, vector<50x32xf32>
    %cst = arith.constant dense<0.000000e+00> : vector<16x32xf32>
    %7 = tpu.matmul %5, %6, %cst {dimension_numbers = #tpu.dot_dimension_numbers<[1], [0], [0], [1], [0, 0, 1, 1], [], []>} : vector<16x50xf32>, vector<50x32xf32>, vector<16x32xf32> -> vector<16x32xf32>
    %cst_2 = arith.constant 5.65685415 : f32
    %8 = vector.broadcast %cst_2 : f32 to vector<16x32xf32>
    %9 = arith.mulf %7, %8 : vector<16x32xf32>
    %c0_3 = arith.constant 0 : index
    %c0_4 = arith.constant 0 : index
    %10 = vector.load %arg2[%c0_3, %c0_4] : memref<1248x128xf32, #tpu.memory_space<vmem>>, vector<32x96xf32>
    %c32 = arith.constant 32 : index
    %c0_5 = arith.constant 0 : index
    %11 = vector.load %arg2[%c32, %c0_5] : memref<1248x128xf32, #tpu.memory_space<vmem>>, vector<1x96xf32>
    %c40 = arith.constant 40 : index
    %c0_6 = arith.constant 0 : index
    %12 = vector.load %arg2[%c40, %c0_6] : memref<1248x128xf32, #tpu.memory_space<vmem>>, vector<32x32xf32>
    %c72 = arith.constant 72 : index
    %c0_7 = arith.constant 0 : index
    %13 = vector.load %arg2[%c72, %c0_7] : memref<1248x128xf32, #tpu.memory_space<vmem>>, vector<1x32xf32>
    %c80 = arith.constant 80 : index
    %c0_8 = arith.constant 0 : index
    %14 = vector.load %arg2[%c80, %c0_8] : memref<1248x128xf32, #tpu.memory_space<vmem>>, vector<1x32xf32>
    %c88 = arith.constant 88 : index
    %c0_9 = arith.constant 0 : index
    %15 = vector.load %arg2[%c88, %c0_9] : memref<1248x128xf32, #tpu.memory_space<vmem>>, vector<1x32xf32>
    %cst_10 = arith.constant dense<0.000000e+00> : vector<16x96xf32>
    %16 = tpu.matmul %9, %10, %cst_10 {dimension_numbers = #tpu.dot_dimension_numbers<[1], [0], [0], [1], [0, 0, 1, 1], [], []>} : vector<16x32xf32>, vector<32x96xf32>, vector<16x96xf32> -> vector<16x96xf32>
    %17 = vector.broadcast %11 : vector<1x96xf32> to vector<16x96xf32>
    %18 = arith.addf %16, %17 : vector<16x96xf32>
    %19 = vector.extract_strided_slice %18 {offsets = [0, 0], sizes = [16, 32], strides = [1, 1]} : vector<16x96xf32> to vector<16x32xf32>
    %20 = vector.extract_strided_slice %18 {offsets = [0, 32], sizes = [16, 32], strides = [1, 1]} : vector<16x96xf32> to vector<16x32xf32>
    %21 = vector.extract_strided_slice %18 {offsets = [0, 64], sizes = [16, 32], strides = [1, 1]} : vector<16x96xf32> to vector<16x32xf32>
    %22 = vector.shape_cast %19 : vector<16x32xf32> to vector<2x8x32xf32>
    %23 = vector.extract_strided_slice %22 {offsets = [0, 0, 0], sizes = [2, 8, 8], strides = [1, 1, 1]} : vector<2x8x32xf32> to vector<2x8x8xf32>
    %24 = vector.extract_strided_slice %22 {offsets = [0, 0, 8], sizes = [2, 8, 8], strides = [1, 1, 1]} : vector<2x8x32xf32> to vector<2x8x8xf32>
    %25 = vector.extract_strided_slice %22 {offsets = [0, 0, 16], sizes = [2, 8, 8], strides = [1, 1, 1]} : vector<2x8x32xf32> to vector<2x8x8xf32>
    %26 = vector.extract_strided_slice %22 {offsets = [0, 0, 24], sizes = [2, 8, 8], strides = [1, 1, 1]} : vector<2x8x32xf32> to vector<2x8x8xf32>
    %27 = tpu.concatenate %23, %24, %25, %26 in 0 : vector<2x8x8xf32>, vector<2x8x8xf32>, vector<2x8x8xf32>, vector<2x8x8xf32> -> vector<8x8x8xf32>
    %28 = vector.shape_cast %20 : vector<16x32xf32> to vector<2x8x32xf32>
    %29 = vector.extract_strided_slice %28 {offsets = [0, 0, 0], sizes = [2, 8, 8], strides = [1, 1, 1]} : vector<2x8x32xf32> to vector<2x8x8xf32>
    %30 = vector.extract_strided_slice %28 {offsets = [0, 0, 8], sizes = [2, 8, 8], strides = [1, 1, 1]} : vector<2x8x32xf32> to vector<2x8x8xf32>
    %31 = vector.extract_strided_slice %28 {offsets = [0, 0, 16], sizes = [2, 8, 8], strides = [1, 1, 1]} : vector<2x8x32xf32> to vector<2x8x8xf32>
    %32 = vector.extract_strided_slice %28 {offsets = [0, 0, 24], sizes = [2, 8, 8], strides = [1, 1, 1]} : vector<2x8x32xf32> to vector<2x8x8xf32>
    %33 = tpu.concatenate %29, %30, %31, %32 in 0 : vector<2x8x8xf32>, vector<2x8x8xf32>, vector<2x8x8xf32>, vector<2x8x8xf32> -> vector<8x8x8xf32>
    %34 = vector.shape_cast %21 : vector<16x32xf32> to vector<2x8x32xf32>
    %35 = vector.extract_strided_slice %34 {offsets = [0, 0, 0], sizes = [2, 8, 8], strides = [1, 1, 1]} : vector<2x8x32xf32> to vector<2x8x8xf32>
    %36 = vector.extract_strided_slice %34 {offsets = [0, 0, 8], sizes = [2, 8, 8], strides = [1, 1, 1]} : vector<2x8x32xf32> to vector<2x8x8xf32>
    %37 = vector.extract_strided_slice %34 {offsets = [0, 0, 16], sizes = [2, 8, 8], strides = [1, 1, 1]} : vector<2x8x32xf32> to vector<2x8x8xf32>
    %38 = vector.extract_strided_slice %34 {offsets = [0, 0, 24], sizes = [2, 8, 8], strides = [1, 1, 1]} : vector<2x8x32xf32> to vector<2x8x8xf32>
    %39 = tpu.concatenate %35, %36, %37, %38 in 0 : vector<2x8x8xf32>, vector<2x8x8xf32>, vector<2x8x8xf32>, vector<2x8x8xf32> -> vector<8x8x8xf32>
    "tpu.trace_start"() <{level = 10 : i32, message = "bqd,bkd->bqk"}> : () -> ()
    %cst_11 = arith.constant dense<0.000000e+00> : vector<8x8x8xf32>
    %40 = tpu.matmul %27, %33, %cst_11 {dimension_numbers = #tpu.dot_dimension_numbers<[2], [2], [1], [1], [0, 0, 0, 1, 1, 1], [0], [0]>} : vector<8x8x8xf32>, vector<8x8x8xf32>, vector<8x8x8xf32> -> vector<8x8x8xf32>
    "tpu.trace_stop"() : () -> ()
    %cst_12 = arith.constant 0.353553385 : f32
    %41 = vector.broadcast %cst_12 : f32 to vector<8x8x8xf32>
    %42 = arith.mulf %40, %41 : vector<8x8x8xf32>
    %cst_13 = arith.constant dense<0xFF800000> : vector<8x8xf32>
    %43 = vector.multi_reduction <maximumf>, %42, %cst_13 [2] : vector<8x8x8xf32> to vector<8x8xf32>
    %44 = vector.shape_cast %43 : vector<8x8xf32> to vector<8x8x1xf32>
    %45 = vector.broadcast %44 : vector<8x8x1xf32> to vector<8x8x8xf32>
    %46 = arith.subf %42, %45 : vector<8x8x8xf32>
    %47 = math.exp %46 : vector<8x8x8xf32>
    %cst_14 = arith.constant dense<0.000000e+00> : vector<8x8xf32>
    %48 = vector.multi_reduction <add>, %47, %cst_14 [2] : vector<8x8x8xf32> to vector<8x8xf32>
    %49 = vector.shape_cast %48 : vector<8x8xf32> to vector<8x8x1xf32>
    %50 = tpu.reciprocal %49 {approx = true} : vector<8x8x1xf32> -> vector<8x8x1xf32>
    %51 = vector.broadcast %50 : vector<8x8x1xf32> to vector<8x8x8xf32>
    %52 = arith.mulf %47, %51 : vector<8x8x8xf32>
    "tpu.trace_start"() <{level = 10 : i32, message = "bqk,bkd->bqd"}> : () -> ()
    %cst_15 = arith.constant dense<0.000000e+00> : vector<8x8x8xf32>
    %53 = tpu.matmul %52, %39, %cst_15 {dimension_numbers = #tpu.dot_dimension_numbers<[2], [1], [1], [2], [0, 0, 0, 1, 1, 2], [0], [0]>} : vector<8x8x8xf32>, vector<8x8x8xf32>, vector<8x8x8xf32> -> vector<8x8x8xf32>
    "tpu.trace_stop"() : () -> ()
    %54 = vector.extract_strided_slice %53 {offsets = [0, 0, 0], sizes = [2, 8, 8], strides = [1, 1, 1]} : vector<8x8x8xf32> to vector<2x8x8xf32>
    %55 = vector.shape_cast %54 : vector<2x8x8xf32> to vector<16x8xf32>
    %56 = vector.extract_strided_slice %53 {offsets = [2, 0, 0], sizes = [2, 8, 8], strides = [1, 1, 1]} : vector<8x8x8xf32> to vector<2x8x8xf32>
    %57 = vector.shape_cast %56 : vector<2x8x8xf32> to vector<16x8xf32>
    %58 = vector.extract_strided_slice %53 {offsets = [4, 0, 0], sizes = [2, 8, 8], strides = [1, 1, 1]} : vector<8x8x8xf32> to vector<2x8x8xf32>
    %59 = vector.shape_cast %58 : vector<2x8x8xf32> to vector<16x8xf32>
    %60 = vector.extract_strided_slice %53 {offsets = [6, 0, 0], sizes = [2, 8, 8], strides = [1, 1, 1]} : vector<8x8x8xf32> to vector<2x8x8xf32>
    %61 = vector.shape_cast %60 : vector<2x8x8xf32> to vector<16x8xf32>
    %62 = tpu.concatenate %55, %57, %59, %61 in 1 : vector<16x8xf32>, vector<16x8xf32>, vector<16x8xf32>, vector<16x8xf32> -> vector<16x32xf32>
    %cst_16 = arith.constant dense<0.000000e+00> : vector<16x32xf32>
    %63 = tpu.matmul %62, %12, %cst_16 {dimension_numbers = #tpu.dot_dimension_numbers<[1], [0], [0], [1], [0, 0, 1, 1], [], []>} : vector<16x32xf32>, vector<32x32xf32>, vector<16x32xf32> -> vector<16x32xf32>
    %64 = vector.broadcast %13 : vector<1x32xf32> to vector<16x32xf32>
    %65 = arith.addf %63, %64 : vector<16x32xf32>
    %66 = arith.addf %65, %9 : vector<16x32xf32>
    %cst_17 = arith.constant dense<0.000000e+00> : vector<16xf32>
    %67 = vector.multi_reduction <add>, %66, %cst_17 [1] : vector<16x32xf32> to vector<16xf32>
    %68 = vector.shape_cast %67 : vector<16xf32> to vector<16x1xf32>
    %cst_18 = arith.constant 3.200000e+01 : f32
    %69 = vector.broadcast %cst_18 : f32 to vector<16x1xf32>
    %70 = arith.divf %68, %69 : vector<16x1xf32>
    %71 = vector.broadcast %70 : vector<16x1xf32> to vector<16x32xf32>
    %72 = arith.subf %66, %71 : vector<16x32xf32>
    %73 = arith.mulf %72, %72 : vector<16x32xf32>
    %cst_19 = arith.constant dense<0.000000e+00> : vector<16xf32>
    %74 = vector.multi_reduction <add>, %73, %cst_19 [1] : vector<16x32xf32> to vector<16xf32>
    %75 = vector.shape_cast %74 : vector<16xf32> to vector<16x1xf32>
    %cst_20 = arith.constant 3.200000e+01 : f32
    %76 = vector.broadcast %cst_20 : f32 to vector<16x1xf32>
    %77 = arith.divf %75, %76 : vector<16x1xf32>
    %78 = vector.broadcast %70 : vector<16x1xf32> to vector<16x32xf32>
    %79 = arith.subf %66, %78 : vector<16x32xf32>
    %cst_21 = arith.constant 9.99999974E-6 : f32
    %80 = vector.broadcast %cst_21 : f32 to vector<16x1xf32>
    %81 = arith.addf %77, %80 : vector<16x1xf32>
    %82 = math.rsqrt %81 : vector<16x1xf32>
    %83 = vector.broadcast %82 : vector<16x1xf32> to vector<16x32xf32>
    %84 = arith.mulf %79, %83 : vector<16x32xf32>
    %85 = vector.broadcast %14 : vector<1x32xf32> to vector<16x32xf32>
    %86 = arith.mulf %84, %85 : vector<16x32xf32>
    %87 = vector.broadcast %15 : vector<1x32xf32> to vector<16x32xf32>
    %88 = arith.addf %86, %87 : vector<16x32xf32>
    %c96 = arith.constant 96 : index
    %c0_22 = arith.constant 0 : index
    %89 = vector.load %arg2[%c96, %c0_22] : memref<1248x128xf32, #tpu.memory_space<vmem>>, vector<32x64xf32>
    %c128 = arith.constant 128 : index
    %c0_23 = arith.constant 0 : index
    %90 = vector.load %arg2[%c128, %c0_23] : memref<1248x128xf32, #tpu.memory_space<vmem>>, vector<1x64xf32>
    %c136 = arith.constant 136 : index
    %c0_24 = arith.constant 0 : index
    %91 = vector.load %arg2[%c136, %c0_24] : memref<1248x128xf32, #tpu.memory_space<vmem>>, vector<64x32xf32>
    %c200 = arith.constant 200 : index
    %c0_25 = arith.constant 0 : index
    %92 = vector.load %arg2[%c200, %c0_25] : memref<1248x128xf32, #tpu.memory_space<vmem>>, vector<1x32xf32>
    %c208 = arith.constant 208 : index
    %c0_26 = arith.constant 0 : index
    %93 = vector.load %arg2[%c208, %c0_26] : memref<1248x128xf32, #tpu.memory_space<vmem>>, vector<1x32xf32>
    %c216 = arith.constant 216 : index
    %c0_27 = arith.constant 0 : index
    %94 = vector.load %arg2[%c216, %c0_27] : memref<1248x128xf32, #tpu.memory_space<vmem>>, vector<1x32xf32>
    %cst_28 = arith.constant dense<0.000000e+00> : vector<16x64xf32>
    %95 = tpu.matmul %88, %89, %cst_28 {dimension_numbers = #tpu.dot_dimension_numbers<[1], [0], [0], [1], [0, 0, 1, 1], [], []>} : vector<16x32xf32>, vector<32x64xf32>, vector<16x64xf32> -> vector<16x64xf32>
    %96 = vector.broadcast %90 : vector<1x64xf32> to vector<16x64xf32>
    %97 = arith.addf %95, %96 : vector<16x64xf32>
    %cst_29 = arith.constant 0.000000e+00 : f32
    %98 = vector.broadcast %cst_29 : f32 to vector<16x64xf32>
    %99 = arith.maximumf %97, %98 : vector<16x64xf32>
    %cst_30 = arith.constant dense<0.000000e+00> : vector<16x32xf32>
    %100 = tpu.matmul %99, %91, %cst_30 {dimension_numbers = #tpu.dot_dimension_numbers<[1], [0], [0], [1], [0, 0, 1, 1], [], []>} : vector<16x64xf32>, vector<64x32xf32>, vector<16x32xf32> -> vector<16x32xf32>
    %101 = vector.broadcast %92 : vector<1x32xf32> to vector<16x32xf32>
    %102 = arith.addf %100, %101 : vector<16x32xf32>
    %103 = arith.addf %102, %88 : vector<16x32xf32>
    %cst_31 = arith.constant dense<0.000000e+00> : vector<16xf32>
    %104 = vector.multi_reduction <add>, %103, %cst_31 [1] : vector<16x32xf32> to vector<16xf32>
    %105 = vector.shape_cast %104 : vector<16xf32> to vector<16x1xf32>
    %cst_32 = arith.constant 3.200000e+01 : f32
    %106 = vector.broadcast %cst_32 : f32 to vector<16x1xf32>
    %107 = arith.divf %105, %106 : vector<16x1xf32>
    %108 = vector.broadcast %107 : vector<16x1xf32> to vector<16x32xf32>
    %109 = arith.subf %103, %108 : vector<16x32xf32>
    %110 = arith.mulf %109, %109 : vector<16x32xf32>
    %cst_33 = arith.constant dense<0.000000e+00> : vector<16xf32>
    %111 = vector.multi_reduction <add>, %110, %cst_33 [1] : vector<16x32xf32> to vector<16xf32>
    %112 = vector.shape_cast %111 : vector<16xf32> to vector<16x1xf32>
    %cst_34 = arith.constant 3.200000e+01 : f32
    %113 = vector.broadcast %cst_34 : f32 to vector<16x1xf32>
    %114 = arith.divf %112, %113 : vector<16x1xf32>
    %115 = vector.broadcast %107 : vector<16x1xf32> to vector<16x32xf32>
    %116 = arith.subf %103, %115 : vector<16x32xf32>
    %cst_35 = arith.constant 9.99999974E-6 : f32
    %117 = vector.broadcast %cst_35 : f32 to vector<16x1xf32>
    %118 = arith.addf %114, %117 : vector<16x1xf32>
    %119 = math.rsqrt %118 : vector<16x1xf32>
    %120 = vector.broadcast %119 : vector<16x1xf32> to vector<16x32xf32>
    %121 = arith.mulf %116, %120 : vector<16x32xf32>
    %122 = vector.broadcast %93 : vector<1x32xf32> to vector<16x32xf32>
    %123 = arith.mulf %121, %122 : vector<16x32xf32>
    %124 = vector.broadcast %94 : vector<1x32xf32> to vector<16x32xf32>
    %125 = arith.addf %123, %124 : vector<16x32xf32>
    %c224 = arith.constant 224 : index
    %c0_36 = arith.constant 0 : index
    %126 = vector.load %arg2[%c224, %c0_36] : memref<1248x128xf32, #tpu.memory_space<vmem>>, vector<32x96xf32>
    %c256 = arith.constant 256 : index
    %c0_37 = arith.constant 0 : index
    %127 = vector.load %arg2[%c256, %c0_37] : memref<1248x128xf32, #tpu.memory_space<vmem>>, vector<1x96xf32>
    %c264 = arith.constant 264 : index
    %c0_38 = arith.constant 0 : index
    %128 = vector.load %arg2[%c264, %c0_38] : memref<1248x128xf32, #tpu.memory_space<vmem>>, vector<32x32xf32>
    %c296 = arith.constant 296 : index
    %c0_39 = arith.constant 0 : index
    %129 = vector.load %arg2[%c296, %c0_39] : memref<1248x128xf32, #tpu.memory_space<vmem>>, vector<1x32xf32>
    %c304 = arith.constant 304 : index
    %c0_40 = arith.constant 0 : index
    %130 = vector.load %arg2[%c304, %c0_40] : memref<1248x128xf32, #tpu.memory_space<vmem>>, vector<1x32xf32>
    %c312 = arith.constant 312 : index
    %c0_41 = arith.constant 0 : index
    %131 = vector.load %arg2[%c312, %c0_41] : memref<1248x128xf32, #tpu.memory_space<vmem>>, vector<1x32xf32>
    %cst_42 = arith.constant dense<0.000000e+00> : vector<16x96xf32>
    %132 = tpu.matmul %125, %126, %cst_42 {dimension_numbers = #tpu.dot_dimension_numbers<[1], [0], [0], [1], [0, 0, 1, 1], [], []>} : vector<16x32xf32>, vector<32x96xf32>, vector<16x96xf32> -> vector<16x96xf32>
    %133 = vector.broadcast %127 : vector<1x96xf32> to vector<16x96xf32>
    %134 = arith.addf %132, %133 : vector<16x96xf32>
    %135 = vector.extract_strided_slice %134 {offsets = [0, 0], sizes = [16, 32], strides = [1, 1]} : vector<16x96xf32> to vector<16x32xf32>
    %136 = vector.extract_strided_slice %134 {offsets = [0, 32], sizes = [16, 32], strides = [1, 1]} : vector<16x96xf32> to vector<16x32xf32>
    %137 = vector.extract_strided_slice %134 {offsets = [0, 64], sizes = [16, 32], strides = [1, 1]} : vector<16x96xf32> to vector<16x32xf32>
    %138 = vector.shape_cast %135 : vector<16x32xf32> to vector<2x8x32xf32>
    %139 = vector.extract_strided_slice %138 {offsets = [0, 0, 0], sizes = [2, 8, 8], strides = [1, 1, 1]} : vector<2x8x32xf32> to vector<2x8x8xf32>
    %140 = vector.extract_strided_slice %138 {offsets = [0, 0, 8], sizes = [2, 8, 8], strides = [1, 1, 1]} : vector<2x8x32xf32> to vector<2x8x8xf32>
    %141 = vector.extract_strided_slice %138 {offsets = [0, 0, 16], sizes = [2, 8, 8], strides = [1, 1, 1]} : vector<2x8x32xf32> to vector<2x8x8xf32>
    %142 = vector.extract_strided_slice %138 {offsets = [0, 0, 24], sizes = [2, 8, 8], strides = [1, 1, 1]} : vector<2x8x32xf32> to vector<2x8x8xf32>
    %143 = tpu.concatenate %139, %140, %141, %142 in 0 : vector<2x8x8xf32>, vector<2x8x8xf32>, vector<2x8x8xf32>, vector<2x8x8xf32> -> vector<8x8x8xf32>
    %144 = vector.shape_cast %136 : vector<16x32xf32> to vector<2x8x32xf32>
    %145 = vector.extract_strided_slice %144 {offsets = [0, 0, 0], sizes = [2, 8, 8], strides = [1, 1, 1]} : vector<2x8x32xf32> to vector<2x8x8xf32>
    %146 = vector.extract_strided_slice %144 {offsets = [0, 0, 8], sizes = [2, 8, 8], strides = [1, 1, 1]} : vector<2x8x32xf32> to vector<2x8x8xf32>
    %147 = vector.extract_strided_slice %144 {offsets = [0, 0, 16], sizes = [2, 8, 8], strides = [1, 1, 1]} : vector<2x8x32xf32> to vector<2x8x8xf32>
    %148 = vector.extract_strided_slice %144 {offsets = [0, 0, 24], sizes = [2, 8, 8], strides = [1, 1, 1]} : vector<2x8x32xf32> to vector<2x8x8xf32>
    %149 = tpu.concatenate %145, %146, %147, %148 in 0 : vector<2x8x8xf32>, vector<2x8x8xf32>, vector<2x8x8xf32>, vector<2x8x8xf32> -> vector<8x8x8xf32>
    %150 = vector.shape_cast %137 : vector<16x32xf32> to vector<2x8x32xf32>
    %151 = vector.extract_strided_slice %150 {offsets = [0, 0, 0], sizes = [2, 8, 8], strides = [1, 1, 1]} : vector<2x8x32xf32> to vector<2x8x8xf32>
    %152 = vector.extract_strided_slice %150 {offsets = [0, 0, 8], sizes = [2, 8, 8], strides = [1, 1, 1]} : vector<2x8x32xf32> to vector<2x8x8xf32>
    %153 = vector.extract_strided_slice %150 {offsets = [0, 0, 16], sizes = [2, 8, 8], strides = [1, 1, 1]} : vector<2x8x32xf32> to vector<2x8x8xf32>
    %154 = vector.extract_strided_slice %150 {offsets = [0, 0, 24], sizes = [2, 8, 8], strides = [1, 1, 1]} : vector<2x8x32xf32> to vector<2x8x8xf32>
    %155 = tpu.concatenate %151, %152, %153, %154 in 0 : vector<2x8x8xf32>, vector<2x8x8xf32>, vector<2x8x8xf32>, vector<2x8x8xf32> -> vector<8x8x8xf32>
    "tpu.trace_start"() <{level = 10 : i32, message = "bqd,bkd->bqk"}> : () -> ()
    %cst_43 = arith.constant dense<0.000000e+00> : vector<8x8x8xf32>
    %156 = tpu.matmul %143, %149, %cst_43 {dimension_numbers = #tpu.dot_dimension_numbers<[2], [2], [1], [1], [0, 0, 0, 1, 1, 1], [0], [0]>} : vector<8x8x8xf32>, vector<8x8x8xf32>, vector<8x8x8xf32> -> vector<8x8x8xf32>
    "tpu.trace_stop"() : () -> ()
    %cst_44 = arith.constant 0.353553385 : f32
    %157 = vector.broadcast %cst_44 : f32 to vector<8x8x8xf32>
    %158 = arith.mulf %156, %157 : vector<8x8x8xf32>
    %cst_45 = arith.constant dense<0xFF800000> : vector<8x8xf32>
    %159 = vector.multi_reduction <maximumf>, %158, %cst_45 [2] : vector<8x8x8xf32> to vector<8x8xf32>
    %160 = vector.shape_cast %159 : vector<8x8xf32> to vector<8x8x1xf32>
    %161 = vector.broadcast %160 : vector<8x8x1xf32> to vector<8x8x8xf32>
    %162 = arith.subf %158, %161 : vector<8x8x8xf32>
    %163 = math.exp %162 : vector<8x8x8xf32>
    %cst_46 = arith.constant dense<0.000000e+00> : vector<8x8xf32>
    %164 = vector.multi_reduction <add>, %163, %cst_46 [2] : vector<8x8x8xf32> to vector<8x8xf32>
    %165 = vector.shape_cast %164 : vector<8x8xf32> to vector<8x8x1xf32>
    %166 = tpu.reciprocal %165 {approx = true} : vector<8x8x1xf32> -> vector<8x8x1xf32>
    %167 = vector.broadcast %166 : vector<8x8x1xf32> to vector<8x8x8xf32>
    %168 = arith.mulf %163, %167 : vector<8x8x8xf32>
    "tpu.trace_start"() <{level = 10 : i32, message = "bqk,bkd->bqd"}> : () -> ()
    %cst_47 = arith.constant dense<0.000000e+00> : vector<8x8x8xf32>
    %169 = tpu.matmul %168, %155, %cst_47 {dimension_numbers = #tpu.dot_dimension_numbers<[2], [1], [1], [2], [0, 0, 0, 1, 1, 2], [0], [0]>} : vector<8x8x8xf32>, vector<8x8x8xf32>, vector<8x8x8xf32> -> vector<8x8x8xf32>
    "tpu.trace_stop"() : () -> ()
    %170 = vector.extract_strided_slice %169 {offsets = [0, 0, 0], sizes = [2, 8, 8], strides = [1, 1, 1]} : vector<8x8x8xf32> to vector<2x8x8xf32>
    %171 = vector.shape_cast %170 : vector<2x8x8xf32> to vector<16x8xf32>
    %172 = vector.extract_strided_slice %169 {offsets = [2, 0, 0], sizes = [2, 8, 8], strides = [1, 1, 1]} : vector<8x8x8xf32> to vector<2x8x8xf32>
    %173 = vector.shape_cast %172 : vector<2x8x8xf32> to vector<16x8xf32>
    %174 = vector.extract_strided_slice %169 {offsets = [4, 0, 0], sizes = [2, 8, 8], strides = [1, 1, 1]} : vector<8x8x8xf32> to vector<2x8x8xf32>
    %175 = vector.shape_cast %174 : vector<2x8x8xf32> to vector<16x8xf32>
    %176 = vector.extract_strided_slice %169 {offsets = [6, 0, 0], sizes = [2, 8, 8], strides = [1, 1, 1]} : vector<8x8x8xf32> to vector<2x8x8xf32>
    %177 = vector.shape_cast %176 : vector<2x8x8xf32> to vector<16x8xf32>
    %178 = tpu.concatenate %171, %173, %175, %177 in 1 : vector<16x8xf32>, vector<16x8xf32>, vector<16x8xf32>, vector<16x8xf32> -> vector<16x32xf32>
    %cst_48 = arith.constant dense<0.000000e+00> : vector<16x32xf32>
    %179 = tpu.matmul %178, %128, %cst_48 {dimension_numbers = #tpu.dot_dimension_numbers<[1], [0], [0], [1], [0, 0, 1, 1], [], []>} : vector<16x32xf32>, vector<32x32xf32>, vector<16x32xf32> -> vector<16x32xf32>
    %180 = vector.broadcast %129 : vector<1x32xf32> to vector<16x32xf32>
    %181 = arith.addf %179, %180 : vector<16x32xf32>
    %182 = arith.addf %181, %125 : vector<16x32xf32>
    %cst_49 = arith.constant dense<0.000000e+00> : vector<16xf32>
    %183 = vector.multi_reduction <add>, %182, %cst_49 [1] : vector<16x32xf32> to vector<16xf32>
    %184 = vector.shape_cast %183 : vector<16xf32> to vector<16x1xf32>
    %cst_50 = arith.constant 3.200000e+01 : f32
    %185 = vector.broadcast %cst_50 : f32 to vector<16x1xf32>
    %186 = arith.divf %184, %185 : vector<16x1xf32>
    %187 = vector.broadcast %186 : vector<16x1xf32> to vector<16x32xf32>
    %188 = arith.subf %182, %187 : vector<16x32xf32>
    %189 = arith.mulf %188, %188 : vector<16x32xf32>
    %cst_51 = arith.constant dense<0.000000e+00> : vector<16xf32>
    %190 = vector.multi_reduction <add>, %189, %cst_51 [1] : vector<16x32xf32> to vector<16xf32>
    %191 = vector.shape_cast %190 : vector<16xf32> to vector<16x1xf32>
    %cst_52 = arith.constant 3.200000e+01 : f32
    %192 = vector.broadcast %cst_52 : f32 to vector<16x1xf32>
    %193 = arith.divf %191, %192 : vector<16x1xf32>
    %194 = vector.broadcast %186 : vector<16x1xf32> to vector<16x32xf32>
    %195 = arith.subf %182, %194 : vector<16x32xf32>
    %cst_53 = arith.constant 9.99999974E-6 : f32
    %196 = vector.broadcast %cst_53 : f32 to vector<16x1xf32>
    %197 = arith.addf %193, %196 : vector<16x1xf32>
    %198 = math.rsqrt %197 : vector<16x1xf32>
    %199 = vector.broadcast %198 : vector<16x1xf32> to vector<16x32xf32>
    %200 = arith.mulf %195, %199 : vector<16x32xf32>
    %201 = vector.broadcast %130 : vector<1x32xf32> to vector<16x32xf32>
    %202 = arith.mulf %200, %201 : vector<16x32xf32>
    %203 = vector.broadcast %131 : vector<1x32xf32> to vector<16x32xf32>
    %204 = arith.addf %202, %203 : vector<16x32xf32>
    %c320 = arith.constant 320 : index
    %c0_54 = arith.constant 0 : index
    %205 = vector.load %arg2[%c320, %c0_54] : memref<1248x128xf32, #tpu.memory_space<vmem>>, vector<32x64xf32>
    %c352 = arith.constant 352 : index
    %c0_55 = arith.constant 0 : index
    %206 = vector.load %arg2[%c352, %c0_55] : memref<1248x128xf32, #tpu.memory_space<vmem>>, vector<1x64xf32>
    %c360 = arith.constant 360 : index
    %c0_56 = arith.constant 0 : index
    %207 = vector.load %arg2[%c360, %c0_56] : memref<1248x128xf32, #tpu.memory_space<vmem>>, vector<64x32xf32>
    %c424 = arith.constant 424 : index
    %c0_57 = arith.constant 0 : index
    %208 = vector.load %arg2[%c424, %c0_57] : memref<1248x128xf32, #tpu.memory_space<vmem>>, vector<1x32xf32>
    %c432 = arith.constant 432 : index
    %c0_58 = arith.constant 0 : index
    %209 = vector.load %arg2[%c432, %c0_58] : memref<1248x128xf32, #tpu.memory_space<vmem>>, vector<1x32xf32>
    %c440 = arith.constant 440 : index
    %c0_59 = arith.constant 0 : index
    %210 = vector.load %arg2[%c440, %c0_59] : memref<1248x128xf32, #tpu.memory_space<vmem>>, vector<1x32xf32>
    %cst_60 = arith.constant dense<0.000000e+00> : vector<16x64xf32>
    %211 = tpu.matmul %204, %205, %cst_60 {dimension_numbers = #tpu.dot_dimension_numbers<[1], [0], [0], [1], [0, 0, 1, 1], [], []>} : vector<16x32xf32>, vector<32x64xf32>, vector<16x64xf32> -> vector<16x64xf32>
    %212 = vector.broadcast %206 : vector<1x64xf32> to vector<16x64xf32>
    %213 = arith.addf %211, %212 : vector<16x64xf32>
    %cst_61 = arith.constant 0.000000e+00 : f32
    %214 = vector.broadcast %cst_61 : f32 to vector<16x64xf32>
    %215 = arith.maximumf %213, %214 : vector<16x64xf32>
    %cst_62 = arith.constant dense<0.000000e+00> : vector<16x32xf32>
    %216 = tpu.matmul %215, %207, %cst_62 {dimension_numbers = #tpu.dot_dimension_numbers<[1], [0], [0], [1], [0, 0, 1, 1], [], []>} : vector<16x64xf32>, vector<64x32xf32>, vector<16x32xf32> -> vector<16x32xf32>
    %217 = vector.broadcast %208 : vector<1x32xf32> to vector<16x32xf32>
    %218 = arith.addf %216, %217 : vector<16x32xf32>
    %219 = arith.addf %218, %204 : vector<16x32xf32>
    %cst_63 = arith.constant dense<0.000000e+00> : vector<16xf32>
    %220 = vector.multi_reduction <add>, %219, %cst_63 [1] : vector<16x32xf32> to vector<16xf32>
    %221 = vector.shape_cast %220 : vector<16xf32> to vector<16x1xf32>
    %cst_64 = arith.constant 3.200000e+01 : f32
    %222 = vector.broadcast %cst_64 : f32 to vector<16x1xf32>
    %223 = arith.divf %221, %222 : vector<16x1xf32>
    %224 = vector.broadcast %223 : vector<16x1xf32> to vector<16x32xf32>
    %225 = arith.subf %219, %224 : vector<16x32xf32>
    %226 = arith.mulf %225, %225 : vector<16x32xf32>
    %cst_65 = arith.constant dense<0.000000e+00> : vector<16xf32>
    %227 = vector.multi_reduction <add>, %226, %cst_65 [1] : vector<16x32xf32> to vector<16xf32>
    %228 = vector.shape_cast %227 : vector<16xf32> to vector<16x1xf32>
    %cst_66 = arith.constant 3.200000e+01 : f32
    %229 = vector.broadcast %cst_66 : f32 to vector<16x1xf32>
    %230 = arith.divf %228, %229 : vector<16x1xf32>
    %231 = vector.broadcast %223 : vector<16x1xf32> to vector<16x32xf32>
    %232 = arith.subf %219, %231 : vector<16x32xf32>
    %cst_67 = arith.constant 9.99999974E-6 : f32
    %233 = vector.broadcast %cst_67 : f32 to vector<16x1xf32>
    %234 = arith.addf %230, %233 : vector<16x1xf32>
    %235 = math.rsqrt %234 : vector<16x1xf32>
    %236 = vector.broadcast %235 : vector<16x1xf32> to vector<16x32xf32>
    %237 = arith.mulf %232, %236 : vector<16x32xf32>
    %238 = vector.broadcast %209 : vector<1x32xf32> to vector<16x32xf32>
    %239 = arith.mulf %237, %238 : vector<16x32xf32>
    %240 = vector.broadcast %210 : vector<1x32xf32> to vector<16x32xf32>
    %241 = arith.addf %239, %240 : vector<16x32xf32>
    %c1088 = arith.constant 1088 : index
    %c0_68 = arith.constant 0 : index
    %242 = vector.load %arg2[%c1088, %c0_68] : memref<1248x128xf32, #tpu.memory_space<vmem>>, vector<32x128xf32>
    %cst_69 = arith.constant dense<0.000000e+00> : vector<16x128xf32>
    %243 = tpu.matmul %241, %242, %cst_69 {dimension_numbers = #tpu.dot_dimension_numbers<[1], [0], [0], [1], [0, 0, 1, 1], [], []>} : vector<16x32xf32>, vector<32x128xf32>, vector<16x128xf32> -> vector<16x128xf32>
    %c1120 = arith.constant 1120 : index
    %c0_70 = arith.constant 0 : index
    %244 = vector.load %arg2[%c1120, %c0_70] : memref<1248x128xf32, #tpu.memory_space<vmem>>, vector<1x128xf32>
    %245 = vector.broadcast %244 : vector<1x128xf32> to vector<16x128xf32>
    %246 = arith.addf %243, %245 : vector<16x128xf32>
    %247 = tpu.iota {dimensions = array<i32: 0>} : vector<8x8xi32>
    %248 = tpu.iota {dimensions = array<i32: 1>} : vector<8x8xi32>
    %249 = arith.cmpi sgt, %248, %247 : vector<8x8xi32>
    %c0_71 = arith.constant 0 : index
    %c0_72 = arith.constant 0 : index
    %250 = vector.load %arg1[%c0_71, %c0_72] : memref<16x1xi32, #tpu.memory_space<vmem>>, vector<16x1xi32>
    %251 = tpu.iota {dimensions = array<i32: 1>} : vector<16x20xi32>
    %252 = vector.broadcast %250 : vector<16x1xi32> to vector<16x20xi32>
    %253 = arith.cmpi eq, %251, %252 : vector<16x20xi32>
    %254 = arith.extui %253 : vector<16x20xi1> to vector<16x20xi32>
    %255 = arith.sitofp %254 : vector<16x20xi32> to vector<16x20xf32>
    %c1224 = arith.constant 1224 : index
    %c0_73 = arith.constant 0 : index
    %256 = vector.load %arg2[%c1224, %c0_73] : memref<1248x128xf32, #tpu.memory_space<vmem>>, vector<20x32xf32>
    %cst_74 = arith.constant dense<0.000000e+00> : vector<16x32xf32>
    %257 = tpu.matmul %255, %256, %cst_74 {dimension_numbers = #tpu.dot_dimension_numbers<[1], [0], [0], [1], [0, 0, 1, 1], [], []>} : vector<16x20xf32>, vector<20x32xf32>, vector<16x32xf32> -> vector<16x32xf32>
    %cst_75 = arith.constant 5.65685415 : f32
    %258 = vector.broadcast %cst_75 : f32 to vector<16x32xf32>
    %259 = arith.mulf %257, %258 : vector<16x32xf32>
    %c448 = arith.constant 448 : index
    %c0_76 = arith.constant 0 : index
    %260 = vector.load %arg2[%c448, %c0_76] : memref<1248x128xf32, #tpu.memory_space<vmem>>, vector<32x96xf32>
    %c480 = arith.constant 480 : index
    %c0_77 = arith.constant 0 : index
    %261 = vector.load %arg2[%c480, %c0_77] : memref<1248x128xf32, #tpu.memory_space<vmem>>, vector<1x96xf32>
    %c488 = arith.constant 488 : index
    %c0_78 = arith.constant 0 : index
    %262 = vector.load %arg2[%c488, %c0_78] : memref<1248x128xf32, #tpu.memory_space<vmem>>, vector<32x32xf32>
    %c520 = arith.constant 520 : index
    %c0_79 = arith.constant 0 : index
    %263 = vector.load %arg2[%c520, %c0_79] : memref<1248x128xf32, #tpu.memory_space<vmem>>, vector<1x32xf32>
    %c528 = arith.constant 528 : index
    %c0_80 = arith.constant 0 : index
    %264 = vector.load %arg2[%c528, %c0_80] : memref<1248x128xf32, #tpu.memory_space<vmem>>, vector<1x32xf32>
    %c536 = arith.constant 536 : index
    %c0_81 = arith.constant 0 : index
    %265 = vector.load %arg2[%c536, %c0_81] : memref<1248x128xf32, #tpu.memory_space<vmem>>, vector<1x32xf32>
    %cst_82 = arith.constant dense<0.000000e+00> : vector<16x96xf32>
    %266 = tpu.matmul %259, %260, %cst_82 {dimension_numbers = #tpu.dot_dimension_numbers<[1], [0], [0], [1], [0, 0, 1, 1], [], []>} : vector<16x32xf32>, vector<32x96xf32>, vector<16x96xf32> -> vector<16x96xf32>
    %267 = vector.broadcast %261 : vector<1x96xf32> to vector<16x96xf32>
    %268 = arith.addf %266, %267 : vector<16x96xf32>
    %269 = vector.extract_strided_slice %268 {offsets = [0, 0], sizes = [16, 32], strides = [1, 1]} : vector<16x96xf32> to vector<16x32xf32>
    %270 = vector.extract_strided_slice %268 {offsets = [0, 32], sizes = [16, 32], strides = [1, 1]} : vector<16x96xf32> to vector<16x32xf32>
    %271 = vector.extract_strided_slice %268 {offsets = [0, 64], sizes = [16, 32], strides = [1, 1]} : vector<16x96xf32> to vector<16x32xf32>
    %272 = vector.shape_cast %269 : vector<16x32xf32> to vector<2x8x32xf32>
    %273 = vector.extract_strided_slice %272 {offsets = [0, 0, 0], sizes = [2, 8, 8], strides = [1, 1, 1]} : vector<2x8x32xf32> to vector<2x8x8xf32>
    %274 = vector.extract_strided_slice %272 {offsets = [0, 0, 8], sizes = [2, 8, 8], strides = [1, 1, 1]} : vector<2x8x32xf32> to vector<2x8x8xf32>
    %275 = vector.extract_strided_slice %272 {offsets = [0, 0, 16], sizes = [2, 8, 8], strides = [1, 1, 1]} : vector<2x8x32xf32> to vector<2x8x8xf32>
    %276 = vector.extract_strided_slice %272 {offsets = [0, 0, 24], sizes = [2, 8, 8], strides = [1, 1, 1]} : vector<2x8x32xf32> to vector<2x8x8xf32>
    %277 = tpu.concatenate %273, %274, %275, %276 in 0 : vector<2x8x8xf32>, vector<2x8x8xf32>, vector<2x8x8xf32>, vector<2x8x8xf32> -> vector<8x8x8xf32>
    %278 = vector.shape_cast %270 : vector<16x32xf32> to vector<2x8x32xf32>
    %279 = vector.extract_strided_slice %278 {offsets = [0, 0, 0], sizes = [2, 8, 8], strides = [1, 1, 1]} : vector<2x8x32xf32> to vector<2x8x8xf32>
    %280 = vector.extract_strided_slice %278 {offsets = [0, 0, 8], sizes = [2, 8, 8], strides = [1, 1, 1]} : vector<2x8x32xf32> to vector<2x8x8xf32>
    %281 = vector.extract_strided_slice %278 {offsets = [0, 0, 16], sizes = [2, 8, 8], strides = [1, 1, 1]} : vector<2x8x32xf32> to vector<2x8x8xf32>
    %282 = vector.extract_strided_slice %278 {offsets = [0, 0, 24], sizes = [2, 8, 8], strides = [1, 1, 1]} : vector<2x8x32xf32> to vector<2x8x8xf32>
    %283 = tpu.concatenate %279, %280, %281, %282 in 0 : vector<2x8x8xf32>, vector<2x8x8xf32>, vector<2x8x8xf32>, vector<2x8x8xf32> -> vector<8x8x8xf32>
    %284 = vector.shape_cast %271 : vector<16x32xf32> to vector<2x8x32xf32>
    %285 = vector.extract_strided_slice %284 {offsets = [0, 0, 0], sizes = [2, 8, 8], strides = [1, 1, 1]} : vector<2x8x32xf32> to vector<2x8x8xf32>
    %286 = vector.extract_strided_slice %284 {offsets = [0, 0, 8], sizes = [2, 8, 8], strides = [1, 1, 1]} : vector<2x8x32xf32> to vector<2x8x8xf32>
    %287 = vector.extract_strided_slice %284 {offsets = [0, 0, 16], sizes = [2, 8, 8], strides = [1, 1, 1]} : vector<2x8x32xf32> to vector<2x8x8xf32>
    %288 = vector.extract_strided_slice %284 {offsets = [0, 0, 24], sizes = [2, 8, 8], strides = [1, 1, 1]} : vector<2x8x32xf32> to vector<2x8x8xf32>
    %289 = tpu.concatenate %285, %286, %287, %288 in 0 : vector<2x8x8xf32>, vector<2x8x8xf32>, vector<2x8x8xf32>, vector<2x8x8xf32> -> vector<8x8x8xf32>
    "tpu.trace_start"() <{level = 10 : i32, message = "bqd,bkd->bqk"}> : () -> ()
    %cst_83 = arith.constant dense<0.000000e+00> : vector<8x8x8xf32>
    %290 = tpu.matmul %277, %283, %cst_83 {dimension_numbers = #tpu.dot_dimension_numbers<[2], [2], [1], [1], [0, 0, 0, 1, 1, 1], [0], [0]>} : vector<8x8x8xf32>, vector<8x8x8xf32>, vector<8x8x8xf32> -> vector<8x8x8xf32>
    "tpu.trace_stop"() : () -> ()
    %cst_84 = arith.constant 0.353553385 : f32
    %291 = vector.broadcast %cst_84 : f32 to vector<8x8x8xf32>
    %292 = arith.mulf %290, %291 : vector<8x8x8xf32>
    %293 = vector.shape_cast %249 : vector<8x8xi1> to vector<1x8x8xi1>
    %cst_85 = arith.constant -1.000000e+09 : f32
    %294 = vector.shape_cast %293 : vector<1x8x8xi1> to vector<1x8x8xi1>
    %295 = vector.broadcast %294 : vector<1x8x8xi1> to vector<8x8x8xi1>
    %296 = vector.broadcast %cst_85 : f32 to vector<8x8x8xf32>
    %297 = arith.select %295, %296, %292 : vector<8x8x8xi1>, vector<8x8x8xf32>
    %cst_86 = arith.constant dense<0xFF800000> : vector<8x8xf32>
    %298 = vector.multi_reduction <maximumf>, %297, %cst_86 [2] : vector<8x8x8xf32> to vector<8x8xf32>
    %299 = vector.shape_cast %298 : vector<8x8xf32> to vector<8x8x1xf32>
    %300 = vector.broadcast %299 : vector<8x8x1xf32> to vector<8x8x8xf32>
    %301 = arith.subf %297, %300 : vector<8x8x8xf32>
    %302 = math.exp %301 : vector<8x8x8xf32>
    %cst_87 = arith.constant dense<0.000000e+00> : vector<8x8xf32>
    %303 = vector.multi_reduction <add>, %302, %cst_87 [2] : vector<8x8x8xf32> to vector<8x8xf32>
    %304 = vector.shape_cast %303 : vector<8x8xf32> to vector<8x8x1xf32>
    %305 = tpu.reciprocal %304 {approx = true} : vector<8x8x1xf32> -> vector<8x8x1xf32>
    %306 = vector.broadcast %305 : vector<8x8x1xf32> to vector<8x8x8xf32>
    %307 = arith.mulf %302, %306 : vector<8x8x8xf32>
    "tpu.trace_start"() <{level = 10 : i32, message = "bqk,bkd->bqd"}> : () -> ()
    %cst_88 = arith.constant dense<0.000000e+00> : vector<8x8x8xf32>
    %308 = tpu.matmul %307, %289, %cst_88 {dimension_numbers = #tpu.dot_dimension_numbers<[2], [1], [1], [2], [0, 0, 0, 1, 1, 2], [0], [0]>} : vector<8x8x8xf32>, vector<8x8x8xf32>, vector<8x8x8xf32> -> vector<8x8x8xf32>
    "tpu.trace_stop"() : () -> ()
    %309 = vector.extract_strided_slice %308 {offsets = [0, 0, 0], sizes = [2, 8, 8], strides = [1, 1, 1]} : vector<8x8x8xf32> to vector<2x8x8xf32>
    %310 = vector.shape_cast %309 : vector<2x8x8xf32> to vector<16x8xf32>
    %311 = vector.extract_strided_slice %308 {offsets = [2, 0, 0], sizes = [2, 8, 8], strides = [1, 1, 1]} : vector<8x8x8xf32> to vector<2x8x8xf32>
    %312 = vector.shape_cast %311 : vector<2x8x8xf32> to vector<16x8xf32>
    %313 = vector.extract_strided_slice %308 {offsets = [4, 0, 0], sizes = [2, 8, 8], strides = [1, 1, 1]} : vector<8x8x8xf32> to vector<2x8x8xf32>
    %314 = vector.shape_cast %313 : vector<2x8x8xf32> to vector<16x8xf32>
    %315 = vector.extract_strided_slice %308 {offsets = [6, 0, 0], sizes = [2, 8, 8], strides = [1, 1, 1]} : vector<8x8x8xf32> to vector<2x8x8xf32>
    %316 = vector.shape_cast %315 : vector<2x8x8xf32> to vector<16x8xf32>
    %317 = tpu.concatenate %310, %312, %314, %316 in 1 : vector<16x8xf32>, vector<16x8xf32>, vector<16x8xf32>, vector<16x8xf32> -> vector<16x32xf32>
    %cst_89 = arith.constant dense<0.000000e+00> : vector<16x32xf32>
    %318 = tpu.matmul %317, %262, %cst_89 {dimension_numbers = #tpu.dot_dimension_numbers<[1], [0], [0], [1], [0, 0, 1, 1], [], []>} : vector<16x32xf32>, vector<32x32xf32>, vector<16x32xf32> -> vector<16x32xf32>
    %319 = vector.broadcast %263 : vector<1x32xf32> to vector<16x32xf32>
    %320 = arith.addf %318, %319 : vector<16x32xf32>
    %321 = arith.addf %320, %259 : vector<16x32xf32>
    %cst_90 = arith.constant dense<0.000000e+00> : vector<16xf32>
    %322 = vector.multi_reduction <add>, %321, %cst_90 [1] : vector<16x32xf32> to vector<16xf32>
    %323 = vector.shape_cast %322 : vector<16xf32> to vector<16x1xf32>
    %cst_91 = arith.constant 3.200000e+01 : f32
    %324 = vector.broadcast %cst_91 : f32 to vector<16x1xf32>
    %325 = arith.divf %323, %324 : vector<16x1xf32>
    %326 = vector.broadcast %325 : vector<16x1xf32> to vector<16x32xf32>
    %327 = arith.subf %321, %326 : vector<16x32xf32>
    %328 = arith.mulf %327, %327 : vector<16x32xf32>
    %cst_92 = arith.constant dense<0.000000e+00> : vector<16xf32>
    %329 = vector.multi_reduction <add>, %328, %cst_92 [1] : vector<16x32xf32> to vector<16xf32>
    %330 = vector.shape_cast %329 : vector<16xf32> to vector<16x1xf32>
    %cst_93 = arith.constant 3.200000e+01 : f32
    %331 = vector.broadcast %cst_93 : f32 to vector<16x1xf32>
    %332 = arith.divf %330, %331 : vector<16x1xf32>
    %333 = vector.broadcast %325 : vector<16x1xf32> to vector<16x32xf32>
    %334 = arith.subf %321, %333 : vector<16x32xf32>
    %cst_94 = arith.constant 9.99999974E-6 : f32
    %335 = vector.broadcast %cst_94 : f32 to vector<16x1xf32>
    %336 = arith.addf %332, %335 : vector<16x1xf32>
    %337 = math.rsqrt %336 : vector<16x1xf32>
    %338 = vector.broadcast %337 : vector<16x1xf32> to vector<16x32xf32>
    %339 = arith.mulf %334, %338 : vector<16x32xf32>
    %340 = vector.broadcast %264 : vector<1x32xf32> to vector<16x32xf32>
    %341 = arith.mulf %339, %340 : vector<16x32xf32>
    %342 = vector.broadcast %265 : vector<1x32xf32> to vector<16x32xf32>
    %343 = arith.addf %341, %342 : vector<16x32xf32>
    %344 = vector.extract_strided_slice %246 {offsets = [0, 0], sizes = [16, 32], strides = [1, 1]} : vector<16x128xf32> to vector<16x32xf32>
    %345 = vector.extract_strided_slice %246 {offsets = [0, 32], sizes = [16, 32], strides = [1, 1]} : vector<16x128xf32> to vector<16x32xf32>
    %c544 = arith.constant 544 : index
    %c0_95 = arith.constant 0 : index
    %346 = vector.load %arg2[%c544, %c0_95] : memref<1248x128xf32, #tpu.memory_space<vmem>>, vector<32x32xf32>
    %c576 = arith.constant 576 : index
    %c0_96 = arith.constant 0 : index
    %347 = vector.load %arg2[%c576, %c0_96] : memref<1248x128xf32, #tpu.memory_space<vmem>>, vector<1x32xf32>
    %c584 = arith.constant 584 : index
    %c0_97 = arith.constant 0 : index
    %348 = vector.load %arg2[%c584, %c0_97] : memref<1248x128xf32, #tpu.memory_space<vmem>>, vector<32x32xf32>
    %c616 = arith.constant 616 : index
    %c0_98 = arith.constant 0 : index
    %349 = vector.load %arg2[%c616, %c0_98] : memref<1248x128xf32, #tpu.memory_space<vmem>>, vector<1x32xf32>
    %c624 = arith.constant 624 : index
    %c0_99 = arith.constant 0 : index
    %350 = vector.load %arg2[%c624, %c0_99] : memref<1248x128xf32, #tpu.memory_space<vmem>>, vector<1x32xf32>
    %c632 = arith.constant 632 : index
    %c0_100 = arith.constant 0 : index
    %351 = vector.load %arg2[%c632, %c0_100] : memref<1248x128xf32, #tpu.memory_space<vmem>>, vector<1x32xf32>
    %cst_101 = arith.constant dense<0.000000e+00> : vector<16x32xf32>
    %352 = tpu.matmul %343, %346, %cst_101 {dimension_numbers = #tpu.dot_dimension_numbers<[1], [0], [0], [1], [0, 0, 1, 1], [], []>} : vector<16x32xf32>, vector<32x32xf32>, vector<16x32xf32> -> vector<16x32xf32>
    %353 = vector.broadcast %347 : vector<1x32xf32> to vector<16x32xf32>
    %354 = arith.addf %352, %353 : vector<16x32xf32>
    %355 = vector.shape_cast %354 : vector<16x32xf32> to vector<2x8x32xf32>
    %356 = vector.extract_strided_slice %355 {offsets = [0, 0, 0], sizes = [2, 8, 8], strides = [1, 1, 1]} : vector<2x8x32xf32> to vector<2x8x8xf32>
    %357 = vector.extract_strided_slice %355 {offsets = [0, 0, 8], sizes = [2, 8, 8], strides = [1, 1, 1]} : vector<2x8x32xf32> to vector<2x8x8xf32>
    %358 = vector.extract_strided_slice %355 {offsets = [0, 0, 16], sizes = [2, 8, 8], strides = [1, 1, 1]} : vector<2x8x32xf32> to vector<2x8x8xf32>
    %359 = vector.extract_strided_slice %355 {offsets = [0, 0, 24], sizes = [2, 8, 8], strides = [1, 1, 1]} : vector<2x8x32xf32> to vector<2x8x8xf32>
    %360 = tpu.concatenate %356, %357, %358, %359 in 0 : vector<2x8x8xf32>, vector<2x8x8xf32>, vector<2x8x8xf32>, vector<2x8x8xf32> -> vector<8x8x8xf32>
    %361 = vector.shape_cast %344 : vector<16x32xf32> to vector<2x8x32xf32>
    %362 = vector.extract_strided_slice %361 {offsets = [0, 0, 0], sizes = [2, 8, 8], strides = [1, 1, 1]} : vector<2x8x32xf32> to vector<2x8x8xf32>
    %363 = vector.extract_strided_slice %361 {offsets = [0, 0, 8], sizes = [2, 8, 8], strides = [1, 1, 1]} : vector<2x8x32xf32> to vector<2x8x8xf32>
    %364 = vector.extract_strided_slice %361 {offsets = [0, 0, 16], sizes = [2, 8, 8], strides = [1, 1, 1]} : vector<2x8x32xf32> to vector<2x8x8xf32>
    %365 = vector.extract_strided_slice %361 {offsets = [0, 0, 24], sizes = [2, 8, 8], strides = [1, 1, 1]} : vector<2x8x32xf32> to vector<2x8x8xf32>
    %366 = tpu.concatenate %362, %363, %364, %365 in 0 : vector<2x8x8xf32>, vector<2x8x8xf32>, vector<2x8x8xf32>, vector<2x8x8xf32> -> vector<8x8x8xf32>
    %367 = vector.shape_cast %345 : vector<16x32xf32> to vector<2x8x32xf32>
    %368 = vector.extract_strided_slice %367 {offsets = [0, 0, 0], sizes = [2, 8, 8], strides = [1, 1, 1]} : vector<2x8x32xf32> to vector<2x8x8xf32>
    %369 = vector.extract_strided_slice %367 {offsets = [0, 0, 8], sizes = [2, 8, 8], strides = [1, 1, 1]} : vector<2x8x32xf32> to vector<2x8x8xf32>
    %370 = vector.extract_strided_slice %367 {offsets = [0, 0, 16], sizes = [2, 8, 8], strides = [1, 1, 1]} : vector<2x8x32xf32> to vector<2x8x8xf32>
    %371 = vector.extract_strided_slice %367 {offsets = [0, 0, 24], sizes = [2, 8, 8], strides = [1, 1, 1]} : vector<2x8x32xf32> to vector<2x8x8xf32>
    %372 = tpu.concatenate %368, %369, %370, %371 in 0 : vector<2x8x8xf32>, vector<2x8x8xf32>, vector<2x8x8xf32>, vector<2x8x8xf32> -> vector<8x8x8xf32>
    "tpu.trace_start"() <{level = 10 : i32, message = "bqd,bkd->bqk"}> : () -> ()
    %cst_102 = arith.constant dense<0.000000e+00> : vector<8x8x8xf32>
    %373 = tpu.matmul %360, %366, %cst_102 {dimension_numbers = #tpu.dot_dimension_numbers<[2], [2], [1], [1], [0, 0, 0, 1, 1, 1], [0], [0]>} : vector<8x8x8xf32>, vector<8x8x8xf32>, vector<8x8x8xf32> -> vector<8x8x8xf32>
    "tpu.trace_stop"() : () -> ()
    %cst_103 = arith.constant 0.353553385 : f32
    %374 = vector.broadcast %cst_103 : f32 to vector<8x8x8xf32>
    %375 = arith.mulf %373, %374 : vector<8x8x8xf32>
    %cst_104 = arith.constant dense<0xFF800000> : vector<8x8xf32>
    %376 = vector.multi_reduction <maximumf>, %375, %cst_104 [2] : vector<8x8x8xf32> to vector<8x8xf32>
    %377 = vector.shape_cast %376 : vector<8x8xf32> to vector<8x8x1xf32>
    %378 = vector.broadcast %377 : vector<8x8x1xf32> to vector<8x8x8xf32>
    %379 = arith.subf %375, %378 : vector<8x8x8xf32>
    %380 = math.exp %379 : vector<8x8x8xf32>
    %cst_105 = arith.constant dense<0.000000e+00> : vector<8x8xf32>
    %381 = vector.multi_reduction <add>, %380, %cst_105 [2] : vector<8x8x8xf32> to vector<8x8xf32>
    %382 = vector.shape_cast %381 : vector<8x8xf32> to vector<8x8x1xf32>
    %383 = tpu.reciprocal %382 {approx = true} : vector<8x8x1xf32> -> vector<8x8x1xf32>
    %384 = vector.broadcast %383 : vector<8x8x1xf32> to vector<8x8x8xf32>
    %385 = arith.mulf %380, %384 : vector<8x8x8xf32>
    "tpu.trace_start"() <{level = 10 : i32, message = "bqk,bkd->bqd"}> : () -> ()
    %cst_106 = arith.constant dense<0.000000e+00> : vector<8x8x8xf32>
    %386 = tpu.matmul %385, %372, %cst_106 {dimension_numbers = #tpu.dot_dimension_numbers<[2], [1], [1], [2], [0, 0, 0, 1, 1, 2], [0], [0]>} : vector<8x8x8xf32>, vector<8x8x8xf32>, vector<8x8x8xf32> -> vector<8x8x8xf32>
    "tpu.trace_stop"() : () -> ()
    %387 = vector.extract_strided_slice %386 {offsets = [0, 0, 0], sizes = [2, 8, 8], strides = [1, 1, 1]} : vector<8x8x8xf32> to vector<2x8x8xf32>
    %388 = vector.shape_cast %387 : vector<2x8x8xf32> to vector<16x8xf32>
    %389 = vector.extract_strided_slice %386 {offsets = [2, 0, 0], sizes = [2, 8, 8], strides = [1, 1, 1]} : vector<8x8x8xf32> to vector<2x8x8xf32>
    %390 = vector.shape_cast %389 : vector<2x8x8xf32> to vector<16x8xf32>
    %391 = vector.extract_strided_slice %386 {offsets = [4, 0, 0], sizes = [2, 8, 8], strides = [1, 1, 1]} : vector<8x8x8xf32> to vector<2x8x8xf32>
    %392 = vector.shape_cast %391 : vector<2x8x8xf32> to vector<16x8xf32>
    %393 = vector.extract_strided_slice %386 {offsets = [6, 0, 0], sizes = [2, 8, 8], strides = [1, 1, 1]} : vector<8x8x8xf32> to vector<2x8x8xf32>
    %394 = vector.shape_cast %393 : vector<2x8x8xf32> to vector<16x8xf32>
    %395 = tpu.concatenate %388, %390, %392, %394 in 1 : vector<16x8xf32>, vector<16x8xf32>, vector<16x8xf32>, vector<16x8xf32> -> vector<16x32xf32>
    %cst_107 = arith.constant dense<0.000000e+00> : vector<16x32xf32>
    %396 = tpu.matmul %395, %348, %cst_107 {dimension_numbers = #tpu.dot_dimension_numbers<[1], [0], [0], [1], [0, 0, 1, 1], [], []>} : vector<16x32xf32>, vector<32x32xf32>, vector<16x32xf32> -> vector<16x32xf32>
    %397 = vector.broadcast %349 : vector<1x32xf32> to vector<16x32xf32>
    %398 = arith.addf %396, %397 : vector<16x32xf32>
    %399 = arith.addf %398, %343 : vector<16x32xf32>
    %cst_108 = arith.constant dense<0.000000e+00> : vector<16xf32>
    %400 = vector.multi_reduction <add>, %399, %cst_108 [1] : vector<16x32xf32> to vector<16xf32>
    %401 = vector.shape_cast %400 : vector<16xf32> to vector<16x1xf32>
    %cst_109 = arith.constant 3.200000e+01 : f32
    %402 = vector.broadcast %cst_109 : f32 to vector<16x1xf32>
    %403 = arith.divf %401, %402 : vector<16x1xf32>
    %404 = vector.broadcast %403 : vector<16x1xf32> to vector<16x32xf32>
    %405 = arith.subf %399, %404 : vector<16x32xf32>
    %406 = arith.mulf %405, %405 : vector<16x32xf32>
    %cst_110 = arith.constant dense<0.000000e+00> : vector<16xf32>
    %407 = vector.multi_reduction <add>, %406, %cst_110 [1] : vector<16x32xf32> to vector<16xf32>
    %408 = vector.shape_cast %407 : vector<16xf32> to vector<16x1xf32>
    %cst_111 = arith.constant 3.200000e+01 : f32
    %409 = vector.broadcast %cst_111 : f32 to vector<16x1xf32>
    %410 = arith.divf %408, %409 : vector<16x1xf32>
    %411 = vector.broadcast %403 : vector<16x1xf32> to vector<16x32xf32>
    %412 = arith.subf %399, %411 : vector<16x32xf32>
    %cst_112 = arith.constant 9.99999974E-6 : f32
    %413 = vector.broadcast %cst_112 : f32 to vector<16x1xf32>
    %414 = arith.addf %410, %413 : vector<16x1xf32>
    %415 = math.rsqrt %414 : vector<16x1xf32>
    %416 = vector.broadcast %415 : vector<16x1xf32> to vector<16x32xf32>
    %417 = arith.mulf %412, %416 : vector<16x32xf32>
    %418 = vector.broadcast %350 : vector<1x32xf32> to vector<16x32xf32>
    %419 = arith.mulf %417, %418 : vector<16x32xf32>
    %420 = vector.broadcast %351 : vector<1x32xf32> to vector<16x32xf32>
    %421 = arith.addf %419, %420 : vector<16x32xf32>
    %c640 = arith.constant 640 : index
    %c0_113 = arith.constant 0 : index
    %422 = vector.load %arg2[%c640, %c0_113] : memref<1248x128xf32, #tpu.memory_space<vmem>>, vector<32x64xf32>
    %c672 = arith.constant 672 : index
    %c0_114 = arith.constant 0 : index
    %423 = vector.load %arg2[%c672, %c0_114] : memref<1248x128xf32, #tpu.memory_space<vmem>>, vector<1x64xf32>
    %c680 = arith.constant 680 : index
    %c0_115 = arith.constant 0 : index
    %424 = vector.load %arg2[%c680, %c0_115] : memref<1248x128xf32, #tpu.memory_space<vmem>>, vector<64x32xf32>
    %c744 = arith.constant 744 : index
    %c0_116 = arith.constant 0 : index
    %425 = vector.load %arg2[%c744, %c0_116] : memref<1248x128xf32, #tpu.memory_space<vmem>>, vector<1x32xf32>
    %c752 = arith.constant 752 : index
    %c0_117 = arith.constant 0 : index
    %426 = vector.load %arg2[%c752, %c0_117] : memref<1248x128xf32, #tpu.memory_space<vmem>>, vector<1x32xf32>
    %c760 = arith.constant 760 : index
    %c0_118 = arith.constant 0 : index
    %427 = vector.load %arg2[%c760, %c0_118] : memref<1248x128xf32, #tpu.memory_space<vmem>>, vector<1x32xf32>
    %cst_119 = arith.constant dense<0.000000e+00> : vector<16x64xf32>
    %428 = tpu.matmul %421, %422, %cst_119 {dimension_numbers = #tpu.dot_dimension_numbers<[1], [0], [0], [1], [0, 0, 1, 1], [], []>} : vector<16x32xf32>, vector<32x64xf32>, vector<16x64xf32> -> vector<16x64xf32>
    %429 = vector.broadcast %423 : vector<1x64xf32> to vector<16x64xf32>
    %430 = arith.addf %428, %429 : vector<16x64xf32>
    %cst_120 = arith.constant 0.000000e+00 : f32
    %431 = vector.broadcast %cst_120 : f32 to vector<16x64xf32>
    %432 = arith.maximumf %430, %431 : vector<16x64xf32>
    %cst_121 = arith.constant dense<0.000000e+00> : vector<16x32xf32>
    %433 = tpu.matmul %432, %424, %cst_121 {dimension_numbers = #tpu.dot_dimension_numbers<[1], [0], [0], [1], [0, 0, 1, 1], [], []>} : vector<16x64xf32>, vector<64x32xf32>, vector<16x32xf32> -> vector<16x32xf32>
    %434 = vector.broadcast %425 : vector<1x32xf32> to vector<16x32xf32>
    %435 = arith.addf %433, %434 : vector<16x32xf32>
    %436 = arith.addf %435, %421 : vector<16x32xf32>
    %cst_122 = arith.constant dense<0.000000e+00> : vector<16xf32>
    %437 = vector.multi_reduction <add>, %436, %cst_122 [1] : vector<16x32xf32> to vector<16xf32>
    %438 = vector.shape_cast %437 : vector<16xf32> to vector<16x1xf32>
    %cst_123 = arith.constant 3.200000e+01 : f32
    %439 = vector.broadcast %cst_123 : f32 to vector<16x1xf32>
    %440 = arith.divf %438, %439 : vector<16x1xf32>
    %441 = vector.broadcast %440 : vector<16x1xf32> to vector<16x32xf32>
    %442 = arith.subf %436, %441 : vector<16x32xf32>
    %443 = arith.mulf %442, %442 : vector<16x32xf32>
    %cst_124 = arith.constant dense<0.000000e+00> : vector<16xf32>
    %444 = vector.multi_reduction <add>, %443, %cst_124 [1] : vector<16x32xf32> to vector<16xf32>
    %445 = vector.shape_cast %444 : vector<16xf32> to vector<16x1xf32>
    %cst_125 = arith.constant 3.200000e+01 : f32
    %446 = vector.broadcast %cst_125 : f32 to vector<16x1xf32>
    %447 = arith.divf %445, %446 : vector<16x1xf32>
    %448 = vector.broadcast %440 : vector<16x1xf32> to vector<16x32xf32>
    %449 = arith.subf %436, %448 : vector<16x32xf32>
    %cst_126 = arith.constant 9.99999974E-6 : f32
    %450 = vector.broadcast %cst_126 : f32 to vector<16x1xf32>
    %451 = arith.addf %447, %450 : vector<16x1xf32>
    %452 = math.rsqrt %451 : vector<16x1xf32>
    %453 = vector.broadcast %452 : vector<16x1xf32> to vector<16x32xf32>
    %454 = arith.mulf %449, %453 : vector<16x32xf32>
    %455 = vector.broadcast %426 : vector<1x32xf32> to vector<16x32xf32>
    %456 = arith.mulf %454, %455 : vector<16x32xf32>
    %457 = vector.broadcast %427 : vector<1x32xf32> to vector<16x32xf32>
    %458 = arith.addf %456, %457 : vector<16x32xf32>
    %c768 = arith.constant 768 : index
    %c0_127 = arith.constant 0 : index
    %459 = vector.load %arg2[%c768, %c0_127] : memref<1248x128xf32, #tpu.memory_space<vmem>>, vector<32x96xf32>
    %c800 = arith.constant 800 : index
    %c0_128 = arith.constant 0 : index
    %460 = vector.load %arg2[%c800, %c0_128] : memref<1248x128xf32, #tpu.memory_space<vmem>>, vector<1x96xf32>
    %c808 = arith.constant 808 : index
    %c0_129 = arith.constant 0 : index
    %461 = vector.load %arg2[%c808, %c0_129] : memref<1248x128xf32, #tpu.memory_space<vmem>>, vector<32x32xf32>
    %c840 = arith.constant 840 : index
    %c0_130 = arith.constant 0 : index
    %462 = vector.load %arg2[%c840, %c0_130] : memref<1248x128xf32, #tpu.memory_space<vmem>>, vector<1x32xf32>
    %c848 = arith.constant 848 : index
    %c0_131 = arith.constant 0 : index
    %463 = vector.load %arg2[%c848, %c0_131] : memref<1248x128xf32, #tpu.memory_space<vmem>>, vector<1x32xf32>
    %c856 = arith.constant 856 : index
    %c0_132 = arith.constant 0 : index
    %464 = vector.load %arg2[%c856, %c0_132] : memref<1248x128xf32, #tpu.memory_space<vmem>>, vector<1x32xf32>
    %cst_133 = arith.constant dense<0.000000e+00> : vector<16x96xf32>
    %465 = tpu.matmul %458, %459, %cst_133 {dimension_numbers = #tpu.dot_dimension_numbers<[1], [0], [0], [1], [0, 0, 1, 1], [], []>} : vector<16x32xf32>, vector<32x96xf32>, vector<16x96xf32> -> vector<16x96xf32>
    %466 = vector.broadcast %460 : vector<1x96xf32> to vector<16x96xf32>
    %467 = arith.addf %465, %466 : vector<16x96xf32>
    %468 = vector.extract_strided_slice %467 {offsets = [0, 0], sizes = [16, 32], strides = [1, 1]} : vector<16x96xf32> to vector<16x32xf32>
    %469 = vector.extract_strided_slice %467 {offsets = [0, 32], sizes = [16, 32], strides = [1, 1]} : vector<16x96xf32> to vector<16x32xf32>
    %470 = vector.extract_strided_slice %467 {offsets = [0, 64], sizes = [16, 32], strides = [1, 1]} : vector<16x96xf32> to vector<16x32xf32>
    %471 = vector.shape_cast %468 : vector<16x32xf32> to vector<2x8x32xf32>
    %472 = vector.extract_strided_slice %471 {offsets = [0, 0, 0], sizes = [2, 8, 8], strides = [1, 1, 1]} : vector<2x8x32xf32> to vector<2x8x8xf32>
    %473 = vector.extract_strided_slice %471 {offsets = [0, 0, 8], sizes = [2, 8, 8], strides = [1, 1, 1]} : vector<2x8x32xf32> to vector<2x8x8xf32>
    %474 = vector.extract_strided_slice %471 {offsets = [0, 0, 16], sizes = [2, 8, 8], strides = [1, 1, 1]} : vector<2x8x32xf32> to vector<2x8x8xf32>
    %475 = vector.extract_strided_slice %471 {offsets = [0, 0, 24], sizes = [2, 8, 8], strides = [1, 1, 1]} : vector<2x8x32xf32> to vector<2x8x8xf32>
    %476 = tpu.concatenate %472, %473, %474, %475 in 0 : vector<2x8x8xf32>, vector<2x8x8xf32>, vector<2x8x8xf32>, vector<2x8x8xf32> -> vector<8x8x8xf32>
    %477 = vector.shape_cast %469 : vector<16x32xf32> to vector<2x8x32xf32>
    %478 = vector.extract_strided_slice %477 {offsets = [0, 0, 0], sizes = [2, 8, 8], strides = [1, 1, 1]} : vector<2x8x32xf32> to vector<2x8x8xf32>
    %479 = vector.extract_strided_slice %477 {offsets = [0, 0, 8], sizes = [2, 8, 8], strides = [1, 1, 1]} : vector<2x8x32xf32> to vector<2x8x8xf32>
    %480 = vector.extract_strided_slice %477 {offsets = [0, 0, 16], sizes = [2, 8, 8], strides = [1, 1, 1]} : vector<2x8x32xf32> to vector<2x8x8xf32>
    %481 = vector.extract_strided_slice %477 {offsets = [0, 0, 24], sizes = [2, 8, 8], strides = [1, 1, 1]} : vector<2x8x32xf32> to vector<2x8x8xf32>
    %482 = tpu.concatenate %478, %479, %480, %481 in 0 : vector<2x8x8xf32>, vector<2x8x8xf32>, vector<2x8x8xf32>, vector<2x8x8xf32> -> vector<8x8x8xf32>
    %483 = vector.shape_cast %470 : vector<16x32xf32> to vector<2x8x32xf32>
    %484 = vector.extract_strided_slice %483 {offsets = [0, 0, 0], sizes = [2, 8, 8], strides = [1, 1, 1]} : vector<2x8x32xf32> to vector<2x8x8xf32>
    %485 = vector.extract_strided_slice %483 {offsets = [0, 0, 8], sizes = [2, 8, 8], strides = [1, 1, 1]} : vector<2x8x32xf32> to vector<2x8x8xf32>
    %486 = vector.extract_strided_slice %483 {offsets = [0, 0, 16], sizes = [2, 8, 8], strides = [1, 1, 1]} : vector<2x8x32xf32> to vector<2x8x8xf32>
    %487 = vector.extract_strided_slice %483 {offsets = [0, 0, 24], sizes = [2, 8, 8], strides = [1, 1, 1]} : vector<2x8x32xf32> to vector<2x8x8xf32>
    %488 = tpu.concatenate %484, %485, %486, %487 in 0 : vector<2x8x8xf32>, vector<2x8x8xf32>, vector<2x8x8xf32>, vector<2x8x8xf32> -> vector<8x8x8xf32>
    "tpu.trace_start"() <{level = 10 : i32, message = "bqd,bkd->bqk"}> : () -> ()
    %cst_134 = arith.constant dense<0.000000e+00> : vector<8x8x8xf32>
    %489 = tpu.matmul %476, %482, %cst_134 {dimension_numbers = #tpu.dot_dimension_numbers<[2], [2], [1], [1], [0, 0, 0, 1, 1, 1], [0], [0]>} : vector<8x8x8xf32>, vector<8x8x8xf32>, vector<8x8x8xf32> -> vector<8x8x8xf32>
    "tpu.trace_stop"() : () -> ()
    %cst_135 = arith.constant 0.353553385 : f32
    %490 = vector.broadcast %cst_135 : f32 to vector<8x8x8xf32>
    %491 = arith.mulf %489, %490 : vector<8x8x8xf32>
    %492 = vector.shape_cast %249 : vector<8x8xi1> to vector<1x8x8xi1>
    %cst_136 = arith.constant -1.000000e+09 : f32
    %493 = vector.shape_cast %492 : vector<1x8x8xi1> to vector<1x8x8xi1>
    %494 = vector.broadcast %493 : vector<1x8x8xi1> to vector<8x8x8xi1>
    %495 = vector.broadcast %cst_136 : f32 to vector<8x8x8xf32>
    %496 = arith.select %494, %495, %491 : vector<8x8x8xi1>, vector<8x8x8xf32>
    %cst_137 = arith.constant dense<0xFF800000> : vector<8x8xf32>
    %497 = vector.multi_reduction <maximumf>, %496, %cst_137 [2] : vector<8x8x8xf32> to vector<8x8xf32>
    %498 = vector.shape_cast %497 : vector<8x8xf32> to vector<8x8x1xf32>
    %499 = vector.broadcast %498 : vector<8x8x1xf32> to vector<8x8x8xf32>
    %500 = arith.subf %496, %499 : vector<8x8x8xf32>
    %501 = math.exp %500 : vector<8x8x8xf32>
    %cst_138 = arith.constant dense<0.000000e+00> : vector<8x8xf32>
    %502 = vector.multi_reduction <add>, %501, %cst_138 [2] : vector<8x8x8xf32> to vector<8x8xf32>
    %503 = vector.shape_cast %502 : vector<8x8xf32> to vector<8x8x1xf32>
    %504 = tpu.reciprocal %503 {approx = true} : vector<8x8x1xf32> -> vector<8x8x1xf32>
    %505 = vector.broadcast %504 : vector<8x8x1xf32> to vector<8x8x8xf32>
    %506 = arith.mulf %501, %505 : vector<8x8x8xf32>
    "tpu.trace_start"() <{level = 10 : i32, message = "bqk,bkd->bqd"}> : () -> ()
    %cst_139 = arith.constant dense<0.000000e+00> : vector<8x8x8xf32>
    %507 = tpu.matmul %506, %488, %cst_139 {dimension_numbers = #tpu.dot_dimension_numbers<[2], [1], [1], [2], [0, 0, 0, 1, 1, 2], [0], [0]>} : vector<8x8x8xf32>, vector<8x8x8xf32>, vector<8x8x8xf32> -> vector<8x8x8xf32>
    "tpu.trace_stop"() : () -> ()
    %508 = vector.extract_strided_slice %507 {offsets = [0, 0, 0], sizes = [2, 8, 8], strides = [1, 1, 1]} : vector<8x8x8xf32> to vector<2x8x8xf32>
    %509 = vector.shape_cast %508 : vector<2x8x8xf32> to vector<16x8xf32>
    %510 = vector.extract_strided_slice %507 {offsets = [2, 0, 0], sizes = [2, 8, 8], strides = [1, 1, 1]} : vector<8x8x8xf32> to vector<2x8x8xf32>
    %511 = vector.shape_cast %510 : vector<2x8x8xf32> to vector<16x8xf32>
    %512 = vector.extract_strided_slice %507 {offsets = [4, 0, 0], sizes = [2, 8, 8], strides = [1, 1, 1]} : vector<8x8x8xf32> to vector<2x8x8xf32>
    %513 = vector.shape_cast %512 : vector<2x8x8xf32> to vector<16x8xf32>
    %514 = vector.extract_strided_slice %507 {offsets = [6, 0, 0], sizes = [2, 8, 8], strides = [1, 1, 1]} : vector<8x8x8xf32> to vector<2x8x8xf32>
    %515 = vector.shape_cast %514 : vector<2x8x8xf32> to vector<16x8xf32>
    %516 = tpu.concatenate %509, %511, %513, %515 in 1 : vector<16x8xf32>, vector<16x8xf32>, vector<16x8xf32>, vector<16x8xf32> -> vector<16x32xf32>
    %cst_140 = arith.constant dense<0.000000e+00> : vector<16x32xf32>
    %517 = tpu.matmul %516, %461, %cst_140 {dimension_numbers = #tpu.dot_dimension_numbers<[1], [0], [0], [1], [0, 0, 1, 1], [], []>} : vector<16x32xf32>, vector<32x32xf32>, vector<16x32xf32> -> vector<16x32xf32>
    %518 = vector.broadcast %462 : vector<1x32xf32> to vector<16x32xf32>
    %519 = arith.addf %517, %518 : vector<16x32xf32>
    %520 = arith.addf %519, %458 : vector<16x32xf32>
    %cst_141 = arith.constant dense<0.000000e+00> : vector<16xf32>
    %521 = vector.multi_reduction <add>, %520, %cst_141 [1] : vector<16x32xf32> to vector<16xf32>
    %522 = vector.shape_cast %521 : vector<16xf32> to vector<16x1xf32>
    %cst_142 = arith.constant 3.200000e+01 : f32
    %523 = vector.broadcast %cst_142 : f32 to vector<16x1xf32>
    %524 = arith.divf %522, %523 : vector<16x1xf32>
    %525 = vector.broadcast %524 : vector<16x1xf32> to vector<16x32xf32>
    %526 = arith.subf %520, %525 : vector<16x32xf32>
    %527 = arith.mulf %526, %526 : vector<16x32xf32>
    %cst_143 = arith.constant dense<0.000000e+00> : vector<16xf32>
    %528 = vector.multi_reduction <add>, %527, %cst_143 [1] : vector<16x32xf32> to vector<16xf32>
    %529 = vector.shape_cast %528 : vector<16xf32> to vector<16x1xf32>
    %cst_144 = arith.constant 3.200000e+01 : f32
    %530 = vector.broadcast %cst_144 : f32 to vector<16x1xf32>
    %531 = arith.divf %529, %530 : vector<16x1xf32>
    %532 = vector.broadcast %524 : vector<16x1xf32> to vector<16x32xf32>
    %533 = arith.subf %520, %532 : vector<16x32xf32>
    %cst_145 = arith.constant 9.99999974E-6 : f32
    %534 = vector.broadcast %cst_145 : f32 to vector<16x1xf32>
    %535 = arith.addf %531, %534 : vector<16x1xf32>
    %536 = math.rsqrt %535 : vector<16x1xf32>
    %537 = vector.broadcast %536 : vector<16x1xf32> to vector<16x32xf32>
    %538 = arith.mulf %533, %537 : vector<16x32xf32>
    %539 = vector.broadcast %463 : vector<1x32xf32> to vector<16x32xf32>
    %540 = arith.mulf %538, %539 : vector<16x32xf32>
    %541 = vector.broadcast %464 : vector<1x32xf32> to vector<16x32xf32>
    %542 = arith.addf %540, %541 : vector<16x32xf32>
    %543 = vector.extract_strided_slice %246 {offsets = [0, 64], sizes = [16, 32], strides = [1, 1]} : vector<16x128xf32> to vector<16x32xf32>
    %544 = vector.extract_strided_slice %246 {offsets = [0, 96], sizes = [16, 32], strides = [1, 1]} : vector<16x128xf32> to vector<16x32xf32>
    %c864 = arith.constant 864 : index
    %c0_146 = arith.constant 0 : index
    %545 = vector.load %arg2[%c864, %c0_146] : memref<1248x128xf32, #tpu.memory_space<vmem>>, vector<32x32xf32>
    %c896 = arith.constant 896 : index
    %c0_147 = arith.constant 0 : index
    %546 = vector.load %arg2[%c896, %c0_147] : memref<1248x128xf32, #tpu.memory_space<vmem>>, vector<1x32xf32>
    %c904 = arith.constant 904 : index
    %c0_148 = arith.constant 0 : index
    %547 = vector.load %arg2[%c904, %c0_148] : memref<1248x128xf32, #tpu.memory_space<vmem>>, vector<32x32xf32>
    %c936 = arith.constant 936 : index
    %c0_149 = arith.constant 0 : index
    %548 = vector.load %arg2[%c936, %c0_149] : memref<1248x128xf32, #tpu.memory_space<vmem>>, vector<1x32xf32>
    %c944 = arith.constant 944 : index
    %c0_150 = arith.constant 0 : index
    %549 = vector.load %arg2[%c944, %c0_150] : memref<1248x128xf32, #tpu.memory_space<vmem>>, vector<1x32xf32>
    %c952 = arith.constant 952 : index
    %c0_151 = arith.constant 0 : index
    %550 = vector.load %arg2[%c952, %c0_151] : memref<1248x128xf32, #tpu.memory_space<vmem>>, vector<1x32xf32>
    %cst_152 = arith.constant dense<0.000000e+00> : vector<16x32xf32>
    %551 = tpu.matmul %542, %545, %cst_152 {dimension_numbers = #tpu.dot_dimension_numbers<[1], [0], [0], [1], [0, 0, 1, 1], [], []>} : vector<16x32xf32>, vector<32x32xf32>, vector<16x32xf32> -> vector<16x32xf32>
    %552 = vector.broadcast %546 : vector<1x32xf32> to vector<16x32xf32>
    %553 = arith.addf %551, %552 : vector<16x32xf32>
    %554 = vector.shape_cast %553 : vector<16x32xf32> to vector<2x8x32xf32>
    %555 = vector.extract_strided_slice %554 {offsets = [0, 0, 0], sizes = [2, 8, 8], strides = [1, 1, 1]} : vector<2x8x32xf32> to vector<2x8x8xf32>
    %556 = vector.extract_strided_slice %554 {offsets = [0, 0, 8], sizes = [2, 8, 8], strides = [1, 1, 1]} : vector<2x8x32xf32> to vector<2x8x8xf32>
    %557 = vector.extract_strided_slice %554 {offsets = [0, 0, 16], sizes = [2, 8, 8], strides = [1, 1, 1]} : vector<2x8x32xf32> to vector<2x8x8xf32>
    %558 = vector.extract_strided_slice %554 {offsets = [0, 0, 24], sizes = [2, 8, 8], strides = [1, 1, 1]} : vector<2x8x32xf32> to vector<2x8x8xf32>
    %559 = tpu.concatenate %555, %556, %557, %558 in 0 : vector<2x8x8xf32>, vector<2x8x8xf32>, vector<2x8x8xf32>, vector<2x8x8xf32> -> vector<8x8x8xf32>
    %560 = vector.shape_cast %543 : vector<16x32xf32> to vector<2x8x32xf32>
    %561 = vector.extract_strided_slice %560 {offsets = [0, 0, 0], sizes = [2, 8, 8], strides = [1, 1, 1]} : vector<2x8x32xf32> to vector<2x8x8xf32>
    %562 = vector.extract_strided_slice %560 {offsets = [0, 0, 8], sizes = [2, 8, 8], strides = [1, 1, 1]} : vector<2x8x32xf32> to vector<2x8x8xf32>
    %563 = vector.extract_strided_slice %560 {offsets = [0, 0, 16], sizes = [2, 8, 8], strides = [1, 1, 1]} : vector<2x8x32xf32> to vector<2x8x8xf32>
    %564 = vector.extract_strided_slice %560 {offsets = [0, 0, 24], sizes = [2, 8, 8], strides = [1, 1, 1]} : vector<2x8x32xf32> to vector<2x8x8xf32>
    %565 = tpu.concatenate %561, %562, %563, %564 in 0 : vector<2x8x8xf32>, vector<2x8x8xf32>, vector<2x8x8xf32>, vector<2x8x8xf32> -> vector<8x8x8xf32>
    %566 = vector.shape_cast %544 : vector<16x32xf32> to vector<2x8x32xf32>
    %567 = vector.extract_strided_slice %566 {offsets = [0, 0, 0], sizes = [2, 8, 8], strides = [1, 1, 1]} : vector<2x8x32xf32> to vector<2x8x8xf32>
    %568 = vector.extract_strided_slice %566 {offsets = [0, 0, 8], sizes = [2, 8, 8], strides = [1, 1, 1]} : vector<2x8x32xf32> to vector<2x8x8xf32>
    %569 = vector.extract_strided_slice %566 {offsets = [0, 0, 16], sizes = [2, 8, 8], strides = [1, 1, 1]} : vector<2x8x32xf32> to vector<2x8x8xf32>
    %570 = vector.extract_strided_slice %566 {offsets = [0, 0, 24], sizes = [2, 8, 8], strides = [1, 1, 1]} : vector<2x8x32xf32> to vector<2x8x8xf32>
    %571 = tpu.concatenate %567, %568, %569, %570 in 0 : vector<2x8x8xf32>, vector<2x8x8xf32>, vector<2x8x8xf32>, vector<2x8x8xf32> -> vector<8x8x8xf32>
    "tpu.trace_start"() <{level = 10 : i32, message = "bqd,bkd->bqk"}> : () -> ()
    %cst_153 = arith.constant dense<0.000000e+00> : vector<8x8x8xf32>
    %572 = tpu.matmul %559, %565, %cst_153 {dimension_numbers = #tpu.dot_dimension_numbers<[2], [2], [1], [1], [0, 0, 0, 1, 1, 1], [0], [0]>} : vector<8x8x8xf32>, vector<8x8x8xf32>, vector<8x8x8xf32> -> vector<8x8x8xf32>
    "tpu.trace_stop"() : () -> ()
    %cst_154 = arith.constant 0.353553385 : f32
    %573 = vector.broadcast %cst_154 : f32 to vector<8x8x8xf32>
    %574 = arith.mulf %572, %573 : vector<8x8x8xf32>
    %cst_155 = arith.constant dense<0xFF800000> : vector<8x8xf32>
    %575 = vector.multi_reduction <maximumf>, %574, %cst_155 [2] : vector<8x8x8xf32> to vector<8x8xf32>
    %576 = vector.shape_cast %575 : vector<8x8xf32> to vector<8x8x1xf32>
    %577 = vector.broadcast %576 : vector<8x8x1xf32> to vector<8x8x8xf32>
    %578 = arith.subf %574, %577 : vector<8x8x8xf32>
    %579 = math.exp %578 : vector<8x8x8xf32>
    %cst_156 = arith.constant dense<0.000000e+00> : vector<8x8xf32>
    %580 = vector.multi_reduction <add>, %579, %cst_156 [2] : vector<8x8x8xf32> to vector<8x8xf32>
    %581 = vector.shape_cast %580 : vector<8x8xf32> to vector<8x8x1xf32>
    %582 = tpu.reciprocal %581 {approx = true} : vector<8x8x1xf32> -> vector<8x8x1xf32>
    %583 = vector.broadcast %582 : vector<8x8x1xf32> to vector<8x8x8xf32>
    %584 = arith.mulf %579, %583 : vector<8x8x8xf32>
    "tpu.trace_start"() <{level = 10 : i32, message = "bqk,bkd->bqd"}> : () -> ()
    %cst_157 = arith.constant dense<0.000000e+00> : vector<8x8x8xf32>
    %585 = tpu.matmul %584, %571, %cst_157 {dimension_numbers = #tpu.dot_dimension_numbers<[2], [1], [1], [2], [0, 0, 0, 1, 1, 2], [0], [0]>} : vector<8x8x8xf32>, vector<8x8x8xf32>, vector<8x8x8xf32> -> vector<8x8x8xf32>
    "tpu.trace_stop"() : () -> ()
    %586 = vector.extract_strided_slice %585 {offsets = [0, 0, 0], sizes = [2, 8, 8], strides = [1, 1, 1]} : vector<8x8x8xf32> to vector<2x8x8xf32>
    %587 = vector.shape_cast %586 : vector<2x8x8xf32> to vector<16x8xf32>
    %588 = vector.extract_strided_slice %585 {offsets = [2, 0, 0], sizes = [2, 8, 8], strides = [1, 1, 1]} : vector<8x8x8xf32> to vector<2x8x8xf32>
    %589 = vector.shape_cast %588 : vector<2x8x8xf32> to vector<16x8xf32>
    %590 = vector.extract_strided_slice %585 {offsets = [4, 0, 0], sizes = [2, 8, 8], strides = [1, 1, 1]} : vector<8x8x8xf32> to vector<2x8x8xf32>
    %591 = vector.shape_cast %590 : vector<2x8x8xf32> to vector<16x8xf32>
    %592 = vector.extract_strided_slice %585 {offsets = [6, 0, 0], sizes = [2, 8, 8], strides = [1, 1, 1]} : vector<8x8x8xf32> to vector<2x8x8xf32>
    %593 = vector.shape_cast %592 : vector<2x8x8xf32> to vector<16x8xf32>
    %594 = tpu.concatenate %587, %589, %591, %593 in 1 : vector<16x8xf32>, vector<16x8xf32>, vector<16x8xf32>, vector<16x8xf32> -> vector<16x32xf32>
    %cst_158 = arith.constant dense<0.000000e+00> : vector<16x32xf32>
    %595 = tpu.matmul %594, %547, %cst_158 {dimension_numbers = #tpu.dot_dimension_numbers<[1], [0], [0], [1], [0, 0, 1, 1], [], []>} : vector<16x32xf32>, vector<32x32xf32>, vector<16x32xf32> -> vector<16x32xf32>
    %596 = vector.broadcast %548 : vector<1x32xf32> to vector<16x32xf32>
    %597 = arith.addf %595, %596 : vector<16x32xf32>
    %598 = arith.addf %597, %542 : vector<16x32xf32>
    %cst_159 = arith.constant dense<0.000000e+00> : vector<16xf32>
    %599 = vector.multi_reduction <add>, %598, %cst_159 [1] : vector<16x32xf32> to vector<16xf32>
    %600 = vector.shape_cast %599 : vector<16xf32> to vector<16x1xf32>
    %cst_160 = arith.constant 3.200000e+01 : f32
    %601 = vector.broadcast %cst_160 : f32 to vector<16x1xf32>
    %602 = arith.divf %600, %601 : vector<16x1xf32>
    %603 = vector.broadcast %602 : vector<16x1xf32> to vector<16x32xf32>
    %604 = arith.subf %598, %603 : vector<16x32xf32>
    %605 = arith.mulf %604, %604 : vector<16x32xf32>
    %cst_161 = arith.constant dense<0.000000e+00> : vector<16xf32>
    %606 = vector.multi_reduction <add>, %605, %cst_161 [1] : vector<16x32xf32> to vector<16xf32>
    %607 = vector.shape_cast %606 : vector<16xf32> to vector<16x1xf32>
    %cst_162 = arith.constant 3.200000e+01 : f32
    %608 = vector.broadcast %cst_162 : f32 to vector<16x1xf32>
    %609 = arith.divf %607, %608 : vector<16x1xf32>
    %610 = vector.broadcast %602 : vector<16x1xf32> to vector<16x32xf32>
    %611 = arith.subf %598, %610 : vector<16x32xf32>
    %cst_163 = arith.constant 9.99999974E-6 : f32
    %612 = vector.broadcast %cst_163 : f32 to vector<16x1xf32>
    %613 = arith.addf %609, %612 : vector<16x1xf32>
    %614 = math.rsqrt %613 : vector<16x1xf32>
    %615 = vector.broadcast %614 : vector<16x1xf32> to vector<16x32xf32>
    %616 = arith.mulf %611, %615 : vector<16x32xf32>
    %617 = vector.broadcast %549 : vector<1x32xf32> to vector<16x32xf32>
    %618 = arith.mulf %616, %617 : vector<16x32xf32>
    %619 = vector.broadcast %550 : vector<1x32xf32> to vector<16x32xf32>
    %620 = arith.addf %618, %619 : vector<16x32xf32>
    %c960 = arith.constant 960 : index
    %c0_164 = arith.constant 0 : index
    %621 = vector.load %arg2[%c960, %c0_164] : memref<1248x128xf32, #tpu.memory_space<vmem>>, vector<32x64xf32>
    %c992 = arith.constant 992 : index
    %c0_165 = arith.constant 0 : index
    %622 = vector.load %arg2[%c992, %c0_165] : memref<1248x128xf32, #tpu.memory_space<vmem>>, vector<1x64xf32>
    %c1000 = arith.constant 1000 : index
    %c0_166 = arith.constant 0 : index
    %623 = vector.load %arg2[%c1000, %c0_166] : memref<1248x128xf32, #tpu.memory_space<vmem>>, vector<64x32xf32>
    %c1064 = arith.constant 1064 : index
    %c0_167 = arith.constant 0 : index
    %624 = vector.load %arg2[%c1064, %c0_167] : memref<1248x128xf32, #tpu.memory_space<vmem>>, vector<1x32xf32>
    %c1072 = arith.constant 1072 : index
    %c0_168 = arith.constant 0 : index
    %625 = vector.load %arg2[%c1072, %c0_168] : memref<1248x128xf32, #tpu.memory_space<vmem>>, vector<1x32xf32>
    %c1080 = arith.constant 1080 : index
    %c0_169 = arith.constant 0 : index
    %626 = vector.load %arg2[%c1080, %c0_169] : memref<1248x128xf32, #tpu.memory_space<vmem>>, vector<1x32xf32>
    %cst_170 = arith.constant dense<0.000000e+00> : vector<16x64xf32>
    %627 = tpu.matmul %620, %621, %cst_170 {dimension_numbers = #tpu.dot_dimension_numbers<[1], [0], [0], [1], [0, 0, 1, 1], [], []>} : vector<16x32xf32>, vector<32x64xf32>, vector<16x64xf32> -> vector<16x64xf32>
    %628 = vector.broadcast %622 : vector<1x64xf32> to vector<16x64xf32>
    %629 = arith.addf %627, %628 : vector<16x64xf32>
    %cst_171 = arith.constant 0.000000e+00 : f32
    %630 = vector.broadcast %cst_171 : f32 to vector<16x64xf32>
    %631 = arith.maximumf %629, %630 : vector<16x64xf32>
    %cst_172 = arith.constant dense<0.000000e+00> : vector<16x32xf32>
    %632 = tpu.matmul %631, %623, %cst_172 {dimension_numbers = #tpu.dot_dimension_numbers<[1], [0], [0], [1], [0, 0, 1, 1], [], []>} : vector<16x64xf32>, vector<64x32xf32>, vector<16x32xf32> -> vector<16x32xf32>
    %633 = vector.broadcast %624 : vector<1x32xf32> to vector<16x32xf32>
    %634 = arith.addf %632, %633 : vector<16x32xf32>
    %635 = arith.addf %634, %620 : vector<16x32xf32>
    %cst_173 = arith.constant dense<0.000000e+00> : vector<16xf32>
    %636 = vector.multi_reduction <add>, %635, %cst_173 [1] : vector<16x32xf32> to vector<16xf32>
    %637 = vector.shape_cast %636 : vector<16xf32> to vector<16x1xf32>
    %cst_174 = arith.constant 3.200000e+01 : f32
    %638 = vector.broadcast %cst_174 : f32 to vector<16x1xf32>
    %639 = arith.divf %637, %638 : vector<16x1xf32>
    %640 = vector.broadcast %639 : vector<16x1xf32> to vector<16x32xf32>
    %641 = arith.subf %635, %640 : vector<16x32xf32>
    %642 = arith.mulf %641, %641 : vector<16x32xf32>
    %cst_175 = arith.constant dense<0.000000e+00> : vector<16xf32>
    %643 = vector.multi_reduction <add>, %642, %cst_175 [1] : vector<16x32xf32> to vector<16xf32>
    %644 = vector.shape_cast %643 : vector<16xf32> to vector<16x1xf32>
    %cst_176 = arith.constant 3.200000e+01 : f32
    %645 = vector.broadcast %cst_176 : f32 to vector<16x1xf32>
    %646 = arith.divf %644, %645 : vector<16x1xf32>
    %647 = vector.broadcast %639 : vector<16x1xf32> to vector<16x32xf32>
    %648 = arith.subf %635, %647 : vector<16x32xf32>
    %cst_177 = arith.constant 9.99999974E-6 : f32
    %649 = vector.broadcast %cst_177 : f32 to vector<16x1xf32>
    %650 = arith.addf %646, %649 : vector<16x1xf32>
    %651 = math.rsqrt %650 : vector<16x1xf32>
    %652 = vector.broadcast %651 : vector<16x1xf32> to vector<16x32xf32>
    %653 = arith.mulf %648, %652 : vector<16x32xf32>
    %654 = vector.broadcast %625 : vector<1x32xf32> to vector<16x32xf32>
    %655 = arith.mulf %653, %654 : vector<16x32xf32>
    %656 = vector.broadcast %626 : vector<1x32xf32> to vector<16x32xf32>
    %657 = arith.addf %655, %656 : vector<16x32xf32>
    %c1128 = arith.constant 1128 : index
    %c0_178 = arith.constant 0 : index
    %658 = vector.load %arg2[%c1128, %c0_178] : memref<1248x128xf32, #tpu.memory_space<vmem>>, vector<32x10xf32>
    %cst_179 = arith.constant dense<0.000000e+00> : vector<16x10xf32>
    %659 = tpu.matmul %657, %658, %cst_179 {dimension_numbers = #tpu.dot_dimension_numbers<[1], [0], [0], [1], [0, 0, 1, 1], [], []>} : vector<16x32xf32>, vector<32x10xf32>, vector<16x10xf32> -> vector<16x10xf32>
    %c1160 = arith.constant 1160 : index
    %c0_180 = arith.constant 0 : index
    %660 = vector.load %arg2[%c1160, %c0_180] : memref<1248x128xf32, #tpu.memory_space<vmem>>, vector<1x10xf32>
    %661 = vector.broadcast %660 : vector<1x10xf32> to vector<16x10xf32>
    %662 = arith.addf %659, %661 : vector<16x10xf32>
    %cst_181 = arith.constant dense<0xFF800000> : vector<16xf32>
    %663 = vector.multi_reduction <maximumf>, %662, %cst_181 [1] : vector<16x10xf32> to vector<16xf32>
    %664 = vector.shape_cast %663 : vector<16xf32> to vector<16x1xf32>
    %665 = vector.broadcast %664 : vector<16x1xf32> to vector<16x10xf32>
    %666 = arith.subf %662, %665 : vector<16x10xf32>
    %667 = math.exp %666 : vector<16x10xf32>
    %cst_182 = arith.constant dense<0.000000e+00> : vector<16xf32>
    %668 = vector.multi_reduction <add>, %667, %cst_182 [1] : vector<16x10xf32> to vector<16xf32>
    %669 = vector.shape_cast %668 : vector<16xf32> to vector<16x1xf32>
    %670 = vector.broadcast %669 : vector<16x1xf32> to vector<16x10xf32>
    %671 = arith.divf %667, %670 : vector<16x10xf32>
    %c0_183 = arith.constant 0 : index
    %c0_184 = arith.constant 0 : index
    %672 = vector.load %arg3[%c0_183, %c0_184] : memref<16x10xf32, #tpu.memory_space<vmem>>, vector<16x10xf32>
    tpu.vector_store %arg3[%c0_183, %c0_184], %671 {strides = array<i32>} : memref<16x10xf32, #tpu.memory_space<vmem>>, vector<16x10xf32>,
    %673 = tpu.iota {dimensions = array<i32: 1>} : vector<16x10xi32>
    %674 = vector.broadcast %664 : vector<16x1xf32> to vector<16x10xf32>
    %675 = arith.cmpf oeq, %662, %674 : vector<16x10xf32>
    %c10_i32 = arith.constant 10 : i32
    %676 = vector.broadcast %c10_i32 : i32 to vector<16x10xi32>
    %677 = arith.select %675, %673, %676 : vector<16x10xi1>, vector<16x10xi32>
    %cst_185 = arith.constant dense<2147483647> : vector<16xi32>
    %678 = vector.multi_reduction <minsi>, %677, %cst_185 [1] : vector<16x10xi32> to vector<16xi32>
    %679 = vector.shape_cast %678 : vector<16xi32> to vector<16x1xi32>
    %c0_186 = arith.constant 0 : index
    %c0_187 = arith.constant 0 : index
    %680 = vector.load %arg4[%c0_186, %c0_187] : memref<16x1xi32, #tpu.memory_space<vmem>>, vector<16x1xi32>
    tpu.vector_store %arg4[%c0_186, %c0_187], %679 {strides = array<i32>} : memref<16x1xi32, #tpu.memory_space<vmem>>, vector<16x1xi32>,
    return
  }
}

</mosaic_0001>

<bundles_post_ra>
// kernel: transformer_forward.1
= control target key start
LH: loop header
LB: loop body
LE: loop exit
PB: predicated region body
PF: predicated region fallthrough
CT: control target
= control target key end

     0   :  { %10 = vsyncpa [#allocation3], 0  ;;  %s6674_s0 = inlined_call_operand.vmem [shape: s32[16,1], index: 0, kind: input, shape index: {}]   ;;  %s6675_s1 = inlined_call_operand.vmem [shape: s32[16,1], index: 1, kind: input, shape index: {}]   ;;  %s6676_s2 = inlined_call_operand.hbm [shape: f32[1248,128], index: 2, kind: input, shape index: {}]   ;;  %s6677_s3 = inlined_call_operand.hbm [shape: f32[16,10], index: 3, kind: output, shape index: {0}]   ;;  %s6678_s4 = inlined_call_operand.vmem [shape: s32[16,1], index: 4, kind: output, shape index: {1}]  }
   0x1   :  { %11 = vsyncpa [#allocation4], 0  ;;  %s20_s17 = sshll.u32 %s6676_s2, 4  ;;  %s5598_s18 = smov [#allocation2]   ;;  %s21_s17 = int_to_ptr.hbm [resolvable:$true] %s20_s17 }
   0x2   :  { %s22_s19 = sshll.u32 %s5598_s18, 4  ;;  %s5599_s20 = smov 128   ;;  %s23_s19 = int_to_ptr.vmem [resolvable:$true] %s22_s19 }
   0x3   :  { %s5600_s21 = smov 8  }
   0x4   :  { %28 = dma.hbm_to_vmem [thread:$0]  %s21_s17, 19968, %s23_s19, [#allocation3], %s5599_s20, %s5599_s20, %s5600_s21  }
   0x5   :  { %5594 = dma.done.wait [#allocation3], 19968  }
   0x6   :  { %5595 = vsyncadd [#allocation3], 4294947328  ;;  %v5601_v0 = vmov 0   ;;  %vm63_vm0 = vcmask 1041408   ;;  %v33_v1 = vld [vmem:[%s6674_s0] sm:$0xff]  ;;  %v54_v3 = vld [vmem:[#allocation2 + $0x4b8] sm:$0xff]  ;;  %v35_v12 = vlaneseq }
   0x7   :  { %5170 = vset.pattern.permute.xlu0 %v5601_v0  ;;  %5201 = vset.pattern.permute.xlu1 %v5601_v0  ;;  %v55_v2 = vld [vmem:[#allocation2 + $0x4c0] sm:$0x3]  ;;  %v53_v4 = vld [vmem:[#allocation2 + $0x4b0] sm:$0xff]  ;;  %v52_v5 = vld [vmem:[#allocation2 + $0x4a8] sm:$0xff]  ;;  %vm56_vm1 = vcmask 408576   ;;  %v5602_v15 = vmov 0.0  }
   0x8   :  { %38 = vperm.xlu0 %5170, %v33_v1   ;;  %4959 = vmatpush.msk.msra.mxu0 %vm63_vm0, %v55_v2  ;;  %v34_v6 = vld [vmem:[%s6674_s0 + $0x8] sm:$0xff]  ;;  %v51_v7 = vld [vmem:[#allocation2 + $0x4a0] sm:$0xff]  ;;  %v50_v8 = vld [vmem:[#allocation2 + $0x498] sm:$0xff]  ;;  %v5651_v13 = vand.u32 127, %v35_v12  ;;  %vm105_vm4 = vcmask 261120   ;;  %s5603_s0 = smov 104  }
   0x9   :  { %v49_v9 = vld [vmem:[#allocation2 + $0x490] sm:$0xff]  ;;  %v95_v10 = vld [vmem:[#allocation2 + $0x18] sm:$0xff]  ;;  %v93_v19 = vld [vmem:[#allocation2 + $0x8] sm:$0xff]  ;;  %s5604_s25 = smov 120   ;;  %s5605_s26 = smov 112   ;;  %vm151_vm5 = vcmask 64512  }
   0xa   :  { %77 = vmatpush.msra.mxu0 %v54_v3  ;;  %v94_v11 = vld [vmem:[#allocation2 + $0x10] sm:$0xff]  ;;  %124 = vmatpush.msra.mxu1 %v95_v10  ;;  %v92_v20 = vld [vmem:[#allocation2] sm:$0xff]  ;;  %s5606_s27 = smov 96   ;;  %s5607_s28 = smov 64   ;;  %vm688_vm6 = vcmask 130048   ;;  %vm691_vm7 = vcmask 195584  }
   0xb   :  { %v5262_v25 = vld [vmem:[#allocation2 + $0x20] ss:$0 sm:$0xff]  ;;  %s5608_s29 = smov 24   ;;  %s5609_s30 = smov 16   ;;  %vm832_vm15 = vcmask 523264  }
   0xc   :  { %78 = vmatpush.msra.mxu0 %v53_v4  ;;  %125 = vmatpush.msra.mxu1 %v94_v11  ;;  %s5612_s9 = smov [#allocation5]   ;;  %s4940_s13 = sshll.u32 %s6677_s3, 4  ;;  %s4941_s13 = int_to_ptr.hbm [resolvable:$true] %s4940_s13 }
   0xd   :  { %s4938_s10 = sshll.u32 %s5612_s9, 4  ;;  %s4939_s10 = int_to_ptr.vmem [resolvable:$true] %s4938_s10 }
   0xe   :  { %79 = vmatpush.msra.mxu0 %v52_v5  ;;  %126 = vmatpush.msra.mxu1 %v93_v19 }
  0x10   :  { %41 = vperm.xlu0 %5170, %v34_v6   ;;  %80 = vmatpush.msra.mxu0 %v51_v7 }
  0x11   :  { %127 = vmatpush.msra.mxu1 %v92_v20 }
  0x12   :  { %81 = vmatpush.msra.mxu0 %v50_v8 }
  0x14   :  { %82 = vmatpush.msra.mxu0 %v49_v9 }
  0x7a   :  { %v39_v14 = vpop.permute.xlu0 %38 }
  0x7b   :  { %vm43_vm2 = vcmp.eq.s32.totalorder %v5651_v13, %v39_v14 }
  0x7c   :  { %v4957_v16 = vsel %vm43_vm2, 1.0, %v5602_v15 }
  0x7d   :  { %4960 = vmatmul.msk.f32.vlgmr.msra.gmra.mxu0 %vm56_vm1, %v4957_v16 }
  0x82   :  { %v42_v17 = vpop.permute.xlu0 %41 }
  0x83   :  { %vm44_vm3 = vcmp.eq.s32.totalorder %v5651_v13, %v42_v17 }
  0x84   :  { %v4958_v18 = vsel %vm44_vm3, 1.0, %v5602_v15 }
  0x85   :  { %4961 = vmatmul.msk.f32.gmra.mxu0 %vm56_vm1, %v4958_v18 }
  0xfa   :  { %v84_v21 = vpop.f32.mrf.mxu0 }
  0xfb   :  { %v5657_v22 = vmul.f32 5.656854, %v84_v21 }
  0xfd   :  { %4962 = vmatmul.msk.f32.vlgmr.msra.gmra.mxu1 %vm105_vm4, %v5657_v22 }
 0x102   :  { %v87_v23 = vpop.f32.mrf.mxu0 }
 0x103   :  { %v5661_v24 = vmul.f32 5.656854, %v87_v23 }
 0x105   :  { %4963 = vmatmul.msk.f32.gmra.mxu1 %vm105_vm4, %v5661_v24 }
 0x17a   :  { %v129_v26 = vpop.f32.mrf.mxu1 }
 0x17b   :  { %v5665_v27 = vadd.f32 %v5262_v25, %v129_v26 }
 0x17d   :  { %145 = vrot.lane.b32.xlu0 %v5665_v27, %s5603_s0  ;;  %137 = vrot.lane.b32.xlu1 %v5665_v27, %s5604_s25 }
 0x182   :  { %v132_v28 = vpop.f32.mrf.mxu1 }
 0x183   :  { %v5671_v29 = vadd.f32 %v5262_v25, %v132_v28 }
 0x185   :  { %141 = vrot.lane.b32.xlu1 %v5665_v27, %s5605_s26  ;;  %139 = vrot.lane.b32.xlu2 %v5671_v29, %s5604_s25 }
 0x18d   :  { %143 = vrot.lane.b32.xlu1 %v5671_v29, %s5605_s26  ;;  %147 = vrot.lane.b32.xlu2 %v5671_v29, %s5603_s0 }
 0x195   :  { %176 = vrot.lane.b32.xlu1 %v5671_v29, %s5606_s27  ;;  %149 = vrot.lane.b32.xlu2 %v5665_v27, %s5606_s27 }
 0x1df   :  { %v5685_v30 = vpop.permute.xlu2 %139 }
 0x1e7   :  { %v5687_v31 = vpop.permute.xlu2 %147 }
 0x1e8   :  { %332 = vrot.lane.b32.xlu1 %v5687_v31, %s5606_s27 }
 0x1ef   :  { %v5691_v32 = vpop.permute.xlu1 %137  ;;  %v150_v33 = vpop.permute.xlu2 %149 }
 0x1f0   :  { %202 = vrot.lane.b32.xlu0 %v5691_v32, %s5606_s27  ;;  %4964 = vmatpush.xpose.msk.msra.mxu2 %vm151_vm5, %v150_v33  ;;  %v5704_v35 = vpop.permute.xlu0 %145 }
 0x1f3   :  { %4965 = vmatmul.msk.f32.vlgmr.msra.gmra.mxu2 %vm151_vm5, %v5665_v27 }
 0x1f7   :  { %v5698_v34 = vpop.permute.xlu1 %141 }
 0x1f8   :  { %254 = vrot.lane.b32.xlu2 %v5698_v34, %s5606_s27  ;;  %228 = vrot.lane.b32.xlu0 %v5685_v30, %s5606_s27  ;;  %v5176_v17 = vpack.i.bf16 %v5698_v34, %v5691_v32 }
 0x1ff   :  { %v5706_v36 = vpop.permute.xlu1 %143 }
 0x200   :  { %280 = vrot.lane.b32.xlu0 %v5706_v36, %s5606_s27  ;;  %306 = vrot.lane.b32.xlu2 %v5704_v35, %s5606_s27 }
 0x207   :  { %v177_v37 = vpop.permute.xlu1 %176 }
 0x208   :  { %4966 = vmatpush.xpose.msk.msra.mxu3 %vm151_vm5, %v177_v37 }
 0x20b   :  { %4967 = vmatmul.msk.f32.vlgmr.msra.gmra.mxu3 %vm151_vm5, %v5671_v29 }
 0x252   :  { %v255_v38 = vpop.permute.xlu2 %254 }
 0x25a   :  { %v307_v39 = vpop.permute.xlu2 %306  ;;  %v333_v41 = vpop.permute.xlu1 %332 }
 0x25b   :  { %4976 = vmatpush.xpose.msk.msrb.mxu1 %vm151_vm5, %v307_v39 }
 0x25e   :  { %4977 = vmatmul.msk.f32.vlgmr.msrb.gmra.mxu1 %vm151_vm5, %v5704_v35 }
 0x262   :  { %v203_v40 = vpop.permute.xlu0 %202 }
 0x263   :  { %4968 = vmatpush.xpose.msk.msrb.mxu2 %vm151_vm5, %v203_v40 }
 0x266   :  { %4969 = vmatmul.msk.f32.vlgmr.msrb.gmra.mxu2 %vm151_vm5, %v5691_v32 }
 0x267   :  { %4972 = vmatpush.xpose.msk.msra.mxu2 %vm151_vm5, %v255_v38 }
 0x26a   :  { %v229_v42 = vpop.permute.xlu0 %228 }
 0x26b   :  { %4978 = vmatpush.xpose.msk.msrb.mxu2 %vm151_vm5, %v333_v41  ;;  %4970 = vmatpush.xpose.msk.msrb.mxu3 %vm151_vm5, %v229_v42 }
 0x26e   :  { %4971 = vmatmul.msk.f32.vlgmr.msrb.gmra.mxu3 %vm151_vm5, %v5685_v30  ;;  %4973 = vmatmul.msk.f32.vlgmr.msra.gmra.mxu2 %vm151_vm5, %v5698_v34 }
 0x272   :  { %v281_v43 = vpop.permute.xlu0 %280 }
 0x273   :  { %4974 = vmatpush.xpose.msk.msra.mxu3 %vm151_vm5, %v281_v43 }
 0x276   :  { %v173_v44 = vpop.f32.mrf.mxu2  ;;  %4975 = vmatmul.msk.f32.vlgmr.msra.gmra.mxu3 %vm151_vm5, %v5706_v36  ;;  %4979 = vmatmul.msk.f32.vlgmr.msrb.gmra.mxu2 %vm151_vm5, %v5687_v31 }
 0x277   :  { %v358_v45 = vmul.f32 0.35355338, %v173_v44 }
 0x279   :  { %v366_v46 = vsel %vm151_vm5, %v358_v45, -inf }
 0x27a   :  { %367 = vmax.xlane.f32.xlu1 %v366_v46 }
 0x28e   :  { %v199_v47 = vpop.f32.mrf.mxu3 }
 0x28f   :  { %v359_v48 = vmul.f32 0.35355338, %v199_v47 }
 0x291   :  { %v369_v49 = vsel %vm151_vm5, %v359_v48, -inf }
 0x292   :  { %370 = vmax.xlane.f32.xlu2 %v369_v49 }
 0x2db   :  { %v329_v50 = vpop.f32.mrf.mxu1 }
 0x2dc   :  { %v364_v51 = vmul.f32 0.35355338, %v329_v50 }
 0x2de   :  { %v384_v52 = vsel %vm151_vm5, %v364_v51, -inf }
 0x2df   :  { %385 = vmax.xlane.f32.xlu2 %v384_v52 }
 0x2e9   :  { %v225_v53 = vpop.f32.mrf.mxu2 }
 0x2ea   :  { %v360_v54 = vmul.f32 0.35355338, %v225_v53  ;;  %v5181_v53 = vpack.i.bf16 %v5704_v35, %v5685_v30 }
 0x2ec   :  { %v372_v55 = vsel %vm151_vm5, %v360_v54, -inf }
 0x2ed   :  { %v368_v56 = vpop.xlane.xlu1 %367  ;;  %373 = vmax.xlane.f32.xlu0 %v372_v55 }
 0x2ee   :  { %v390_v57 = vsub.f32 %v358_v45, %v368_v56 }
 0x2f0   :  { %v398_v58 = vmul.f32 1.442695, %v390_v57 }
 0x2f1   :  { %v251_v59 = vpop.f32.mrf.mxu3  ;;  %v277_v60 = vpop.f32.mrf.mxu2 }
 0x2f2   :  { %v361_v61 = vmul.f32 0.35355338, %v251_v59  ;;  %v362_v62 = vmul.f32 0.35355338, %v277_v60  ;;  %5304 = vpow2.f32 %v398_v58 }
 0x2f4   :  { %v378_v63 = vsel %vm151_vm5, %v362_v62, -inf  ;;  %v375_v0 = vsel %vm151_vm5, %v361_v61, -inf }
 0x2f5   :  { %379 = vmax.xlane.f32.xlu2 %v378_v63  ;;  %376 = vmax.xlane.f32.xlu1 %v375_v0 }
 0x2f8   :  { %v5739_v1 = vpop.eup %5304 }
 0x2f9   :  { %v303_v2 = vpop.f32.mrf.mxu3  ;;  %v355_v3 = vpop.f32.mrf.mxu2  ;;  %v414_v6 = vsel %vm151_vm5, %v5739_v1, 0.0 }
 0x2fa   :  { %v5741_v4 = vmul.f32 0.35355338, %v303_v2  ;;  %v365_v5 = vmul.f32 0.35355338, %v355_v3 }
 0x2fc   :  { %v387_v7 = vsel %vm151_vm5, %v365_v5, -inf  ;;  %v381_v8 = vsel %vm151_vm5, %v5741_v4, -inf }
 0x2fd   :  { %415 = vadd.xlane.f32.xlu2 %v414_v6  ;;  %388 = vmax.xlane.f32.xlu0 %v387_v7 }
 0x2fe   :  { %382 = vmax.xlane.f32.xlu1 %v381_v8 }
 0x305   :  { %v371_v9 = vpop.xlane.xlu2 %370 }
 0x306   :  { %v391_v10 = vsub.f32 %v359_v48, %v371_v9 }
 0x308   :  { %v400_v11 = vmul.f32 1.442695, %v391_v10 }
 0x30a   :  { %5306 = vpow2.f32 %v400_v11 }
 0x310   :  { %v5748_v14 = vpop.eup %5306 }
 0x311   :  { %v417_v16 = vsel %vm151_vm5, %v5748_v14, 0.0 }
 0x312   :  { %418 = vadd.xlane.f32.xlu0 %v417_v16 }
 0x326   :  { %5177 = vrot.lane.b32.xlu0 %v5176_v17, %s5607_s28 }
 0x352   :  { %v386_v18 = vpop.xlane.xlu2 %385 }
 0x353   :  { %v396_v19 = vsub.f32 %v364_v51, %v386_v18  ;;  %v5171_v51 = vpack.i.bf16 %v5671_v29, %v5665_v27 }
 0x355   :  { %v410_v20 = vmul.f32 1.442695, %v396_v19 }
 0x357   :  { %5308 = vpow2.f32 %v410_v20 }
 0x35d   :  { %v5755_v21 = vpop.eup %5308 }
 0x35e   :  { %v432_v23 = vsel %vm151_vm5, %v5755_v21, 0.0 }
 0x35f   :  { %433 = vadd.xlane.f32.xlu2 %v432_v23 }
 0x360   :  { %v374_v25 = vpop.xlane.xlu0 %373 }
 0x361   :  { %v392_v26 = vsub.f32 %v360_v54, %v374_v25 }
 0x363   :  { %v402_v28 = vmul.f32 1.442695, %v392_v26 }
 0x365   :  { %5310 = vpow2.f32 %v402_v28 }
 0x368   :  { %v380_v33 = vpop.xlane.xlu2 %379  ;;  %v377_v37 = vpop.xlane.xlu1 %376 }
 0x369   :  { %v394_v32 = vsub.f32 %v362_v62, %v380_v33  ;;  %v393_v34 = vsub.f32 %v361_v61, %v377_v37 }
 0x36b   :  { %v5311_v38 = vpop.eup %5310  ;;  %v406_v39 = vmul.f32 1.442695, %v394_v32  ;;  %v404_v40 = vmul.f32 1.442695, %v393_v34 }
 0x36c   :  { %v420_v41 = vsel %vm151_vm5, %v5311_v38, 0.0 }
 0x36d   :  { %5312 = vpow2.f32 %v406_v39  ;;  %421 = vadd.xlane.f32.xlu1 %v420_v41 }
 0x36e   :  { %5314 = vpow2.f32 %v404_v40 }
 0x370   :  { %v389_v42 = vpop.xlane.xlu0 %388  ;;  %v416_v58 = vpop.xlane.xlu2 %415 }
 0x371   :  { %v397_v43 = vsub.f32 %v365_v5, %v389_v42  ;;  %v383_v56 = vpop.xlane.xlu1 %382  ;;  %v100_v42 = vld [vmem:[#allocation2 + $0x40] sm:$0xff] }
 0x372   :  { %v395_v27 = vsub.f32 %v5741_v4, %v383_v56 }
 0x373   :  { %v5760_v44 = vpop.eup %5312  ;;  %v412_v45 = vmul.f32 1.442695, %v397_v43  ;;  %v99_v43 = vld [vmem:[#allocation2 + $0x38] sm:$0xff] }
 0x374   :  { %v5762_v46 = vpop.eup %5314  ;;  %v426_v47 = vsel %vm151_vm5, %v5760_v44, 0.0  ;;  %v408_v29 = vmul.f32 1.442695, %v395_v27 }
 0x375   :  { %5316 = vpow2.f32 %v412_v45  ;;  %427 = vadd.xlane.f32.xlu2 %v426_v47  ;;  %v423_v48 = vsel %vm151_vm5, %v5762_v46, 0.0  ;;  %v97_v45 = vld [vmem:[#allocation2 + $0x28] sm:$0xff] }
 0x376   :  { %424 = vadd.xlane.f32.xlu0 %v423_v48  ;;  %5318 = vpow2.f32 %v408_v29  ;;  %v5263_v29 = vld [vmem:[#allocation2 + $0x48] ss:$0 sm:$0xff] }
 0x37b   :  { %v5768_v49 = vpop.eup %5316 }
 0x37c   :  { %v435_v50 = vsel %vm151_vm5, %v5768_v49, 0.0  ;;  %v5319_v57 = vpop.eup %5318 }
 0x37d   :  { %436 = vadd.xlane.f32.xlu2 %v435_v50 }
 0x385   :  { %v419_v52 = vpop.xlane.xlu0 %418 }
 0x386   :  { %5172 = vrot.lane.b32.xlu1 %v5171_v51, %s5607_s28 }
 0x38a   :  { %636 = vrot.lane.b32.xlu0 %v5687_v31, %s5607_s28  ;;  %v429_v31 = vsel %vm151_vm5, %v5319_v57, 0.0 }
 0x392   :  { %584 = vrot.lane.b32.xlu0 %v5706_v36, %s5607_s28 }
 0x395   :  { %5182 = vrot.lane.b32.xlu2 %v5181_v53, %s5607_s28 }
 0x398   :  { %v5178_v54 = vpop.permute.xlu0 %5177 }
 0x399   :  { %v5179_v55 = vunpack.i.l.bf16 %v5178_v54  ;;  %v5180_v11 = vunpack.i.h.bf16 %v5178_v54 }
 0x39b   :  { %527 = vmatpush.msra.mxu1 %v5179_v55 }
 0x3b0   :  { %430 = vadd.xlane.f32.xlu1 %v429_v31 }
 0x3d2   :  { %v434_v59 = vpop.xlane.xlu2 %433 }
 0x3e0   :  { %v422_v36 = vpop.xlane.xlu1 %421 }
 0x3e1   :  { %5320 = vrcp.f32 %v422_v36 }
 0x3e2   :  { %5322 = vrcp.f32 %v416_v58 }
 0x3e3   :  { %5324 = vrcp.f32 %v419_v52 }
 0x3e4   :  { %5326 = vrcp.f32 %v434_v59 }
 0x3e7   :  { %v5321_v60 = vpop.eup %5320 }
 0x3e8   :  { %v448_v30 = vmul.f32 %v5321_v60, %v5311_v38  ;;  %v428_v35 = vpop.xlane.xlu2 %427  ;;  %v5323_v63 = vpop.eup %5322 }
 0x3e9   :  { %v425_v62 = vpop.xlane.xlu0 %424  ;;  %v5325_v0 = vpop.eup %5324  ;;  %5328 = vrcp.f32 %v428_v35  ;;  %v446_v8 = vmul.f32 %v5323_v63, %v5739_v1 }
 0x3ea   :  { %4982 = vmatmul.msk.f32.vlgmr.msra.gmra.mxu1 %vm151_vm5, %v448_v30  ;;  %v5327_v4 = vpop.eup %5326  ;;  %5330 = vrcp.f32 %v425_v62  ;;  %v447_v10 = vmul.f32 %v5325_v0, %v5748_v14 }
 0x3eb   :  { %v452_v16 = vmul.f32 %v5327_v4, %v5755_v21 }
 0x3ef   :  { %v5329_v1 = vpop.eup %5328 }
 0x3f0   :  { %v437_v61 = vpop.xlane.xlu2 %436  ;;  %v5331_v18 = vpop.eup %5330  ;;  %v450_v14 = vmul.f32 %v5329_v1, %v5760_v44  ;;  %v98_v44 = vld [vmem:[#allocation2 + $0x30] sm:$0xff] }
 0x3f1   :  { %5332 = vrcp.f32 %v437_v61  ;;  %v449_v19 = vmul.f32 %v5331_v18, %v5762_v46  ;;  %v5610_v61 = vmov 32.0   ;;  %v785_v1 = vld [vmem:[#allocation2 + $0x70] sm:$0xff]  ;;  %v784_v18 = vld [vmem:[#allocation2 + $0x68] sm:$0xff] }
 0x3f7   :  { %v5333_v21 = vpop.eup %5332 }
 0x3f8   :  { %v5173_v2 = vpop.permute.xlu1 %5172  ;;  %v5183_v3 = vpop.permute.xlu2 %5182  ;;  %v453_v23 = vmul.f32 %v5333_v21, %v5768_v49 }
 0x3f9   :  { %v5175_v5 = vunpack.i.h.bf16 %v5173_v2  ;;  %v5174_v6 = vunpack.i.l.bf16 %v5173_v2  ;;  %v5185_v7 = vunpack.i.h.bf16 %v5183_v3  ;;  %v5184_v9 = vunpack.i.l.bf16 %v5183_v3 }
 0x3fb   :  { %475 = vmatpush.msrb.mxu3 %v5174_v6  ;;  %501 = vmatpush.msra.mxu2 %v5175_v5 }
 0x3fc   :  { %v637_v17 = vpop.permute.xlu0 %636  ;;  %631 = vmatpush.msrb.mxu1 %v5185_v7  ;;  %4980 = vmatmul.msk.f32.vlgmr.msrb.gmra.mxu3 %vm151_vm5, %v446_v8 }
 0x3fd   :  { %4981 = vmatmul.msk.f32.vlgmr.msra.gmra.mxu2 %vm151_vm5, %v447_v10  ;;  %579 = vmatpush.msra.mxu3 %v5180_v11 }
 0x3fe   :  { %553 = vmatpush.msrb.mxu2 %v5184_v9  ;;  %4986 = vmatmul.msk.f32.vlgmr.msrb.gmra.mxu1 %vm151_vm5, %v452_v16 }
 0x3ff   :  { %713 = vmatpush.msrb.mxu3 %v100_v42  ;;  %v795_v42 = vld [vmem:[#allocation2 + $0xc0] sm:$0xff] }
 0x400   :  { %657 = vmatpush.msra.mxu2 %v637_v17  ;;  %v786_v17 = vld [vmem:[#allocation2 + $0x78] sm:$0xff]  ;;  %847 = vmatpush.msra.mxu1 %v795_v42  ;;  %v5268_v42 = vld [vmem:[#allocation2 + $0xd0] ss:$0 sm:$0xff] }
 0x401   :  { %714 = vmatpush.msrb.mxu3 %v99_v43  ;;  %v794_v43 = vld [vmem:[#allocation2 + $0xb8] sm:$0xff] }
 0x402   :  { %848 = vmatpush.msra.mxu1 %v794_v43 }
 0x403   :  { %715 = vmatpush.msrb.mxu3 %v98_v44  ;;  %v793_v44 = vld [vmem:[#allocation2 + $0xb0] sm:$0xff] }
 0x404   :  { %v585_v20 = vpop.permute.xlu0 %584  ;;  %4984 = vmatmul.msk.f32.vlgmr.msra.gmra.mxu3 %vm151_vm5, %v450_v14  ;;  %v783_v14 = vld [vmem:[#allocation2 + $0x60] sm:$0xff]  ;;  %849 = vmatpush.msra.mxu1 %v793_v44 }
 0x405   :  { %4983 = vmatmul.msk.f32.vlgmr.msrb.gmra.mxu2 %vm151_vm5, %v449_v19  ;;  %605 = vmatpush.msrb.mxu0 %v585_v20 }
 0x406   :  { %716 = vmatpush.msrb.mxu3 %v97_v45 }
 0x407   :  { %818 = vmatpush.msra.mxu0 %v786_v17 }
 0x409   :  { %819 = vmatpush.msra.mxu0 %v785_v1 }
 0x40b   :  { %820 = vmatpush.msra.mxu0 %v784_v18 }
 0x40d   :  { %4987 = vmatmul.msk.f32.vlgmr.msra.gmra.mxu2 %vm151_vm5, %v453_v23  ;;  %821 = vmatpush.msra.mxu0 %v783_v14 }
 0x423   :  { %v431_v25 = vpop.xlane.xlu1 %430 }
 0x424   :  { %5334 = vrcp.f32 %v431_v25 }
 0x425   :  { %5336 = vrcp.f32 %v5610_v61 }
 0x42a   :  { %v5335_v26 = vpop.eup %5334 }
 0x42b   :  { %v451_v28 = vmul.f32 %v5335_v26, %v5319_v57  ;;  %v5337_v62 = vpop.eup %5336 }
 0x42c   :  { %v733_v63 = vmul.f32 32.0, %v5337_v62  ;;  %vm737_vm8 = vweird.f32 %v5337_v62 }
 0x42d   :  { %4985 = vmatmul.msk.f32.vlgmr.msrb.gmra.mxu0 %vm151_vm5, %v451_v28 }
 0x42e   :  { %v734_v0 = vsub.f32 1.0, %v733_v63 }
 0x430   :  { %v735_v2 = vmul.f32 %v5337_v62, %v734_v0  ;;  %v5267_v0 = vld [vmem:[#allocation2 + $0xc8] ss:$0 sm:$0xff] }
 0x432   :  { %v736_v3 = vadd.f32 %v5337_v62, %v735_v2 }
 0x434   :  { %v5816_v4 = vsel %vm737_vm8, %v5337_v62, %v736_v3 }
 0x467   :  { %v529_v33 = vpop.f32.mrf.mxu1 }
 0x468   :  { %664 = vrot.lane.b32.xlu0 %v529_v33, %s5600_s21 }
 0x47b   :  { %v633_v37 = vpop.f32.mrf.mxu1 }
 0x47c   :  { %680 = vrot.lane.b32.xlu0 %v633_v37, %s5608_s29 }
 0x47f   :  { %v477_v32 = vpop.f32.mrf.mxu3 }
 0x480   :  { %v503_v34 = vpop.f32.mrf.mxu2 }
 0x487   :  { %v581_v38 = vpop.f32.mrf.mxu3 }
 0x488   :  { %672 = vrot.lane.b32.xlu2 %v581_v38, %s5609_s30  ;;  %v555_v39 = vpop.f32.mrf.mxu2 }
 0x490   :  { %666 = vrot.lane.b32.xlu2 %v555_v39, %s5600_s21  ;;  %v659_v40 = vpop.f32.mrf.mxu2  ;;  %v5265_v39 = vld [vmem:[#allocation2 + $0x58] ss:$0 sm:$0xff] }
 0x498   :  { %682 = vrot.lane.b32.xlu2 %v659_v40, %s5608_s29 }
 0x4aa   :  { %v607_v41 = vpop.f32.mrf.mxu0 }
 0x4ab   :  { %674 = vrot.lane.b32.xlu0 %v607_v41, %s5609_s30 }
 0x4da   :  { %v665_v46 = vpop.permute.xlu0 %664 }
 0x4db   :  { %v686_v48 = vsel %vm151_vm5, %v477_v32, %v665_v46  ;;  %v5264_v32 = vld [vmem:[#allocation2 + $0x50] ss:$0 sm:$0xff] }
 0x4e2   :  { %v673_v47 = vpop.permute.xlu2 %672 }
 0x4e3   :  { %v689_v49 = vsel %vm688_vm6, %v686_v48, %v673_v47  ;;  %v792_v47 = vld [vmem:[#allocation2 + $0xa8] sm:$0xff] }
 0x4e4   :  { %850 = vmatpush.msra.mxu1 %v792_v47 }
 0x4ea   :  { %v667_v52 = vpop.permute.xlu2 %666 }
 0x4eb   :  { %v687_v53 = vsel %vm151_vm5, %v503_v34, %v667_v52 }
 0x4ee   :  { %v681_v50 = vpop.permute.xlu0 %680 }
 0x4ef   :  { %v692_v51 = vsel %vm691_vm7, %v689_v49, %v681_v50  ;;  %v791_v49 = vld [vmem:[#allocation2 + $0xa0] sm:$0xff] }
 0x4f0   :  { %4988 = vmatmul.msk.f32.vlgmr.msrb.gmra.mxu3 %vm105_vm4, %v692_v51  ;;  %851 = vmatpush.msra.mxu1 %v791_v49 }
 0x4f2   :  { %v683_v55 = vpop.permute.xlu2 %682 }
 0x51d   :  { %v675_v54 = vpop.permute.xlu0 %674 }
 0x51e   :  { %v690_v56 = vsel %vm688_vm6, %v687_v53, %v675_v54 }
 0x51f   :  { %v693_v27 = vsel %vm691_vm7, %v690_v56, %v683_v55 }
 0x520   :  { %4989 = vmatmul.msk.f32.gmra.mxu3 %vm105_vm4, %v693_v27 }
 0x573   :  { %v718_v57 = vpop.f32.mrf.mxu3 }
 0x574   :  { %v719_v31 = vadd.f32 %v5263_v29, %v718_v57 }
 0x576   :  { %v724_v58 = vadd.f32 %v719_v31, %v5657_v22  ;;  %v790_v31 = vld [vmem:[#allocation2 + $0x98] sm:$0xff] }
 0x577   :  { %852 = vmatpush.msra.mxu1 %v790_v31 }
 0x578   :  { %v726_v59 = vsel %vm105_vm4, %v724_v58, 0.0 }
 0x579   :  { %727 = vadd.xlane.f32.xlu1 %v726_v59  ;;  %v788_v59 = vld [vmem:[#allocation2 + $0x88] sm:$0xff] }
 0x5a3   :  { %v721_v36 = vpop.f32.mrf.mxu3 }
 0x5a4   :  { %v722_v60 = vadd.f32 %v5263_v29, %v721_v36  ;;  %v5266_v36 = vld [vmem:[#allocation2 + $0x80] ss:$0 sm:$0xff] }
 0x5a6   :  { %v725_v30 = vadd.f32 %v722_v60, %v5661_v24 }
 0x5a8   :  { %v729_v35 = vsel %vm105_vm4, %v725_v30, 0.0 }
 0x5a9   :  { %730 = vadd.xlane.f32.xlu0 %v729_v35 }
 0x5ec   :  { %v728_v22 = vpop.xlane.xlu1 %727 }
 0x5ed   :  { %v739_v5 = vmul.f32 %v5816_v4, %v728_v22 }
 0x5ef   :  { %v741_v6 = vsub.f32 %v724_v58, %v739_v5  ;;  %v789_v58 = vld [vmem:[#allocation2 + $0x90] sm:$0xff] }
 0x5f0   :  { %853 = vmatpush.msra.mxu1 %v789_v58  ;;  %v5270_v58 = vld [vmem:[#allocation2 + $0x100] ss:$0 sm:$0xff] }
 0x5f1   :  { %v743_v7 = vmul.f32 %v741_v6, %v741_v6 }
 0x5f2   :  { %854 = vmatpush.msra.mxu1 %v788_v59 }
 0x5f3   :  { %v745_v24 = vsel %vm105_vm4, %v743_v7, 0.0 }
 0x5f4   :  { %746 = vadd.xlane.f32.xlu2 %v745_v24 }
 0x61c   :  { %v731_v8 = vpop.xlane.xlu0 %730 }
 0x61d   :  { %v740_v9 = vmul.f32 %v5816_v4, %v731_v8 }
 0x61f   :  { %v742_v10 = vsub.f32 %v725_v30, %v740_v9 }
 0x621   :  { %v744_v11 = vmul.f32 %v742_v10, %v742_v10 }
 0x623   :  { %v748_v16 = vsel %vm105_vm4, %v744_v11, 0.0 }
 0x624   :  { %749 = vadd.xlane.f32.xlu1 %v748_v16 }
 0x667   :  { %v747_v19 = vpop.xlane.xlu2 %746 }
 0x668   :  { %v751_v20 = vmul.f32 %v747_v19, %v5816_v4 }
 0x66a   :  { %v753_v21 = vadd.f32 1e-05, %v751_v20 }
 0x66c   :  { %5338 = vrsqrt.f32 %v753_v21  ;;  %vm761_vm10 = vweird.f32 %v753_v21 }
 0x672   :  { %v5339_v23 = vpop.eup %5338 }
 0x673   :  { %v756_v25 = vmul.f32 %v5339_v23, %v753_v21  ;;  %vm762_vm9 = vweird.f32 %v5339_v23  ;;  %v917_v21 = vld [vmem:[#allocation2 + $0xf8] sm:$0xff] }
 0x674   :  { %vm763_vm11 = vmor %vm761_vm10, %vm762_vm9  ;;  %945 = vmatpush.msrb.mxu2 %v917_v21  ;;  %vm1786_vm10 = vcmask 1043456  }
 0x675   :  { %v757_v26 = vmul.f32 %v5339_v23, %v756_v25  ;;  %v915_v25 = vld [vmem:[#allocation2 + $0xe8] sm:$0xff] }
 0x677   :  { %v758_v28 = vmul.f32 0.5, %v757_v26  ;;  %v914_v26 = vld [vmem:[#allocation2 + $0xe0] sm:$0xff] }
 0x679   :  { %v759_v33 = vsub.f32 1.5, %v758_v28 }
 0x67b   :  { %v760_v37 = vmul.f32 %v5339_v23, %v759_v33 }
 0x67d   :  { %v764_v34 = vsel %vm763_vm11, %v5339_v23, %v760_v37  ;;  %v916_v23 = vld [vmem:[#allocation2 + $0xf0] sm:$0xff]  ;;  %vm1779_vm11 = vcmask 162816  }
 0x67e   :  { %v775_v38 = vmul.f32 %v764_v34, %v741_v6  ;;  %946 = vmatpush.msrb.mxu2 %v916_v23 }
 0x680   :  { %v778_v40 = vmul.f32 %v5264_v32, %v775_v38  ;;  %947 = vmatpush.msrb.mxu2 %v915_v25 }
 0x682   :  { %v781_v41 = vadd.f32 %v5265_v39, %v778_v40  ;;  %948 = vmatpush.msrb.mxu2 %v914_v26 }
 0x684   :  { %4990 = vmatmul.msk.f32.vlgmr.msra.gmra.mxu0 %vm105_vm4, %v781_v41 }
 0x697   :  { %v750_v45 = vpop.xlane.xlu1 %749 }
 0x698   :  { %v752_v46 = vmul.f32 %v750_v45, %v5816_v4  ;;  %v5269_v45 = vld [vmem:[#allocation2 + $0xd8] ss:$0 sm:$0xff] }
 0x69a   :  { %v754_v48 = vadd.f32 1e-05, %v752_v46 }
 0x69c   :  { %5340 = vrsqrt.f32 %v754_v48  ;;  %vm771_vm13 = vweird.f32 %v754_v48 }
 0x6a2   :  { %v5341_v50 = vpop.eup %5340 }
 0x6a3   :  { %v766_v51 = vmul.f32 %v5341_v50, %v754_v48  ;;  %vm772_vm12 = vweird.f32 %v5341_v50 }
 0x6a4   :  { %vm773_vm14 = vmor %vm771_vm13, %vm772_vm12 }
 0x6a5   :  { %v767_v52 = vmul.f32 %v5341_v50, %v766_v51 }
 0x6a7   :  { %v768_v53 = vmul.f32 0.5, %v767_v52 }
 0x6a9   :  { %v769_v54 = vsub.f32 1.5, %v768_v53 }
 0x6ab   :  { %v770_v55 = vmul.f32 %v5341_v50, %v769_v54 }
 0x6ad   :  { %v774_v56 = vsel %vm773_vm14, %v5341_v50, %v770_v55 }
 0x6ae   :  { %v776_v27 = vmul.f32 %v774_v56, %v742_v10 }
 0x6b0   :  { %v779_v29 = vmul.f32 %v5264_v32, %v776_v27 }
 0x6b2   :  { %v782_v57 = vadd.f32 %v5265_v39, %v779_v29 }
 0x6b4   :  { %4991 = vmatmul.msk.f32.gmra.mxu0 %vm105_vm4, %v782_v57 }
 0x701   :  { %v823_v60 = vpop.f32.mrf.mxu0 }
 0x702   :  { %v824_v30 = vadd.f32 %v5266_v36, %v823_v60 }
 0x704   :  { %v829_v35 = vmax.f32 %v824_v30, 0.0 }
 0x706   :  { %4992 = vmatmul.msk.f32.vlgmr.msra.gmra.mxu1 %vm832_vm15, %v829_v35 }
 0x731   :  { %v826_v61 = vpop.f32.mrf.mxu0 }
 0x732   :  { %v827_v62 = vadd.f32 %v5266_v36, %v826_v61 }
 0x734   :  { %v830_v63 = vmax.f32 %v827_v62, 0.0 }
 0x736   :  { %4993 = vmatmul.msk.f32.gmra.mxu1 %vm832_vm15, %v830_v63 }
 0x783   :  { %v856_v2 = vpop.f32.mrf.mxu1 }
 0x784   :  { %v857_v3 = vadd.f32 %v5267_v0, %v856_v2 }
 0x786   :  { %v862_v22 = vadd.f32 %v857_v3, %v781_v41 }
 0x788   :  { %v864_v5 = vsel %vm105_vm4, %v862_v22, 0.0 }
 0x789   :  { %865 = vadd.xlane.f32.xlu1 %v864_v5 }
 0x7b3   :  { %v859_v6 = vpop.f32.mrf.mxu1 }
 0x7b4   :  { %v860_v7 = vadd.f32 %v5267_v0, %v859_v6 }
 0x7b6   :  { %v863_v24 = vadd.f32 %v860_v7, %v782_v57 }
 0x7b8   :  { %v867_v8 = vsel %vm105_vm4, %v863_v24, 0.0 }
 0x7b9   :  { %868 = vadd.xlane.f32.xlu1 %v867_v8 }
 0x7fc   :  { %v866_v9 = vpop.xlane.xlu1 %865 }
 0x7fd   :  { %v870_v10 = vmul.f32 %v866_v9, %v5816_v4 }
 0x7ff   :  { %v872_v11 = vsub.f32 %v862_v22, %v870_v10 }
 0x801   :  { %v874_v16 = vmul.f32 %v872_v11, %v872_v11 }
 0x803   :  { %v876_v17 = vsel %vm105_vm4, %v874_v16, 0.0 }
 0x804   :  { %877 = vadd.xlane.f32.xlu1 %v876_v17 }
 0x82c   :  { %v869_v1 = vpop.xlane.xlu1 %868 }
 0x82d   :  { %v871_v18 = vmul.f32 %v869_v1, %v5816_v4 }
 0x82f   :  { %v873_v14 = vsub.f32 %v863_v24, %v871_v18 }
 0x831   :  { %v875_v19 = vmul.f32 %v873_v14, %v873_v14 }
 0x833   :  { %v879_v20 = vsel %vm105_vm4, %v875_v19, 0.0 }
 0x834   :  { %880 = vadd.xlane.f32.xlu1 %v879_v20 }
 0x877   :  { %v878_v28 = vpop.xlane.xlu1 %877 }
 0x878   :  { %v882_v33 = vmul.f32 %v878_v28, %v5816_v4 }
 0x87a   :  { %v884_v37 = vadd.f32 1e-05, %v882_v33 }
 0x87c   :  { %5342 = vrsqrt.f32 %v884_v37  ;;  %vm892_vm1 = vweird.f32 %v884_v37 }
 0x882   :  { %v5343_v32 = vpop.eup %5342 }
 0x883   :  { %v887_v34 = vmul.f32 %v5343_v32, %v884_v37  ;;  %vm893_vm0 = vweird.f32 %v5343_v32 }
 0x884   :  { %vm894_vm2 = vmor %vm892_vm1, %vm893_vm0 }
 0x885   :  { %v888_v38 = vmul.f32 %v5343_v32, %v887_v34 }
 0x887   :  { %v889_v39 = vmul.f32 0.5, %v888_v38 }
 0x889   :  { %v890_v40 = vsub.f32 1.5, %v889_v39 }
 0x88b   :  { %v891_v41 = vmul.f32 %v5343_v32, %v890_v40 }
 0x88d   :  { %v895_v43 = vsel %vm894_vm2, %v5343_v32, %v891_v41 }
 0x88e   :  { %v906_v44 = vmul.f32 %v895_v43, %v872_v11 }
 0x890   :  { %v909_v46 = vmul.f32 %v5268_v42, %v906_v44 }
 0x892   :  { %v5835_v47 = vadd.f32 %v5269_v45, %v909_v46 }
 0x894   :  { %4994 = vmatmul.msk.f32.vlgmr.msrb.gmra.mxu2 %vm105_vm4, %v5835_v47 }
 0x8a7   :  { %v881_v48 = vpop.xlane.xlu1 %880 }
 0x8a8   :  { %v883_v49 = vmul.f32 %v881_v48, %v5816_v4 }
 0x8aa   :  { %v885_v50 = vadd.f32 1e-05, %v883_v49 }
 0x8ac   :  { %5344 = vrsqrt.f32 %v885_v50  ;;  %vm902_vm8 = vweird.f32 %v885_v50 }
 0x8b2   :  { %v5345_v51 = vpop.eup %5344 }
 0x8b3   :  { %v897_v52 = vmul.f32 %v5345_v51, %v885_v50  ;;  %vm903_vm3 = vweird.f32 %v5345_v51 }
 0x8b4   :  { %vm904_vm9 = vmor %vm902_vm8, %vm903_vm3 }
 0x8b5   :  { %v898_v53 = vmul.f32 %v5345_v51, %v897_v52 }
 0x8b7   :  { %v899_v54 = vmul.f32 0.5, %v898_v53 }
 0x8b9   :  { %v900_v55 = vsub.f32 1.5, %v899_v54 }
 0x8bb   :  { %v901_v56 = vmul.f32 %v5345_v51, %v900_v55 }
 0x8bd   :  { %v905_v27 = vsel %vm904_vm9, %v5345_v51, %v901_v56 }
 0x8be   :  { %v907_v29 = vmul.f32 %v905_v27, %v873_v14 }
 0x8c0   :  { %v910_v57 = vmul.f32 %v5268_v42, %v907_v29 }
 0x8c2   :  { %v5840_v31 = vadd.f32 %v5269_v45, %v910_v57 }
 0x8c4   :  { %4995 = vmatmul.msk.f32.gmra.mxu2 %vm105_vm4, %v5840_v31 }
 0x917   :  { %v950_v59 = vpop.f32.mrf.mxu2 }
 0x918   :  { %v5844_v36 = vadd.f32 %v5270_v58, %v950_v59 }
 0x91a   :  { %966 = vrot.lane.b32.xlu1 %v5844_v36, %s5603_s0  ;;  %958 = vrot.lane.b32.xlu0 %v5844_v36, %s5604_s25 }
 0x922   :  { %970 = vrot.lane.b32.xlu1 %v5844_v36, %s5606_s27 }
 0x947   :  { %v953_v60 = vpop.f32.mrf.mxu2 }
 0x948   :  { %v5852_v30 = vadd.f32 %v5270_v58, %v953_v60 }
 0x94a   :  { %968 = vrot.lane.b32.xlu0 %v5852_v30, %s5603_s0  ;;  %960 = vrot.lane.b32.xlu2 %v5852_v30, %s5604_s25 }
 0x952   :  { %964 = vrot.lane.b32.xlu0 %v5852_v30, %s5605_s26  ;;  %962 = vrot.lane.b32.xlu2 %v5844_v36, %s5605_s26 }
 0x98c   :  { %v5862_v35 = vpop.permute.xlu0 %958  ;;  %v5864_v61 = vpop.permute.xlu1 %966 }
 0x98d   :  { %1022 = vrot.lane.b32.xlu2 %v5862_v35, %s5606_s27  ;;  %1126 = vrot.lane.b32.xlu1 %v5864_v61, %s5606_s27  ;;  %v5186_v50 = vpack.i.bf16 %v5844_v36, %v5862_v35 }
 0x994   :  { %v971_v62 = vpop.permute.xlu1 %970 }
 0x995   :  { %996 = vrot.lane.b32.xlu2 %v5852_v30, %s5606_s27  ;;  %4996 = vmatpush.xpose.msk.msra.mxu3 %vm151_vm5, %v971_v62 }
 0x998   :  { %4997 = vmatmul.msk.f32.vlgmr.msra.gmra.mxu3 %vm151_vm5, %v5844_v36 }
 0x9a4   :  { %v5875_v63 = vpop.permute.xlu2 %960 }
 0x9a5   :  { %1048 = vrot.lane.b32.xlu0 %v5875_v63, %s5606_s27 }
 0x9ac   :  { %v5879_v0 = vpop.permute.xlu2 %962 }
 0x9ad   :  { %1074 = vrot.lane.b32.xlu1 %v5879_v0, %s5606_s27  ;;  %v5196_v51 = vpack.i.bf16 %v5879_v0, %v5852_v30 }
 0x9bc   :  { %v5883_v2 = vpop.permute.xlu0 %968 }
 0x9bd   :  { %1152 = vrot.lane.b32.xlu0 %v5883_v2, %s5606_s27 }
 0x9c4   :  { %v5887_v3 = vpop.permute.xlu0 %964 }
 0x9c5   :  { %1100 = vrot.lane.b32.xlu2 %v5887_v3, %s5606_s27 }
 0x9e7   :  { %v1023_v22 = vpop.permute.xlu2 %1022 }
 0x9e8   :  { %5000 = vmatpush.xpose.msk.msra.mxu2 %vm151_vm5, %v1023_v22 }
 0x9eb   :  { %5001 = vmatmul.msk.f32.vlgmr.msra.gmra.mxu2 %vm151_vm5, %v5862_v35 }
 0x9ef   :  { %v997_v5 = vpop.permute.xlu2 %996 }
 0x9f0   :  { %4998 = vmatpush.xpose.msk.msrb.mxu0 %vm151_vm5, %v997_v5 }
 0x9f3   :  { %4999 = vmatmul.msk.f32.vlgmr.msrb.gmra.mxu0 %vm151_vm5, %v5852_v30 }
 0x9ff   :  { %v1127_v6 = vpop.permute.xlu1 %1126 }
 0xa00   :  { %5008 = vmatpush.xpose.msk.msrb.mxu2 %vm151_vm5, %v1127_v6 }
 0xa03   :  { %5009 = vmatmul.msk.f32.vlgmr.msrb.gmra.mxu2 %vm151_vm5, %v5864_v61 }
 0xa17   :  { %v1049_v7 = vpop.permute.xlu0 %1048 }
 0xa18   :  { %5002 = vmatpush.xpose.msk.msrb.mxu3 %vm151_vm5, %v1049_v7 }
 0xa1b   :  { %v993_v24 = vpop.f32.mrf.mxu3  ;;  %5003 = vmatmul.msk.f32.vlgmr.msrb.gmra.mxu3 %vm151_vm5, %v5875_v63 }
 0xa1c   :  { %v1178_v8 = vmul.f32 0.35355338, %v993_v24 }
 0xa1e   :  { %v1186_v9 = vsel %vm151_vm5, %v1178_v8, -inf }
 0xa1f   :  { %1187 = vmax.xlane.f32.xlu1 %v1186_v9  ;;  %v1101_v10 = vpop.permute.xlu2 %1100  ;;  %v1075_v11 = vpop.permute.xlu1 %1074 }
 0xa20   :  { %5004 = vmatpush.xpose.msk.msra.mxu0 %vm151_vm5, %v1075_v11  ;;  %5006 = vmatpush.xpose.msk.msrb.mxu1 %vm151_vm5, %v1101_v10 }
 0xa23   :  { %5005 = vmatmul.msk.f32.vlgmr.msra.gmra.mxu0 %vm151_vm5, %v5879_v0  ;;  %5007 = vmatmul.msk.f32.vlgmr.msrb.gmra.mxu1 %vm151_vm5, %v5887_v3 }
 0xa2f   :  { %v1153_v16 = vpop.permute.xlu0 %1152 }
 0xa30   :  { %5010 = vmatpush.xpose.msk.msra.mxu3 %vm151_vm5, %v1153_v16 }
 0xa33   :  { %5011 = vmatmul.msk.f32.vlgmr.msra.gmra.mxu3 %vm151_vm5, %v5883_v2 }
 0xa6e   :  { %v1045_v17 = vpop.f32.mrf.mxu2 }
 0xa6f   :  { %v1180_v1 = vmul.f32 0.35355338, %v1045_v17 }
 0xa70   :  { %v1019_v18 = vpop.f32.mrf.mxu0 }
 0xa71   :  { %v1179_v14 = vmul.f32 0.35355338, %v1019_v18  ;;  %v1192_v19 = vsel %vm151_vm5, %v1180_v1, -inf }
 0xa72   :  { %1193 = vmax.xlane.f32.xlu0 %v1192_v19 }
 0xa73   :  { %v1189_v20 = vsel %vm151_vm5, %v1179_v14, -inf }
 0xa74   :  { %1190 = vmax.xlane.f32.xlu1 %v1189_v20 }
 0xa86   :  { %v1149_v21 = vpop.f32.mrf.mxu2 }
 0xa87   :  { %v1184_v23 = vmul.f32 0.35355338, %v1149_v21 }
 0xa89   :  { %v1204_v25 = vsel %vm151_vm5, %v1184_v23, -inf }
 0xa8a   :  { %1205 = vmax.xlane.f32.xlu0 %v1204_v25 }
 0xa92   :  { %v1188_v41 = vpop.xlane.xlu1 %1187 }
 0xa93   :  { %v1210_v42 = vsub.f32 %v1178_v8, %v1188_v41 }
 0xa95   :  { %v1218_v43 = vmul.f32 1.442695, %v1210_v42 }
 0xa97   :  { %5346 = vpow2.f32 %v1218_v43 }
 0xa9d   :  { %v5920_v48 = vpop.eup %5346 }
 0xa9e   :  { %v1071_v38 = vpop.f32.mrf.mxu3  ;;  %v1234_v49 = vsel %vm151_vm5, %v5920_v48, 0.0 }
 0xa9f   :  { %v1181_v39 = vmul.f32 0.35355338, %v1071_v38 }
 0xaa0   :  { %v1097_v26 = vpop.f32.mrf.mxu0  ;;  %v1123_v28 = vpop.f32.mrf.mxu1 }
 0xaa1   :  { %v1182_v33 = vmul.f32 0.35355338, %v1097_v26  ;;  %v1183_v37 = vmul.f32 0.35355338, %v1123_v28  ;;  %v1195_v40 = vsel %vm151_vm5, %v1181_v39, -inf }
 0xaa3   :  { %v1201_v32 = vsel %vm151_vm5, %v1183_v37, -inf  ;;  %v1198_v34 = vsel %vm151_vm5, %v1182_v33, -inf }
 0xaa4   :  { %1202 = vmax.xlane.f32.xlu1 %v1201_v32  ;;  %1199 = vmax.xlane.f32.xlu2 %v1198_v34  ;;  %v5191_v34 = vpack.i.bf16 %v5864_v61, %v5875_v63 }
 0xaac   :  { %1196 = vmax.xlane.f32.xlu2 %v1195_v40 }
 0xab6   :  { %v1175_v44 = vpop.f32.mrf.mxu3 }
 0xab7   :  { %v1185_v45 = vmul.f32 0.35355338, %v1175_v44 }
 0xab9   :  { %v1207_v46 = vsel %vm151_vm5, %v1185_v45, -inf }
 0xaba   :  { %1208 = vmax.xlane.f32.xlu0 %v1207_v46 }
 0xac2   :  { %1235 = vadd.xlane.f32.xlu0 %v1234_v49 }
 0xad6   :  { %5187 = vrot.lane.b32.xlu0 %v5186_v50, %s5607_s28 }
 0xade   :  { %5197 = vrot.lane.b32.xlu0 %v5196_v51, %s5607_s28 }
 0xae5   :  { %v1194_v27 = vpop.xlane.xlu0 %1193 }
 0xae6   :  { %1404 = vrot.lane.b32.xlu0 %v5887_v3, %s5607_s28  ;;  %v1212_v58 = vsub.f32 %v1180_v1, %v1194_v27 }
 0xae7   :  { %v1191_v52 = vpop.xlane.xlu1 %1190 }
 0xae8   :  { %v1211_v53 = vsub.f32 %v1179_v14, %v1191_v52  ;;  %v1222_v36 = vmul.f32 1.442695, %v1212_v58 }
 0xaea   :  { %v1220_v54 = vmul.f32 1.442695, %v1211_v53 }
 0xaec   :  { %5348 = vpow2.f32 %v1220_v54 }
 0xaf2   :  { %v5932_v55 = vpop.eup %5348 }
 0xaf3   :  { %v1237_v56 = vsel %vm151_vm5, %v5932_v55, 0.0 }
 0xaf4   :  { %1238 = vadd.xlane.f32.xlu1 %v1237_v56 }
 0xafd   :  { %v1206_v60 = vpop.xlane.xlu0 %1205 }
 0xafe   :  { %v1216_v0 = vsub.f32 %v1184_v23, %v1206_v60 }
 0xb00   :  { %v1230_v7 = vmul.f32 1.442695, %v1216_v0 }
 0xb17   :  { %v1200_v29 = vpop.xlane.xlu2 %1199  ;;  %v1203_v30 = vpop.xlane.xlu1 %1202 }
 0xb18   :  { %v1214_v57 = vsub.f32 %v1182_v33, %v1200_v29  ;;  %v1215_v22 = vsub.f32 %v1183_v37, %v1203_v30 }
 0xb1a   :  { %v1226_v59 = vmul.f32 1.442695, %v1214_v57  ;;  %v1228_v24 = vmul.f32 1.442695, %v1215_v22 }
 0xb1c   :  { %5350 = vpow2.f32 %v1226_v59 }
 0xb1d   :  { %5352 = vpow2.f32 %v1222_v36 }
 0xb1f   :  { %v1197_v35 = vpop.xlane.xlu2 %1196 }
 0xb20   :  { %v1213_v62 = vsub.f32 %v1181_v39, %v1197_v35 }
 0xb22   :  { %v5351_v3 = vpop.eup %5350  ;;  %v1224_v5 = vmul.f32 1.442695, %v1213_v62 }
 0xb23   :  { %v1246_v6 = vsel %vm151_vm5, %v5351_v3, 0.0  ;;  %v5353_v8 = vpop.eup %5352 }
 0xb24   :  { %5354 = vpow2.f32 %v1224_v5  ;;  %1247 = vadd.xlane.f32.xlu2 %v1246_v6  ;;  %v1240_v10 = vsel %vm151_vm5, %v5353_v8, 0.0 }
 0xb25   :  { %5356 = vpow2.f32 %v1230_v7 }
 0xb26   :  { %5358 = vpow2.f32 %v1228_v24  ;;  %v922_v24 = vld [vmem:[#allocation2 + $0x120] sm:$0xff] }
 0xb2a   :  { %v5937_v9 = vpop.eup %5354 }
 0xb2b   :  { %v1243_v11 = vsel %vm151_vm5, %v5937_v9, 0.0  ;;  %v5357_v1 = vpop.eup %5356 }
 0xb2c   :  { %1241 = vadd.xlane.f32.xlu2 %v1240_v10  ;;  %1244 = vadd.xlane.f32.xlu1 %v1243_v11  ;;  %v5359_v18 = vpop.eup %5358  ;;  %v1252_v19 = vsel %vm151_vm5, %v5357_v1, 0.0  ;;  %v919_v10 = vld [vmem:[#allocation2 + $0x108] sm:$0xff] }
 0xb2d   :  { %v1209_v16 = vpop.xlane.xlu0 %1208  ;;  %v1249_v20 = vsel %vm151_vm5, %v5359_v18, 0.0 }
 0xb2e   :  { %v1217_v17 = vsub.f32 %v1185_v45, %v1209_v16 }
 0xb30   :  { %v1232_v14 = vmul.f32 1.442695, %v1217_v17 }
 0xb32   :  { %5360 = vpow2.f32 %v1232_v14 }
 0xb34   :  { %1253 = vadd.xlane.f32.xlu2 %v1252_v19  ;;  %1250 = vadd.xlane.f32.xlu1 %v1249_v20 }
 0xb35   :  { %v1236_v25 = vpop.xlane.xlu0 %1235 }
 0xb36   :  { %5362 = vrcp.f32 %v1236_v25 }
 0xb38   :  { %v5361_v21 = vpop.eup %5360 }
 0xb39   :  { %v1255_v23 = vsel %vm151_vm5, %v5361_v21, 0.0 }
 0xb3c   :  { %1256 = vadd.xlane.f32.xlu1 %v1255_v23  ;;  %v5363_v26 = vpop.eup %5362 }
 0xb3d   :  { %v1266_v32 = vmul.f32 %v5363_v26, %v5920_v48 }
 0xb48   :  { %v5188_v28 = vpop.permute.xlu0 %5187 }
 0xb49   :  { %v5190_v33 = vunpack.i.h.bf16 %v5188_v28  ;;  %v5189_v37 = vunpack.i.l.bf16 %v5188_v28  ;;  %v5271_v28 = vld [vmem:[#allocation2 + $0x128] ss:$0 sm:$0xff] }
 0xb4b   :  { %1295 = vmatpush.msrb.mxu0 %v5190_v33  ;;  %1347 = vmatpush.msra.mxu2 %v5189_v37 }
 0xb4c   :  { %5192 = vrot.lane.b32.xlu2 %v5191_v34, %s5607_s28  ;;  %5012 = vmatmul.msk.f32.vlgmr.msrb.gmra.mxu0 %vm151_vm5, %v1266_v32 }
 0xb50   :  { %v5198_v38 = vpop.permute.xlu0 %5197 }
 0xb51   :  { %v5200_v39 = vunpack.i.h.bf16 %v5198_v38  ;;  %v5199_v40 = vunpack.i.l.bf16 %v5198_v38 }
 0xb53   :  { %1321 = vmatpush.msra.mxu1 %v5199_v40  ;;  %1399 = vmatpush.msra.mxu0 %v5200_v39 }
 0xb55   :  { %1456 = vrot.lane.b32.xlu1 %v5883_v2, %s5607_s28  ;;  %1531 = vmatpush.msrb.mxu0 %v922_v24 }
 0xb58   :  { %v1405_v41 = vpop.permute.xlu0 %1404 }
 0xb59   :  { %1425 = vmatpush.msrb.mxu1 %v1405_v41 }
 0xb67   :  { %v1239_v42 = vpop.xlane.xlu1 %1238 }
 0xb68   :  { %5364 = vrcp.f32 %v1239_v42  ;;  %v1762_v42 = vld [vmem:[%s6675_s1] sm:$0xff] }
 0xb6e   :  { %v5365_v43 = vpop.eup %5364 }
 0xb6f   :  { %v1267_v61 = vmul.f32 %v5365_v43, %v5932_v55  ;;  %v1778_v43 = vld [vmem:[#allocation2 + $0x4d8] sm:$0xf] }
 0xb71   :  { %5013 = vmatmul.msk.f32.vlgmr.msra.gmra.mxu1 %vm151_vm5, %v1267_v61  ;;  %v1777_v61 = vld [vmem:[#allocation2 + $0x4d0] sm:$0xff] }
 0xb97   :  { %v1248_v63 = vpop.xlane.xlu2 %1247 }
 0xb98   :  { %5366 = vrcp.f32 %v1248_v63 }
 0xb9e   :  { %v5367_v44 = vpop.eup %5366 }
 0xb9f   :  { %v1270_v45 = vmul.f32 %v5367_v44, %v5351_v3  ;;  %v1242_v46 = vpop.xlane.xlu2 %1241  ;;  %v1245_v48 = vpop.xlane.xlu1 %1244 }
 0xba0   :  { %5368 = vrcp.f32 %v1242_v46  ;;  %v1776_v46 = vld [vmem:[#allocation2 + $0x4c8] sm:$0xff] }
 0xba1   :  { %5016 = vmatmul.msk.f32.vlgmr.msra.gmra.mxu0 %vm151_vm5, %v1270_v45  ;;  %5370 = vrcp.f32 %v1245_v48 }
 0xba6   :  { %v5369_v49 = vpop.eup %5368 }
 0xba7   :  { %v1268_v2 = vmul.f32 %v5369_v49, %v5353_v8  ;;  %v1254_v50 = vpop.xlane.xlu2 %1253  ;;  %v1251_v51 = vpop.xlane.xlu1 %1250  ;;  %v921_v8 = vld [vmem:[#allocation2 + $0x118] sm:$0xff] }
 0xba8   :  { %5372 = vrcp.f32 %v1254_v50  ;;  %v5371_v52 = vpop.eup %5370  ;;  %1532 = vmatpush.msrb.mxu0 %v921_v8  ;;  %v1763_v50 = vld [vmem:[%s6675_s1 + $0x8] sm:$0xff]  ;;  %s5611_s1 = smov 32  }
 0xba9   :  { %5374 = vrcp.f32 %v1251_v51  ;;  %5014 = vmatmul.msk.f32.vlgmr.msra.gmra.mxu2 %vm151_vm5, %v1268_v2  ;;  %v1269_v57 = vmul.f32 %v5371_v52, %v5937_v9  ;;  %v920_v9 = vld [vmem:[#allocation2 + $0x110] sm:$0xff] }
 0xbaa   :  { %1533 = vmatpush.msrb.mxu0 %v920_v9 }
 0xbac   :  { %1534 = vmatpush.msrb.mxu0 %v919_v10 }
 0xbae   :  { %v5373_v53 = vpop.eup %5372  ;;  %5030 = vmatpush.msk.msra.mxu0 %vm1786_vm10, %v1778_v43  ;;  %v1601_v43 = vld [vmem:[#allocation2 + $0x178] sm:$0xff] }
 0xbaf   :  { %v5375_v54 = vpop.eup %5374  ;;  %v5193_v55 = vpop.permute.xlu2 %5192  ;;  %v1272_v58 = vmul.f32 %v5373_v53, %v5357_v1 }
 0xbb0   :  { %v1271_v56 = vmul.f32 %v5375_v54, %v5359_v18  ;;  %v5195_v27 = vunpack.i.h.bf16 %v5193_v55  ;;  %v5194_v29 = vunpack.i.l.bf16 %v5193_v55  ;;  %v1257_v59 = vpop.xlane.xlu1 %1256  ;;  %1804 = vmatpush.msra.mxu0 %v1777_v61  ;;  %v1597_v55 = vld [vmem:[#allocation2 + $0x158] sm:$0xff]  ;;  %v1600_v61 = vld [vmem:[#allocation2 + $0x170] sm:$0xff] }
 0xbb1   :  { %5376 = vrcp.f32 %v1257_v59  ;;  %1629 = vmatpush.msra.mxu1 %v1597_v55 }
 0xbb2   :  { %5017 = vmatmul.msk.f32.vlgmr.msrb.gmra.mxu1 %vm151_vm5, %v1271_v56  ;;  %1373 = vmatpush.msrb.mxu3 %v5194_v29  ;;  %v1596_v56 = vld [vmem:[#allocation2 + $0x150] sm:$0xff]  ;;  %v1594_v29 = vld [vmem:[#allocation2 + $0x140] sm:$0xff] }
 0xbb3   :  { %1451 = vmatpush.msrb.mxu2 %v5195_v27  ;;  %5015 = vmatmul.msk.f32.vlgmr.msrb.gmra.mxu3 %vm151_vm5, %v1269_v57  ;;  %v1595_v27 = vld [vmem:[#allocation2 + $0x148] sm:$0xff] }
 0xbb4   :  { %5018 = vmatmul.msk.f32.vlgmr.msrb.gmra.mxu2 %vm151_vm5, %v1272_v58  ;;  %1805 = vmatpush.msra.mxu0 %v1776_v46 }
 0xbb5   :  { %1630 = vmatpush.msra.mxu1 %v1596_v56  ;;  %v5276_v56 = vld [vmem:[#allocation2 + $0x1a8] ss:$0 sm:$0xff] }
 0xbb7   :  { %v5377_v36 = vpop.eup %5376  ;;  %1631 = vmatpush.msra.mxu1 %v1595_v27 }
 0xbb8   :  { %v1273_v60 = vmul.f32 %v5377_v36, %v5361_v21 }
 0xbb9   :  { %1632 = vmatpush.msra.mxu1 %v1594_v29 }
 0xbc7   :  { %v1457_v30 = vpop.permute.xlu1 %1456 }
 0xbc8   :  { %1477 = vmatpush.msra.mxu3 %v1457_v30 }
 0xbc9   :  { %5019 = vmatmul.msk.f32.vlgmr.msra.gmra.mxu3 %vm151_vm5, %v1273_v60  ;;  %v1297_v35 = vpop.f32.mrf.mxu0 }
 0xbee   :  { %v1323_v0 = vpop.f32.mrf.mxu1 }
 0xc1e   :  { %v1401_v62 = vpop.f32.mrf.mxu0 }
 0xc1f   :  { %1492 = vrot.lane.b32.xlu2 %v1401_v62, %s5609_s30 }
 0xc2c   :  { %v1349_v3 = vpop.f32.mrf.mxu2 }
 0xc2d   :  { %1484 = vrot.lane.b32.xlu0 %v1349_v3, %s5600_s21  ;;  %v1817_v3 = vld [vmem:[#allocation2 + $0x1d0] sm:$0xff] }
 0xc2f   :  { %v1427_v22 = vpop.f32.mrf.mxu1 }
 0xc30   :  { %1494 = vrot.lane.b32.xlu1 %v1427_v22, %s5609_s30 }
 0xc36   :  { %v1375_v5 = vpop.f32.mrf.mxu3 }
 0xc37   :  { %v1453_v6 = vpop.f32.mrf.mxu2  ;;  %1486 = vrot.lane.b32.xlu2 %v1375_v5, %s5600_s21 }
 0xc38   :  { %1500 = vrot.lane.b32.xlu0 %v1453_v6, %s5608_s29  ;;  %v1816_v6 = vld [vmem:[#allocation2 + $0x1c8] sm:$0xff] }
 0xc4c   :  { %v1479_v7 = vpop.f32.mrf.mxu3 }
 0xc4d   :  { %1502 = vrot.lane.b32.xlu0 %v1479_v7, %s5608_s29  ;;  %v5272_v7 = vld [vmem:[#allocation2 + $0x130] ss:$0 sm:$0xff] }
 0xc79   :  { %v1493_v17 = vpop.permute.xlu2 %1492 }
 0xc91   :  { %v1487_v19 = vpop.permute.xlu2 %1486 }
 0xc92   :  { %v1507_v21 = vsel %vm151_vm5, %v1323_v0, %v1487_v19  ;;  %v1818_v0 = vld [vmem:[#allocation2 + $0x1d8] sm:$0xff] }
 0xc93   :  { %1846 = vmatpush.msrb.mxu1 %v1818_v0  ;;  %v1605_v19 = vld [vmem:[#allocation2 + $0x198] sm:$0xff] }
 0xc95   :  { %1847 = vmatpush.msrb.mxu1 %v1817_v3 }
 0xc97   :  { %1848 = vmatpush.msrb.mxu1 %v1816_v6 }
 0xc9f   :  { %v1485_v11 = vpop.permute.xlu0 %1484 }
 0xca0   :  { %v1506_v16 = vsel %vm151_vm5, %v1297_v35, %v1485_v11  ;;  %v1815_v11 = vld [vmem:[#allocation2 + $0x1c0] sm:$0xff] }
 0xca1   :  { %v1508_v1 = vsel %vm688_vm6, %v1506_v16, %v1493_v17  ;;  %v5273_v17 = vld [vmem:[#allocation2 + $0x138] ss:$0 sm:$0xff]  ;;  %1849 = vmatpush.msrb.mxu1 %v1815_v11 }
 0xca2   :  { %v1495_v20 = vpop.permute.xlu1 %1494 }
 0xca3   :  { %v1509_v23 = vsel %vm688_vm6, %v1507_v21, %v1495_v20 }
 0xcaa   :  { %v1501_v18 = vpop.permute.xlu0 %1500 }
 0xcab   :  { %v1510_v14 = vsel %vm691_vm7, %v1508_v1, %v1501_v18 }
 0xcac   :  { %5020 = vmatmul.msk.f32.vlgmr.msrb.gmra.mxu0 %vm105_vm4, %v1510_v14  ;;  %v1606_v14 = vld [vmem:[#allocation2 + $0x1a0] sm:$0xff] }
 0xcad   :  { %1657 = vmatpush.msra.mxu2 %v1606_v14  ;;  %v1727_v14 = vld [vmem:[#allocation2 + $0x458] sm:$0xff] }
 0xcae   :  { %1748 = vmatpush.msrb.mxu3 %v1727_v14 }
 0xcaf   :  { %1658 = vmatpush.msra.mxu2 %v1605_v19  ;;  %v1726_v19 = vld [vmem:[#allocation2 + $0x450] sm:$0xff] }
 0xcb0   :  { %1749 = vmatpush.msrb.mxu3 %v1726_v19 }
 0xcbf   :  { %v1503_v25 = vpop.permute.xlu0 %1502 }
 0xcc0   :  { %v1511_v26 = vsel %vm691_vm7, %v1509_v23, %v1503_v25 }
 0xcc1   :  { %5021 = vmatmul.msk.f32.gmra.mxu0 %vm105_vm4, %v1511_v26 }
 0xd29   :  { %v1536_v33 = vpop.f32.mrf.mxu0 }
 0xd2a   :  { %v1537_v37 = vadd.f32 %v5271_v28, %v1536_v33 }
 0xd2c   :  { %v1542_v32 = vadd.f32 %v1537_v37, %v5835_v47 }
 0xd2e   :  { %v1544_v34 = vsel %vm105_vm4, %v1542_v32, 0.0 }
 0xd2f   :  { %1545 = vadd.xlane.f32.xlu2 %v1544_v34 }
 0xd3e   :  { %v1539_v38 = vpop.f32.mrf.mxu0 }
 0xd3f   :  { %v1540_v39 = vadd.f32 %v5271_v28, %v1539_v38 }
 0xd41   :  { %v1543_v40 = vadd.f32 %v1540_v39, %v5840_v31 }
 0xd43   :  { %v1547_v41 = vsel %vm105_vm4, %v1543_v40, 0.0 }
 0xd44   :  { %1548 = vadd.xlane.f32.xlu1 %v1547_v41  ;;  %v1603_v41 = vld [vmem:[#allocation2 + $0x188] sm:$0xff] }
 0xd5d   :  { %1765 = vperm.xlu1 %5201, %v1762_v42   ;;  %v1602_v42 = vld [vmem:[#allocation2 + $0x180] sm:$0xff] }
 0xda2   :  { %v1546_v47 = vpop.xlane.xlu2 %1545 }
 0xda3   :  { %v1550_v63 = vmul.f32 %v1546_v47, %v5816_v4  ;;  %v1599_v47 = vld [vmem:[#allocation2 + $0x168] sm:$0xff] }
 0xda5   :  { %v1552_v44 = vsub.f32 %v1542_v32, %v1550_v63 }
 0xda7   :  { %v1554_v45 = vmul.f32 %v1552_v44, %v1552_v44 }
 0xda9   :  { %v1556_v31 = vsel %vm105_vm4, %v1554_v45, 0.0  ;;  %v5274_v45 = vld [vmem:[#allocation2 + $0x160] ss:$0 sm:$0xff] }
 0xdaa   :  { %1557 = vadd.xlane.f32.xlu0 %v1556_v31 }
 0xdb7   :  { %v1549_v48 = vpop.xlane.xlu1 %1548 }
 0xdb8   :  { %v1551_v49 = vmul.f32 %v1549_v48, %v5816_v4 }
 0xdba   :  { %v5985_v2 = vsub.f32 %v1543_v40, %v1551_v49  ;;  %v1604_v40 = vld [vmem:[#allocation2 + $0x190] sm:$0xff] }
 0xdbb   :  { %1659 = vmatpush.msra.mxu2 %v1604_v40 }
 0xdbc   :  { %v1555_v51 = vmul.f32 %v5985_v2, %v5985_v2 }
 0xdbd   :  { %1660 = vmatpush.msra.mxu2 %v1603_v41  ;;  %v5277_v41 = vld [vmem:[#allocation2 + $0x1b0] ss:$0 sm:$0xff] }
 0xdbe   :  { %1768 = vperm.xlu0 %5170, %v1763_v50   ;;  %v1559_v52 = vsel %vm105_vm4, %v1555_v51, 0.0  ;;  %v5275_v51 = vld [vmem:[#allocation2 + $0x1e0] ss:$0 sm:$0xff] }
 0xdbf   :  { %1560 = vadd.xlane.f32.xlu2 %v1559_v52  ;;  %1661 = vmatpush.msra.mxu2 %v1602_v42 }
 0xdc1   :  { %1662 = vmatpush.msra.mxu2 %v1601_v43 }
 0xdc3   :  { %1663 = vmatpush.msra.mxu2 %v1600_v61 }
 0xdc5   :  { %1664 = vmatpush.msra.mxu2 %v1599_v47 }
 0xdcf   :  { %v1766_v53 = vpop.permute.xlu1 %1765 }
 0xdd0   :  { %vm1770_vm12 = vcmp.eq.s32.totalorder %v5651_v13, %v1766_v53 }
 0xdd1   :  { %v5028_v54 = vsel %vm1770_vm12, 1.0, %v5602_v15 }
 0xdd2   :  { %5031 = vmatmul.msk.f32.vlgmr.msra.gmra.mxu0 %vm1779_vm11, %v5028_v54 }
 0xe1d   :  { %v1558_v57 = vpop.xlane.xlu0 %1557 }
 0xe1e   :  { %v1562_v58 = vmul.f32 %v1558_v57, %v5816_v4 }
 0xe20   :  { %v1564_v59 = vadd.f32 1e-05, %v1562_v58 }
 0xe22   :  { %5378 = vrsqrt.f32 %v1564_v59  ;;  %vm1572_vm14 = vweird.f32 %v1564_v59 }
 0xe28   :  { %v5379_v36 = vpop.eup %5378 }
 0xe29   :  { %v1567_v60 = vmul.f32 %v5379_v36, %v1564_v59  ;;  %vm1573_vm13 = vweird.f32 %v5379_v36 }
 0xe2a   :  { %vm1574_vm1 = vmor %vm1572_vm14, %vm1573_vm13 }
 0xe2b   :  { %v1568_v30 = vmul.f32 %v5379_v36, %v1567_v60 }
 0xe2d   :  { %v1569_v35 = vmul.f32 0.5, %v1568_v30 }
 0xe2f   :  { %v1570_v62 = vsub.f32 1.5, %v1569_v35 }
 0xe30   :  { %v1769_v22 = vpop.permute.xlu0 %1768 }
 0xe31   :  { %v1571_v5 = vmul.f32 %v5379_v36, %v1570_v62  ;;  %vm1771_vm0 = vcmp.eq.s32.totalorder %v5651_v13, %v1769_v22 }
 0xe32   :  { %v1561_v24 = vpop.xlane.xlu2 %1560  ;;  %v5029_v8 = vsel %vm1771_vm0, 1.0, %v5602_v15 }
 0xe33   :  { %v1575_v9 = vsel %vm1574_vm1, %v5379_v36, %v1571_v5  ;;  %v1563_v10 = vmul.f32 %v1561_v24, %v5816_v4  ;;  %5032 = vmatmul.msk.f32.gmra.mxu0 %vm1779_vm11, %v5029_v8 }
 0xe34   :  { %v1586_v16 = vmul.f32 %v1575_v9, %v1552_v44 }
 0xe35   :  { %v1565_v1 = vadd.f32 1e-05, %v1563_v10 }
 0xe36   :  { %v1589_v18 = vmul.f32 %v5272_v7, %v1586_v16 }
 0xe37   :  { %5380 = vrsqrt.f32 %v1565_v1  ;;  %vm1582_vm3 = vweird.f32 %v1565_v1 }
 0xe38   :  { %v1592_v20 = vadd.f32 %v5273_v17, %v1589_v18 }
 0xe3a   :  { %5022 = vmatmul.msk.f32.vlgmr.msra.gmra.mxu1 %vm105_vm4, %v1592_v20 }
 0xe3d   :  { %v5381_v15 = vpop.eup %5380 }
 0xe3e   :  { %v1577_v21 = vmul.f32 %v5381_v15, %v1565_v1  ;;  %vm1583_vm2 = vweird.f32 %v5381_v15 }
 0xe3f   :  { %vm1584_vm8 = vmor %vm1582_vm3, %vm1583_vm2 }
 0xe40   :  { %v1578_v23 = vmul.f32 %v5381_v15, %v1577_v21 }
 0xe42   :  { %v1579_v25 = vmul.f32 0.5, %v1578_v23 }
 0xe44   :  { %v1580_v26 = vsub.f32 1.5, %v1579_v25 }
 0xe46   :  { %v1581_v28 = vmul.f32 %v5381_v15, %v1580_v26 }
 0xe48   :  { %v1585_v33 = vsel %vm1584_vm8, %v5381_v15, %v1581_v28  ;;  %v1724_v15 = vld [vmem:[#allocation2 + $0x440] sm:$0xff] }
 0xe49   :  { %v1587_v37 = vmul.f32 %v1585_v33, %v5985_v2 }
 0xe4b   :  { %v1590_v32 = vmul.f32 %v5272_v7, %v1587_v37 }
 0xe4d   :  { %v1593_v34 = vadd.f32 %v5273_v17, %v1590_v32 }
 0xe4f   :  { %5023 = vmatmul.msk.f32.gmra.mxu1 %vm105_vm4, %v1593_v34  ;;  %v1807_v38 = vpop.f32.mrf.mxu0 }
 0xe50   :  { %v6004_v39 = vmul.f32 5.656854, %v1807_v38 }
 0xe57   :  { %5033 = vmatmul.msk.f32.vlgmr.msrb.gmra.mxu1 %vm105_vm4, %v6004_v39 }
 0xeb0   :  { %v1810_v63 = vpop.f32.mrf.mxu0 }
 0xeb1   :  { %v6008_v44 = vmul.f32 5.656854, %v1810_v63  ;;  %v5278_v63 = vld [vmem:[#allocation2 + $0x1b8] ss:$0 sm:$0xff] }
 0xeb3   :  { %5034 = vmatmul.msk.f32.gmra.mxu1 %vm105_vm4, %v6008_v44 }
 0xeb7   :  { %v1634_v31 = vpop.f32.mrf.mxu1 }
 0xeb8   :  { %v1635_v46 = vadd.f32 %v5274_v45, %v1634_v31 }
 0xeba   :  { %v1640_v48 = vmax.f32 %v1635_v46, 0.0 }
 0xebc   :  { %5024 = vmatmul.msk.f32.vlgmr.msra.gmra.mxu2 %vm832_vm15, %v1640_v48 }
 0xecc   :  { %v1637_v49 = vpop.f32.mrf.mxu1 }
 0xecd   :  { %v1638_v2 = vadd.f32 %v5274_v45, %v1637_v49 }
 0xecf   :  { %v1641_v50 = vmax.f32 %v1638_v2, 0.0 }
 0xed1   :  { %5025 = vmatmul.msk.f32.gmra.mxu2 %vm832_vm15, %v1641_v50 }
 0xed4   :  { %v1851_v52 = vpop.f32.mrf.mxu1 }
 0xed5   :  { %v6014_v53 = vadd.f32 %v5275_v51, %v1851_v52 }
 0xed7   :  { %1859 = vrot.lane.b32.xlu1 %v6014_v53, %s5604_s25 }
 0xedf   :  { %1863 = vrot.lane.b32.xlu1 %v6014_v53, %s5605_s26 }
 0xf30   :  { %v1854_v54 = vpop.f32.mrf.mxu1 }
 0xf31   :  { %v6020_v55 = vadd.f32 %v5275_v51, %v1854_v54 }
 0xf33   :  { %1865 = vrot.lane.b32.xlu1 %v6020_v55, %s5605_s26 }
 0xf3b   :  { %1861 = vrot.lane.b32.xlu1 %v6020_v55, %s5604_s25 }
 0xf3f   :  { %v1666_v27 = vpop.f32.mrf.mxu2 }
 0xf40   :  { %v1667_v29 = vadd.f32 %v5276_v56, %v1666_v27 }
 0xf42   :  { %v1672_v57 = vadd.f32 %v1667_v29, %v1592_v20  ;;  %v1725_v20 = vld [vmem:[#allocation2 + $0x448] sm:$0xff] }
 0xf43   :  { %1869 = vrot.lane.b32.xlu1 %v6020_v55, %s5603_s0  ;;  %1750 = vmatpush.msrb.mxu3 %v1725_v20  ;;  %v6120_v20 = vld [vmem:[#allocation2 + $0x460] ss:$0 sm:$0xff] }
 0xf44   :  { %v1674_v58 = vsel %vm105_vm4, %v1672_v57, 0.0 }
 0xf45   :  { %1675 = vadd.xlane.f32.xlu2 %v1674_v58  ;;  %1751 = vmatpush.msrb.mxu3 %v1724_v15 }
 0xf49   :  { %v6032_v35 = vpop.permute.xlu1 %1859 }
 0xf4b   :  { %1897 = vrot.lane.b32.xlu1 %v6020_v55, %s5606_s27 }
 0xf51   :  { %v6034_v62 = vpop.permute.xlu1 %1863 }
 0xf54   :  { %v1669_v59 = vpop.f32.mrf.mxu2 }
 0xf55   :  { %v1670_v36 = vadd.f32 %v5276_v56, %v1669_v59 }
 0xf57   :  { %v1673_v60 = vadd.f32 %v1670_v36, %v1593_v34 }
 0xf59   :  { %v1677_v30 = vsel %vm105_vm4, %v1673_v60, 0.0 }
 0xf5a   :  { %1678 = vadd.xlane.f32.xlu2 %v1677_v30  ;;  %v1760_v30 = vshrl.u32 %v35_v12, 7 }
 0xf5c   :  { %vm6096_vm0 = vcmp.gt.s32.totalorder %v5651_v13, %v1760_v30 }
 0xfa5   :  { %v6036_v0 = vpop.permute.xlu1 %1865 }
 0xfa6   :  { %2001 = vrot.lane.b32.xlu1 %v6036_v0, %s5606_s27 }
 0xfad   :  { %v6040_v3 = vpop.permute.xlu1 %1861 }
 0xfb5   :  { %v6042_v22 = vpop.permute.xlu1 %1869 }
 0xfb6   :  { %2053 = vrot.lane.b32.xlu1 %v6042_v22, %s5606_s27 }
 0xfb8   :  { %v1676_v5 = vpop.xlane.xlu2 %1675 }
 0xfb9   :  { %v1680_v6 = vmul.f32 %v1676_v5, %v5816_v4 }
 0xfbb   :  { %v1682_v7 = vsub.f32 %v1672_v57, %v1680_v6 }
 0xfbd   :  { %v1898_v24 = vpop.permute.xlu1 %1897  ;;  %v1684_v8 = vmul.f32 %v1682_v7, %v1682_v7 }
 0xfbe   :  { %5037 = vmatpush.xpose.msk.msrb.mxu2 %vm151_vm5, %v1898_v24 }
 0xfbf   :  { %v1686_v9 = vsel %vm105_vm4, %v1684_v8, 0.0 }
 0xfc0   :  { %1687 = vadd.xlane.f32.xlu2 %v1686_v9 }
 0xfc1   :  { %5038 = vmatmul.msk.f32.vlgmr.msrb.gmra.mxu2 %vm151_vm5, %v6020_v55 }
 0xfcd   :  { %v1679_v10 = vpop.xlane.xlu2 %1678 }
 0xfce   :  { %v1681_v11 = vmul.f32 %v1679_v10, %v5816_v4 }
 0xfd0   :  { %v6052_v16 = vsub.f32 %v1673_v60, %v1681_v11 }
 0xfd2   :  { %v1685_v17 = vmul.f32 %v6052_v16, %v6052_v16 }
 0xfd4   :  { %v1689_v1 = vsel %vm105_vm4, %v1685_v17, 0.0 }
 0xfd5   :  { %1690 = vadd.xlane.f32.xlu0 %v1689_v1 }
 0xfd8   :  { %1867 = vrot.lane.b32.xlu2 %v6014_v53, %s5603_s0 }
 0xfe0   :  { %1871 = vrot.lane.b32.xlu2 %v6014_v53, %s5606_s27 }
 0xfe8   :  { %1923 = vrot.lane.b32.xlu2 %v6032_v35, %s5606_s27 }
 0xff0   :  { %1975 = vrot.lane.b32.xlu2 %v6034_v62, %s5606_s27 }
 0xff8   :  { %1949 = vrot.lane.b32.xlu2 %v6040_v3, %s5606_s27 }
0x1018   :  { %v2002_v18 = vpop.permute.xlu1 %2001 }
0x1019   :  { %5045 = vmatpush.xpose.msk.msra.mxu2 %vm151_vm5, %v2002_v18 }
0x101c   :  { %5046 = vmatmul.msk.f32.vlgmr.msra.gmra.mxu2 %vm151_vm5, %v6036_v0 }
0x1028   :  { %v2054_v27 = vpop.permute.xlu1 %2053 }
0x1033   :  { %v1688_v21 = vpop.xlane.xlu2 %1687 }
0x1034   :  { %v1692_v23 = vmul.f32 %v1688_v21, %v5816_v4 }
0x1036   :  { %v1694_v25 = vadd.f32 1e-05, %v1692_v23 }
0x1038   :  { %5382 = vrsqrt.f32 %v1694_v25  ;;  %vm1702_vm10 = vweird.f32 %v1694_v25 }
0x103b   :  { %v6071_v26 = vpop.permute.xlu2 %1867 }
0x103c   :  { %2027 = vrot.lane.b32.xlu0 %v6071_v26, %s5606_s27 }
0x103e   :  { %v5383_v28 = vpop.eup %5382 }
0x103f   :  { %v1697_v33 = vmul.f32 %v5383_v28, %v1694_v25  ;;  %vm1703_vm9 = vweird.f32 %v5383_v28 }
0x1040   :  { %vm1704_vm11 = vmor %vm1702_vm10, %vm1703_vm9 }
0x1041   :  { %v1698_v37 = vmul.f32 %v5383_v28, %v1697_v33 }
0x1043   :  { %v1699_v32 = vmul.f32 0.5, %v1698_v37  ;;  %v1872_v34 = vpop.permute.xlu2 %1871 }
0x1044   :  { %5035 = vmatpush.xpose.msk.msra.mxu3 %vm151_vm5, %v1872_v34  ;;  %v1920_v60 = vpop.f32.mrf.mxu2 }
0x1045   :  { %v1700_v38 = vsub.f32 1.5, %v1699_v32  ;;  %v2080_v37 = vmul.f32 0.35355338, %v1920_v60  ;;  %v5207_v60 = vpack.i.bf16 %v6034_v62, %v6071_v26 }
0x1047   :  { %v1701_v40 = vmul.f32 %v5383_v28, %v1700_v38  ;;  %v2090_v38 = vsel %vm6096_vm0, -1e+09, %v2080_v37 }
0x1048   :  { %v1691_v42 = vpop.xlane.xlu0 %1690 }
0x1049   :  { %v1705_v43 = vsel %vm1704_vm11, %v5383_v28, %v1701_v40  ;;  %v1693_v61 = vmul.f32 %v1691_v42, %v5816_v4 }
0x104a   :  { %v1716_v47 = vmul.f32 %v1705_v43, %v1682_v7  ;;  %v2100_v43 = vsel %vm151_vm5, %v2090_v38, -inf }
0x104b   :  { %v1695_v45 = vadd.f32 1e-05, %v1693_v61  ;;  %v1924_v31 = vpop.permute.xlu2 %1923 }
0x104c   :  { %v1719_v46 = vmul.f32 %v5277_v41, %v1716_v47 }
0x104d   :  { %5384 = vrsqrt.f32 %v1695_v45  ;;  %vm1712_vm13 = vweird.f32 %v1695_v45 }
0x104e   :  { %v1722_v48 = vadd.f32 %v5278_v63, %v1719_v46 }
0x1050   :  { %5026 = vmatmul.msk.f32.vlgmr.msrb.gmra.mxu3 %vm105_vm4, %v1722_v48 }
0x1051   :  { %5039 = vmatpush.xpose.msk.msrb.mxu3 %vm151_vm5, %v1924_v31 }
0x1053   :  { %v5385_v49 = vpop.eup %5384  ;;  %v1976_v2 = vpop.permute.xlu2 %1975 }
0x1054   :  { %v1707_v50 = vmul.f32 %v5385_v49, %v1695_v45  ;;  %5043 = vmatpush.xpose.msk.msra.mxu1 %vm151_vm5, %v1976_v2  ;;  %vm1713_vm12 = vweird.f32 %v5385_v49  ;;  %v5202_v45 = vpack.i.bf16 %v6014_v53, %v6032_v35 }
0x1055   :  { %vm1714_vm14 = vmor %vm1712_vm13, %vm1713_vm12 }
0x1056   :  { %v1708_v51 = vmul.f32 %v5385_v49, %v1707_v50 }
0x1057   :  { %5044 = vmatmul.msk.f32.vlgmr.msra.gmra.mxu1 %vm151_vm5, %v6034_v62 }
0x1058   :  { %v1709_v52 = vmul.f32 0.5, %v1708_v51 }
0x105a   :  { %v1710_v54 = vsub.f32 1.5, %v1709_v52 }
0x105b   :  { %v1950_v56 = vpop.permute.xlu2 %1949 }
0x105c   :  { %v1711_v29 = vmul.f32 %v5385_v49, %v1710_v54  ;;  %5041 = vmatpush.xpose.msk.msrb.mxu0 %vm151_vm5, %v1950_v56 }
0x105e   :  { %v1715_v57 = vsel %vm1714_vm14, %v5385_v49, %v1711_v29 }
0x105f   :  { %5042 = vmatmul.msk.f32.vlgmr.msrb.gmra.mxu0 %vm151_vm5, %v6040_v3  ;;  %v1717_v58 = vmul.f32 %v1715_v57, %v6052_v16 }
0x1060   :  { %5049 = vmatpush.xpose.msk.msra.mxu0 %vm151_vm5, %v2054_v27 }
0x1061   :  { %v1720_v59 = vmul.f32 %v5277_v41, %v1717_v58 }
0x1063   :  { %v1723_v36 = vadd.f32 %v5278_v63, %v1720_v59 }
0x1065   :  { %5027 = vmatmul.msk.f32.gmra.mxu3 %vm105_vm4, %v1723_v36 }
0x1067   :  { %5050 = vmatmul.msk.f32.vlgmr.msra.gmra.mxu0 %vm151_vm5, %v6042_v22 }
0x106d   :  { %5036 = vmatmul.msk.f32.vlgmr.msra.gmra.mxu3 %vm151_vm5, %v6014_v53 }
0x1075   :  { %5040 = vmatmul.msk.f32.vlgmr.msrb.gmra.mxu3 %vm151_vm5, %v6032_v35 }
0x109f   :  { %v2024_v5 = vpop.f32.mrf.mxu2 }
0x10a0   :  { %v2084_v6 = vmul.f32 0.35355338, %v2024_v5 }
0x10a2   :  { %v6102_v24 = vsel %vm6096_vm0, -1e+09, %v2084_v6 }
0x10a3   :  { %v2112_v8 = vsel %vm151_vm5, %v6102_v24, -inf }
0x10a4   :  { %2113 = vmax.xlane.f32.xlu1 %v2112_v8 }
0x10ae   :  { %v2028_v9 = vpop.permute.xlu0 %2027 }
0x10af   :  { %5047 = vmatpush.xpose.msk.msra.mxu3 %vm151_vm5, %v2028_v9 }
0x10b2   :  { %5048 = vmatmul.msk.f32.vlgmr.msra.gmra.mxu3 %vm151_vm5, %v6071_v26 }
0x10d3   :  { %v6116_v14 = vpop.f32.mrf.mxu3 }
0x10d4   :  { %v1998_v12 = vpop.f32.mrf.mxu1 }
0x10d5   :  { %v2083_v10 = vmul.f32 0.35355338, %v1998_v12 }
0x10d7   :  { %v2093_v11 = vsel %vm6096_vm0, -1e+09, %v2083_v10 }
0x10d8   :  { %v2109_v16 = vsel %vm151_vm5, %v2093_v11, -inf }
0x10d9   :  { %2110 = vmax.xlane.f32.xlu2 %v2109_v16 }
0x10dc   :  { %v1972_v17 = vpop.f32.mrf.mxu0 }
0x10dd   :  { %v2082_v1 = vmul.f32 0.35355338, %v1972_v17 }
0x10df   :  { %v6114_v18 = vsel %vm6096_vm0, -1e+09, %v2082_v1 }
0x10e0   :  { %v2106_v19 = vsel %vm151_vm5, %v6114_v18, -inf }
0x10e1   :  { %2107 = vmax.xlane.f32.xlu2 %v2106_v19 }
0x10e4   :  { %v2076_v40 = vpop.f32.mrf.mxu0 }
0x10e5   :  { %v2086_v61 = vmul.f32 0.35355338, %v2076_v40 }
0x10e7   :  { %v6136_v47 = vsel %vm6096_vm0, -1e+09, %v2086_v61 }
0x10e8   :  { %v1756_v15 = vpop.f32.mrf.mxu3  ;;  %v2118_v63 = vsel %vm151_vm5, %v6136_v47, -inf }
0x10e9   :  { %v6123_v21 = vadd.f32 %v6120_v20, %v1756_v15 }
0x10f0   :  { %v1894_v23 = vpop.f32.mrf.mxu3 }
0x10f1   :  { %v2079_v25 = vmul.f32 0.35355338, %v1894_v23 }
0x10f3   :  { %v2089_v28 = vsel %vm6096_vm0, -1e+09, %v2079_v25 }
0x10f4   :  { %v2097_v33 = vsel %vm151_vm5, %v2089_v28, -inf }
0x10f5   :  { %2098 = vmax.xlane.f32.xlu0 %v2097_v33 }
0x10f8   :  { %v1946_v32 = vpop.f32.mrf.mxu3 }
0x10f9   :  { %v2081_v34 = vmul.f32 0.35355338, %v1946_v32 }
0x10fb   :  { %v2091_v41 = vsel %vm6096_vm0, -1e+09, %v2081_v34 }
0x10fc   :  { %v2103_v42 = vsel %vm151_vm5, %v2091_v41, -inf }
0x10fd   :  { %2104 = vmax.xlane.f32.xlu2 %v2103_v42  ;;  %2101 = vmax.xlane.f32.xlu0 %v2100_v43 }
0x1105   :  { %2119 = vmax.xlane.f32.xlu0 %v2118_v63 }
0x1115   :  { %5203 = vrot.lane.b32.xlu2 %v5202_v45, %s5607_s28 }
0x1117   :  { %v2114_v17 = vpop.xlane.xlu1 %2113 }
0x1135   :  { %v2050_v49 = vpop.f32.mrf.mxu3 }
0x1136   :  { %v2085_v51 = vmul.f32 0.35355338, %v2050_v49  ;;  %v6172_v49 = vadd.f32 %v6120_v20, %v6116_v14 }
0x1138   :  { %v2095_v52 = vsel %vm6096_vm0, -1e+09, %v2085_v51 }
0x1139   :  { %v2115_v54 = vsel %vm151_vm5, %v2095_v52, -inf }
0x114c   :  { %v2111_v31 = vpop.xlane.xlu2 %2110 }
0x114d   :  { %v2125_v46 = vsub.f32 %v2093_v11, %v2111_v31  ;;  %v5212_v11 = vpack.i.bf16 %v6040_v3, %v6020_v55 }
0x114f   :  { %v2137_v48 = vmul.f32 1.442695, %v2125_v46 }
0x1151   :  { %5386 = vpow2.f32 %v2137_v48 }
0x1154   :  { %v2108_v53 = vpop.xlane.xlu2 %2107 }
0x1155   :  { %v2124_v55 = vsub.f32 %v6114_v18, %v2108_v53 }
0x1157   :  { %v6143_v2 = vpop.eup %5386  ;;  %v2135_v23 = vmul.f32 1.442695, %v2124_v55  ;;  %v1821_v55 = vld [vmem:[#allocation2 + $0x1f0] sm:$0xff] }
0x1158   :  { %v2157_v50 = vsel %vm151_vm5, %v6143_v2, 0.0 }
0x1159   :  { %2158 = vadd.xlane.f32.xlu1 %v2157_v50 }
0x1161   :  { %2116 = vmax.xlane.f32.xlu1 %v2115_v54 }
0x1168   :  { %v2099_v35 = vpop.xlane.xlu0 %2098 }
0x1169   :  { %v2121_v10 = vsub.f32 %v2089_v28, %v2099_v35  ;;  %v2126_v28 = vsub.f32 %v6102_v24, %v2114_v17 }
0x116b   :  { %v2129_v62 = vmul.f32 1.442695, %v2121_v10  ;;  %v2139_v33 = vmul.f32 1.442695, %v2126_v28 }
0x1170   :  { %v2105_v56 = vpop.xlane.xlu2 %2104  ;;  %v2102_v27 = vpop.xlane.xlu0 %2101 }
0x1171   :  { %v2123_v29 = vsub.f32 %v2091_v41, %v2105_v56  ;;  %v2122_v57 = vsub.f32 %v2090_v38, %v2102_v27 }
0x1173   :  { %v2133_v58 = vmul.f32 1.442695, %v2123_v29  ;;  %v2131_v59 = vmul.f32 1.442695, %v2122_v57 }
0x1175   :  { %5388 = vpow2.f32 %v2133_v58 }
0x1176   :  { %5390 = vpow2.f32 %v2131_v59 }
0x1177   :  { %5392 = vpow2.f32 %v2129_v62 }
0x1178   :  { %v5204_v36 = vpop.permute.xlu2 %5203  ;;  %v2120_v37 = vpop.xlane.xlu0 %2119 }
0x1179   :  { %v5206_v30 = vunpack.i.h.bf16 %v5204_v36  ;;  %v5205_v5 = vunpack.i.l.bf16 %v5204_v36 }
0x117a   :  { %5208 = vrot.lane.b32.xlu1 %v5207_v60, %s5607_s28 }
0x117b   :  { %v5389_v6 = vpop.eup %5388  ;;  %2206 = vmatpush.msrb.mxu1 %v5206_v30  ;;  %2258 = vmatpush.msrb.mxu3 %v5205_v5 }
0x117c   :  { %v5391_v8 = vpop.eup %5390  ;;  %v2151_v9 = vsel %vm151_vm5, %v5389_v6, 0.0 }
0x117d   :  { %2152 = vadd.xlane.f32.xlu2 %v2151_v9  ;;  %v2148_v12 = vsel %vm151_vm5, %v5391_v8, 0.0  ;;  %v5393_v26 = vpop.eup %5392 }
0x117e   :  { %2149 = vadd.xlane.f32.xlu0 %v2148_v12  ;;  %v2145_v16 = vsel %vm151_vm5, %v5393_v26, 0.0 }
0x1195   :  { %5213 = vrot.lane.b32.xlu2 %v5212_v11, %s5607_s28 }
0x119d   :  { %2315 = vrot.lane.b32.xlu2 %v6036_v0, %s5607_s28 }
0x11a4   :  { %2146 = vadd.xlane.f32.xlu1 %v2145_v16 }
0x11bd   :  { %2367 = vrot.lane.b32.xlu1 %v6042_v22, %s5607_s28  ;;  %v2128_v22 = vsub.f32 %v6136_v47, %v2120_v37 }
0x11bf   :  { %v2143_v18 = vmul.f32 1.442695, %v2128_v22 }
0x11cc   :  { %v2159_v1 = vpop.xlane.xlu1 %2158 }
0x11d4   :  { %v2117_v19 = vpop.xlane.xlu1 %2116 }
0x11d5   :  { %v2127_v15 = vsub.f32 %v2095_v52, %v2117_v19  ;;  %v1823_v19 = vld [vmem:[#allocation2 + $0x200] sm:$0xff] }
0x11d7   :  { %v2141_v3 = vmul.f32 1.442695, %v2127_v15  ;;  %v1822_v15 = vld [vmem:[#allocation2 + $0x1f8] sm:$0xff] }
0x11d9   :  { %5394 = vpow2.f32 %v2141_v3  ;;  %v1820_v3 = vld [vmem:[#allocation2 + $0x1e8] sm:$0xff] }
0x11da   :  { %5396 = vpow2.f32 %v2135_v23 }
0x11db   :  { %5398 = vpow2.f32 %v2139_v33 }
0x11dc   :  { %5400 = vpow2.f32 %v2143_v18 }
0x11df   :  { %v5395_v25 = vpop.eup %5394 }
0x11e0   :  { %v2163_v0 = vsel %vm151_vm5, %v5395_v25, 0.0  ;;  %v5397_v32 = vpop.eup %5396 }
0x11e1   :  { %2164 = vadd.xlane.f32.xlu0 %v2163_v0  ;;  %v2154_v34 = vsel %vm151_vm5, %v5397_v32, 0.0  ;;  %v5399_v40 = vpop.eup %5398 }
0x11e2   :  { %v2160_v43 = vsel %vm151_vm5, %v5399_v40, 0.0  ;;  %v5401_v63 = vpop.eup %5400 }
0x11e3   :  { %v2166_v48 = vsel %vm151_vm5, %v5401_v63, 0.0 }
0x11e9   :  { %2155 = vadd.xlane.f32.xlu0 %v2154_v34 }
0x11ec   :  { %v5209_v38 = vpop.permute.xlu1 %5208 }
0x11ed   :  { %v5211_v41 = vunpack.i.h.bf16 %v5209_v38  ;;  %v5210_v42 = vunpack.i.l.bf16 %v5209_v38 }
0x11ef   :  { %2310 = vmatpush.msra.mxu1 %v5211_v41  ;;  %2362 = vmatpush.msra.mxu3 %v5210_v42  ;;  %v5280_v41 = vld [vmem:[#allocation2 + $0x208] ss:$0 sm:$0xff] }
0x11f0   :  { %v2153_v24 = vpop.xlane.xlu2 %2152 }
0x11f1   :  { %5402 = vrcp.f32 %v2153_v24  ;;  %v2150_v61 = vpop.xlane.xlu0 %2149  ;;  %2161 = vadd.xlane.f32.xlu0 %v2160_v43 }
0x11f2   :  { %5404 = vrcp.f32 %v2150_v61 }
0x11f7   :  { %v5403_v47 = vpop.eup %5402 }
0x11f8   :  { %v5405_v45 = vpop.eup %5404  ;;  %v2179_v31 = vmul.f32 %v5403_v47, %v5389_v6  ;;  %v5214_v46 = vpop.permute.xlu2 %5213 }
0x11f9   :  { %v5216_v50 = vunpack.i.h.bf16 %v5214_v46  ;;  %v5215_v51 = vunpack.i.l.bf16 %v5214_v46  ;;  %2167 = vadd.xlane.f32.xlu0 %v2166_v48  ;;  %v2178_v52 = vmul.f32 %v5405_v45, %v5391_v8 }
0x11fa   :  { %5053 = vmatmul.msk.f32.vlgmr.msrb.gmra.mxu3 %vm151_vm5, %v2179_v31 }
0x11fb   :  { %5063 = vmatpush.xpose.msk.msrb.mxu3 %vm151_vm5, %v6172_v49  ;;  %2232 = vmatpush.msrb.mxu2 %v5215_v51  ;;  %v2508_v51 = vld [vmem:[#allocation2 + $0x238] sm:$0xff] }
0x11fc   :  { %2284 = vmatpush.msrb.mxu0 %v5216_v50  ;;  %5052 = vmatmul.msk.f32.vlgmr.msrb.gmra.mxu2 %vm151_vm5, %v2178_v52  ;;  %v2507_v52 = vld [vmem:[#allocation2 + $0x230] sm:$0xff] }
0x1200   :  { %v2316_v54 = vpop.permute.xlu2 %2315 }
0x1201   :  { %2336 = vmatpush.msra.mxu2 %v2316_v54  ;;  %v2506_v54 = vld [vmem:[#allocation2 + $0x228] sm:$0xff] }
0x1203   :  { %2536 = vmatpush.msrb.mxu2 %v2508_v51 }
0x1205   :  { %2537 = vmatpush.msrb.mxu2 %v2507_v52 }
0x1207   :  { %2538 = vmatpush.msrb.mxu2 %v2506_v54 }
0x1217   :  { %v2147_v53 = vpop.xlane.xlu1 %2146 }
0x1218   :  { %5406 = vrcp.f32 %v2147_v53  ;;  %v2505_v53 = vld [vmem:[#allocation2 + $0x220] sm:$0xff] }
0x1219   :  { %5408 = vrcp.f32 %v2159_v1  ;;  %2539 = vmatpush.msrb.mxu2 %v2505_v53 }
0x121e   :  { %v5407_v35 = vpop.eup %5406 }
0x121f   :  { %v2177_v14 = vmul.f32 %v5407_v35, %v5393_v26  ;;  %v5409_v20 = vpop.eup %5408 }
0x1220   :  { %v2181_v56 = vmul.f32 %v5409_v20, %v6143_v2 }
0x1221   :  { %5051 = vmatmul.msk.f32.vlgmr.msrb.gmra.mxu1 %vm151_vm5, %v2177_v14 }
0x1222   :  { %2442 = vmatpush.msrb.mxu1 %v1823_v19 }
0x1224   :  { %2443 = vmatpush.msrb.mxu1 %v1822_v15 }
0x1226   :  { %2444 = vmatpush.msrb.mxu1 %v1821_v55 }
0x1228   :  { %2445 = vmatpush.msrb.mxu1 %v1820_v3 }
0x1229   :  { %5055 = vmatmul.msk.f32.vlgmr.msra.gmra.mxu1 %vm151_vm5, %v2181_v56 }
0x122f   :  { %v2368_v27 = vpop.permute.xlu1 %2367 }
0x1230   :  { %2388 = vmatpush.msra.mxu0 %v2368_v27 }
0x1254   :  { %v2165_v29 = vpop.xlane.xlu0 %2164 }
0x1255   :  { %5410 = vrcp.f32 %v2165_v29 }
0x125b   :  { %v5411_v57 = vpop.eup %5410 }
0x125c   :  { %v2183_v58 = vmul.f32 %v5411_v57, %v5395_v25  ;;  %v2156_v59 = vpop.xlane.xlu0 %2155 }
0x125d   :  { %5412 = vrcp.f32 %v2156_v59 }
0x125e   :  { %5057 = vmatmul.msk.f32.vlgmr.msra.gmra.mxu3 %vm151_vm5, %v2183_v58 }
0x1263   :  { %v5413_v36 = vpop.eup %5412 }
0x1264   :  { %v2180_v60 = vmul.f32 %v5413_v36, %v5397_v32  ;;  %v2162_v30 = vpop.xlane.xlu0 %2161 }
0x1265   :  { %5414 = vrcp.f32 %v2162_v30 }
0x1266   :  { %5054 = vmatmul.msk.f32.vlgmr.msrb.gmra.mxu0 %vm151_vm5, %v2180_v60 }
0x1267   :  { %5065 = vmatpush.xpose.msk.msrb.mxu0 %vm151_vm5, %v6123_v21 }
0x126b   :  { %v5415_v2 = vpop.eup %5414 }
0x126c   :  { %v2182_v5 = vmul.f32 %v5415_v2, %v5399_v40  ;;  %v2168_v6 = vpop.xlane.xlu0 %2167 }
0x126d   :  { %5416 = vrcp.f32 %v2168_v6 }
0x126e   :  { %5056 = vmatmul.msk.f32.vlgmr.msra.gmra.mxu2 %vm151_vm5, %v2182_v5 }
0x1273   :  { %v5417_v8 = vpop.eup %5416 }
0x1274   :  { %v2184_v9 = vmul.f32 %v5417_v8, %v5401_v63 }
0x1276   :  { %5058 = vmatmul.msk.f32.vlgmr.msra.gmra.mxu0 %vm151_vm5, %v2184_v9 }
0x127d   :  { %v2260_v12 = vpop.f32.mrf.mxu3 }
0x127e   :  { %2395 = vrot.lane.b32.xlu0 %v2260_v12, %s5600_s21 }
0x127f   :  { %v2234_v16 = vpop.f32.mrf.mxu2 }
0x129e   :  { %v2208_v10 = vpop.f32.mrf.mxu1 }
0x12a6   :  { %v2312_v11 = vpop.f32.mrf.mxu1 }
0x12a7   :  { %2403 = vrot.lane.b32.xlu2 %v2312_v11, %s5609_s30  ;;  %v5281_v11 = vld [vmem:[#allocation2 + $0x210] ss:$0 sm:$0xff] }
0x12e1   :  { %v2364_v62 = vpop.f32.mrf.mxu3 }
0x12e2   :  { %2411 = vrot.lane.b32.xlu1 %v2364_v62, %s5608_s29 }
0x12e3   :  { %v2286_v26 = vpop.f32.mrf.mxu0 }
0x12e4   :  { %2397 = vrot.lane.b32.xlu2 %v2286_v26, %s5600_s21 }
0x12f0   :  { %v2396_v23 = vpop.permute.xlu0 %2395 }
0x12f1   :  { %v2338_v17 = vpop.f32.mrf.mxu2  ;;  %v2417_v28 = vsel %vm151_vm5, %v2208_v10, %v2396_v23 }
0x12f2   :  { %2405 = vrot.lane.b32.xlu1 %v2338_v17, %s5609_s30  ;;  %v5282_v17 = vld [vmem:[#allocation2 + $0x218] ss:$0 sm:$0xff] }
0x12f3   :  { %v2390_v1 = vpop.f32.mrf.mxu0 }
0x12f4   :  { %2413 = vrot.lane.b32.xlu0 %v2390_v1, %s5608_s29 }
0x1301   :  { %v2404_v25 = vpop.permute.xlu2 %2403 }
0x1302   :  { %v2419_v0 = vsel %vm688_vm6, %v2417_v28, %v2404_v25 }
0x133e   :  { %v2398_v32 = vpop.permute.xlu2 %2397 }
0x133f   :  { %v2418_v22 = vsel %vm151_vm5, %v2234_v16, %v2398_v32 }
0x1354   :  { %v2412_v33 = vpop.permute.xlu1 %2411 }
0x1355   :  { %v2421_v37 = vsel %vm691_vm7, %v2419_v0, %v2412_v33 }
0x1356   :  { %5059 = vmatmul.msk.f32.vlgmr.msrb.gmra.mxu1 %vm105_vm4, %v2421_v37 }
0x1364   :  { %v2406_v34 = vpop.permute.xlu1 %2405 }
0x1365   :  { %v2420_v18 = vsel %vm688_vm6, %v2418_v22, %v2406_v34  ;;  %v5283_v22 = vld [vmem:[#allocation2 + $0x240] ss:$0 sm:$0xff] }
0x1366   :  { %v2414_v38 = vpop.permute.xlu0 %2413 }
0x1367   :  { %v2422_v40 = vsel %vm691_vm7, %v2420_v18, %v2414_v38 }
0x1368   :  { %5060 = vmatmul.msk.f32.gmra.mxu1 %vm105_vm4, %v2422_v40 }
0x13d3   :  { %v2447_v42 = vpop.f32.mrf.mxu1 }
0x13d4   :  { %v2448_v24 = vadd.f32 %v5280_v41, %v2447_v42 }
0x13d6   :  { %v2453_v43 = vadd.f32 %v2448_v24, %v6004_v39 }
0x13d8   :  { %v2455_v61 = vsel %vm105_vm4, %v2453_v43, 0.0 }
0x13d9   :  { %2456 = vadd.xlane.f32.xlu2 %v2455_v61 }
0x13e5   :  { %v2450_v63 = vpop.f32.mrf.mxu1 }
0x13e6   :  { %v2451_v47 = vadd.f32 %v5280_v41, %v2450_v63 }
0x13e8   :  { %v2454_v45 = vadd.f32 %v2451_v47, %v6008_v44 }
0x13ea   :  { %v2458_v31 = vsel %vm105_vm4, %v2454_v45, 0.0 }
0x13eb   :  { %2459 = vadd.xlane.f32.xlu1 %v2458_v31 }
0x1404   :  { %2563 = vrot.lane.b32.xlu1 %v6172_v49, %s5604_s25 }
0x140c   :  { %2569 = vrot.lane.b32.xlu1 %v6123_v21, %s5605_s26 }
0x1414   :  { %2565 = vrot.lane.b32.xlu1 %v6123_v21, %s5604_s25 }
0x141c   :  { %2573 = vrot.lane.b32.xlu1 %v6123_v21, %s5603_s0 }
0x144c   :  { %v2457_v39 = vpop.xlane.xlu2 %2456 }
0x144d   :  { %v2461_v46 = vmul.f32 %v2457_v39, %v5816_v4 }
0x144f   :  { %v2463_v48 = vsub.f32 %v2453_v43, %v2461_v46 }
0x1451   :  { %v2465_v44 = vmul.f32 %v2463_v48, %v2463_v48 }
0x1453   :  { %v2467_v50 = vsel %vm105_vm4, %v2465_v44, 0.0 }
0x1454   :  { %2468 = vadd.xlane.f32.xlu0 %v2467_v50 }
0x145e   :  { %v2460_v35 = vpop.xlane.xlu1 %2459 }
0x145f   :  { %v2462_v14 = vmul.f32 %v2460_v35, %v5816_v4 }
0x1461   :  { %v2464_v20 = vsub.f32 %v2454_v45, %v2462_v14 }
0x1463   :  { %v2466_v56 = vmul.f32 %v2464_v20, %v2464_v20 }
0x1465   :  { %v2470_v27 = vsel %vm105_vm4, %v2466_v56, 0.0 }
0x1466   :  { %2471 = vadd.xlane.f32.xlu2 %v2470_v27 }
0x1476   :  { %v6217_v29 = vpop.permute.xlu1 %2563 }
0x1477   :  { %5067 = vmatpush.xpose.msk.msra.mxu3 %vm151_vm5, %v6217_v29 }
0x147e   :  { %2571 = vrot.lane.b32.xlu2 %v6172_v49, %s5603_s0  ;;  %v6223_v57 = vpop.permute.xlu1 %2569 }
0x147f   :  { %5073 = vmatpush.xpose.msk.msra.mxu2 %vm151_vm5, %v6223_v57 }
0x1486   :  { %v6227_v58 = vpop.permute.xlu1 %2565 }
0x1487   :  { %5069 = vmatpush.xpose.msk.msra.mxu0 %vm151_vm5, %v6227_v58 }
0x148e   :  { %v6250_v42 = vpop.permute.xlu1 %2573 }
0x14c7   :  { %v2469_v59 = vpop.xlane.xlu0 %2468 }
0x14c8   :  { %v2473_v36 = vmul.f32 %v2469_v59, %v5816_v4 }
0x14ca   :  { %v2475_v60 = vadd.f32 1e-05, %v2473_v36 }
0x14cc   :  { %5418 = vrsqrt.f32 %v2475_v60  ;;  %vm2483_vm2 = vweird.f32 %v2475_v60 }
0x14d2   :  { %v5419_v30 = vpop.eup %5418 }
0x14d3   :  { %v2478_v2 = vmul.f32 %v5419_v30, %v2475_v60  ;;  %vm2484_vm1 = vweird.f32 %v5419_v30 }
0x14d4   :  { %vm2485_vm3 = vmor %vm2483_vm2, %vm2484_vm1 }
0x14d5   :  { %v2479_v5 = vmul.f32 %v5419_v30, %v2478_v2 }
0x14d7   :  { %v2480_v6 = vmul.f32 0.5, %v2479_v5 }
0x14d9   :  { %v2481_v8 = vsub.f32 1.5, %v2480_v6  ;;  %v2472_v9 = vpop.xlane.xlu2 %2471 }
0x14da   :  { %v2474_v12 = vmul.f32 %v2472_v9, %v5816_v4 }
0x14db   :  { %v2482_v10 = vmul.f32 %v5419_v30, %v2481_v8 }
0x14dc   :  { %v2476_v62 = vadd.f32 1e-05, %v2474_v12 }
0x14dd   :  { %v2486_v26 = vsel %vm2485_vm3, %v5419_v30, %v2482_v10 }
0x14de   :  { %v2497_v16 = vmul.f32 %v2486_v26, %v2463_v48  ;;  %5420 = vrsqrt.f32 %v2476_v62  ;;  %vm2493_vm9 = vweird.f32 %v2476_v62 }
0x14e0   :  { %v2500_v1 = vmul.f32 %v5281_v11, %v2497_v16 }
0x14e1   :  { %v6241_v38 = vpop.permute.xlu2 %2571 }
0x14e2   :  { %v6233_v19 = vadd.f32 %v5282_v17, %v2500_v1 }
0x14e4   :  { %v5421_v15 = vpop.eup %5420  ;;  %5061 = vmatmul.msk.f32.vlgmr.msrb.gmra.mxu2 %vm105_vm4, %v6233_v19 }
0x14e5   :  { %v2488_v55 = vmul.f32 %v5421_v15, %v2476_v62  ;;  %vm2494_vm8 = vweird.f32 %v5421_v15 }
0x14e6   :  { %vm2495_vm10 = vmor %vm2493_vm9, %vm2494_vm8 }
0x14e7   :  { %v2489_v3 = vmul.f32 %v5421_v15, %v2488_v55 }
0x14e9   :  { %v2490_v23 = vmul.f32 0.5, %v2489_v3 }
0x14eb   :  { %v2491_v25 = vsub.f32 1.5, %v2490_v23 }
0x14ed   :  { %v2492_v28 = vmul.f32 %v5421_v15, %v2491_v25 }
0x14ef   :  { %v2496_v0 = vsel %vm2495_vm10, %v5421_v15, %v2492_v28 }
0x14f0   :  { %v2498_v33 = vmul.f32 %v2496_v0, %v2464_v20 }
0x14f2   :  { %v2501_v37 = vmul.f32 %v5281_v11, %v2498_v33 }
0x14f4   :  { %v6237_v32 = vadd.f32 %v5282_v17, %v2501_v37  ;;  %v5217_v17 = vpack.i.bf16 %v6172_v49, %v6217_v29 }
0x14f6   :  { %5062 = vmatmul.msk.f32.gmra.mxu2 %vm105_vm4, %v6237_v32 }
0x1567   :  { %v2541_v34 = vpop.f32.mrf.mxu2 }
0x1568   :  { %v2542_v18 = vadd.f32 %v5283_v22, %v2541_v34 }
0x156a   :  { %2549 = vrot.lane.b32.xlu0 %v2542_v18, %s5604_s25  ;;  %5064 = vmatmul.msk.f32.vlgmr.msrb.gmra.mxu3 %vm151_vm5, %v2542_v18 }
0x156b   :  { %5075 = vmatpush.xpose.msk.msrb.mxu3 %vm151_vm5, %v6241_v38 }
0x1572   :  { %2557 = vrot.lane.b32.xlu0 %v2542_v18, %s5603_s0 }
0x1579   :  { %v2544_v40 = vpop.f32.mrf.mxu2 }
0x157a   :  { %v2545_v41 = vadd.f32 %v5283_v22, %v2544_v40  ;;  %2567 = vrot.lane.b32.xlu0 %v6172_v49, %s5605_s26 }
0x157c   :  { %2555 = vrot.lane.b32.xlu2 %v2545_v41, %s5605_s26  ;;  %5066 = vmatmul.msk.f32.vlgmr.msrb.gmra.mxu0 %vm151_vm5, %v2545_v41 }
0x157d   :  { %5077 = vmatpush.xpose.msk.msrb.mxu0 %vm151_vm5, %v6250_v42 }
0x1582   :  { %2551 = vrot.lane.b32.xlu0 %v2545_v41, %s5604_s25 }
0x1584   :  { %2553 = vrot.lane.b32.xlu2 %v2542_v18, %s5605_s26 }
0x158c   :  { %2559 = vrot.lane.b32.xlu2 %v2545_v41, %s5603_s0 }
0x15d6   :  { %v2556_v24 = vpop.permute.xlu2 %2555 }
0x15d7   :  { %5074 = vmatmul.msk.f32.vlgmr.msra.gmra.mxu2 %vm151_vm5, %v2556_v24 }
0x15dc   :  { %v2550_v43 = vpop.permute.xlu0 %2549 }
0x15dd   :  { %5068 = vmatmul.msk.f32.vlgmr.msra.gmra.mxu3 %vm151_vm5, %v2550_v43 }
0x15de   :  { %v2554_v31 = vpop.permute.xlu2 %2553 }
0x15e4   :  { %v2558_v61 = vpop.permute.xlu0 %2557 }
0x15e5   :  { %5076 = vmatmul.msk.f32.vlgmr.msrb.gmra.mxu3 %vm151_vm5, %v2558_v61 }
0x15e6   :  { %v2560_v50 = vpop.permute.xlu2 %2559 }
0x15ec   :  { %v6262_v63 = vpop.permute.xlu0 %2567 }
0x15ed   :  { %v2596_v47 = vpop.f32.mrf.mxu3  ;;  %5071 = vmatpush.xpose.msk.msra.mxu1 %vm151_vm5, %v6262_v63  ;;  %v5227_v25 = vpack.i.bf16 %v6227_v58, %v6262_v63 }
0x15ee   :  { %v2767_v45 = vmul.f32 0.35355338, %v2596_v47 }
0x15f0   :  { %5072 = vmatmul.msk.f32.vlgmr.msra.gmra.mxu1 %vm151_vm5, %v2554_v31  ;;  %v2775_v39 = vsel %vm151_vm5, %v2767_v45, -inf }
0x15f1   :  { %2776 = vmax.xlane.f32.xlu1 %v2775_v39 }
0x15f4   :  { %v2552_v46 = vpop.permute.xlu0 %2551 }
0x15f5   :  { %5070 = vmatmul.msk.f32.vlgmr.msra.gmra.mxu0 %vm151_vm5, %v2552_v46 }
0x15f9   :  { %v2620_v48 = vpop.f32.mrf.mxu0 }
0x15fa   :  { %v2768_v44 = vmul.f32 0.35355338, %v2620_v48 }
0x15fc   :  { %v2778_v51 = vsel %vm151_vm5, %v2768_v44, -inf }
0x15fd   :  { %2779 = vmax.xlane.f32.xlu2 %v2778_v51  ;;  %5078 = vmatmul.msk.f32.vlgmr.msrb.gmra.mxu0 %vm151_vm5, %v2560_v50 }
0x165a   :  { %v2716_v56 = vpop.f32.mrf.mxu2 }
0x165b   :  { %v2772_v36 = vmul.f32 0.35355338, %v2716_v56 }
0x165d   :  { %v2790_v6 = vsel %vm151_vm5, %v2772_v36, -inf }
0x1660   :  { %v2644_v52 = vpop.f32.mrf.mxu3 }
0x1661   :  { %v2769_v54 = vmul.f32 0.35355338, %v2644_v52 }
0x1663   :  { %v2781_v53 = vsel %vm151_vm5, %v2769_v54, -inf }
0x1664   :  { %2782 = vmax.xlane.f32.xlu0 %v2781_v53  ;;  %v2777_v1 = vpop.xlane.xlu1 %2776 }
0x1665   :  { %v2799_v15 = vsub.f32 %v2767_v45, %v2777_v1 }
0x1667   :  { %v2807_v55 = vmul.f32 1.442695, %v2799_v15 }
0x1668   :  { %v2740_v35 = vpop.f32.mrf.mxu3 }
0x1669   :  { %v2773_v14 = vmul.f32 0.35355338, %v2740_v35 }
0x166b   :  { %v2793_v20 = vsel %vm151_vm5, %v2773_v14, -inf }
0x166c   :  { %2794 = vmax.xlane.f32.xlu0 %v2793_v20 }
0x166d   :  { %v2692_v27 = vpop.f32.mrf.mxu1 }
0x166e   :  { %v2771_v59 = vmul.f32 0.35355338, %v2692_v27 }
0x1670   :  { %v2787_v60 = vsel %vm151_vm5, %v2771_v59, -inf  ;;  %v2780_v30 = vpop.xlane.xlu2 %2779 }
0x1671   :  { %2788 = vmax.xlane.f32.xlu1 %v2787_v60  ;;  %v2800_v8 = vsub.f32 %v2768_v44, %v2780_v30 }
0x1672   :  { %v2668_v2 = vpop.f32.mrf.mxu0 }
0x1673   :  { %v2770_v5 = vmul.f32 0.35355338, %v2668_v2  ;;  %v2809_v12 = vmul.f32 1.442695, %v2800_v8  ;;  %v5222_v2 = vpack.i.bf16 %v6241_v38, %v6123_v21 }
0x1674   :  { %2791 = vmax.xlane.f32.xlu0 %v2790_v6 }
0x1675   :  { %v2784_v9 = vsel %vm151_vm5, %v2770_v5, -inf  ;;  %5422 = vpow2.f32 %v2809_v12 }
0x1676   :  { %2785 = vmax.xlane.f32.xlu2 %v2784_v9  ;;  %5424 = vpow2.f32 %v2807_v55 }
0x167a   :  { %v2764_v10 = vpop.f32.mrf.mxu0 }
0x167b   :  { %v2774_v11 = vmul.f32 0.35355338, %v2764_v10  ;;  %v6277_v26 = vpop.eup %5422 }
0x167c   :  { %v2826_v16 = vsel %vm151_vm5, %v6277_v26, 0.0  ;;  %v5425_v3 = vpop.eup %5424 }
0x167d   :  { %v2796_v62 = vsel %vm151_vm5, %v2774_v11, -inf  ;;  %v2823_v23 = vsel %vm151_vm5, %v5425_v3, 0.0 }
0x167e   :  { %2797 = vmax.xlane.f32.xlu1 %v2796_v62 }
0x1686   :  { %2827 = vadd.xlane.f32.xlu1 %v2826_v16 }
0x1688   :  { %5218 = vrot.lane.b32.xlu0 %v5217_v17, %s5606_s27 }
0x16b2   :  { %2824 = vadd.xlane.f32.xlu0 %v2823_v23 }
0x16c6   :  { %5228 = vrot.lane.b32.xlu0 %v5227_v25, %s5606_s27 }
0x16ce   :  { %3045 = vrot.lane.b32.xlu0 %v6250_v42, %s5606_s27 }
0x16d7   :  { %v2783_v28 = vpop.xlane.xlu0 %2782 }
0x16d8   :  { %v2801_v0 = vsub.f32 %v2769_v54, %v2783_v28 }
0x16da   :  { %v2811_v33 = vmul.f32 1.442695, %v2801_v0 }
0x16dc   :  { %5426 = vpow2.f32 %v2811_v33 }
0x16df   :  { %v2795_v37 = vpop.xlane.xlu0 %2794 }
0x16e0   :  { %v2805_v31 = vsub.f32 %v2773_v14, %v2795_v37 }
0x16e2   :  { %v5427_v22 = vpop.eup %5426  ;;  %v2819_v48 = vmul.f32 1.442695, %v2805_v31 }
0x16e3   :  { %v2829_v34 = vsel %vm151_vm5, %v5427_v22, 0.0 }
0x16e4   :  { %2830 = vadd.xlane.f32.xlu2 %v2829_v34  ;;  %v2789_v18 = vpop.xlane.xlu1 %2788 }
0x16e5   :  { %v2803_v40 = vsub.f32 %v2771_v59, %v2789_v18 }
0x16e7   :  { %v2815_v41 = vmul.f32 1.442695, %v2803_v40  ;;  %v2792_v24 = vpop.xlane.xlu0 %2791 }
0x16e8   :  { %v2804_v43 = vsub.f32 %v2772_v36, %v2792_v24 }
0x16e9   :  { %5428 = vpow2.f32 %v2815_v41  ;;  %v2786_v61 = vpop.xlane.xlu2 %2785 }
0x16ea   :  { %v2802_v47 = vsub.f32 %v2770_v5, %v2786_v61  ;;  %v2817_v45 = vmul.f32 1.442695, %v2804_v43 }
0x16ec   :  { %v2813_v39 = vmul.f32 1.442695, %v2802_v47 }
0x16ee   :  { %5430 = vpow2.f32 %v2813_v39 }
0x16ef   :  { %v5429_v46 = vpop.eup %5428  ;;  %5432 = vpow2.f32 %v2817_v45 }
0x16f0   :  { %v2835_v44 = vsel %vm151_vm5, %v5429_v46, 0.0  ;;  %5434 = vpow2.f32 %v2819_v48 }
0x16f1   :  { %2836 = vadd.xlane.f32.xlu1 %v2835_v44  ;;  %v2798_v50 = vpop.xlane.xlu1 %2797 }
0x16f2   :  { %v2806_v51 = vsub.f32 %v2774_v11, %v2798_v50 }
0x16f4   :  { %v5431_v52 = vpop.eup %5430  ;;  %v2821_v54 = vmul.f32 1.442695, %v2806_v51 }
0x16f5   :  { %v6292_v53 = vpop.eup %5432  ;;  %v2832_v35 = vsel %vm151_vm5, %v5431_v52, 0.0 }
0x16f6   :  { %2833 = vadd.xlane.f32.xlu2 %v2832_v35  ;;  %5436 = vpow2.f32 %v2821_v54  ;;  %v2838_v14 = vsel %vm151_vm5, %v6292_v53, 0.0  ;;  %v5435_v20 = vpop.eup %5434  ;;  %v2512_v35 = vld [vmem:[#allocation2 + $0x258] sm:$0xff] }
0x16f7   :  { %v2841_v60 = vsel %vm151_vm5, %v5435_v20, 0.0 }
0x16f9   :  { %2839 = vadd.xlane.f32.xlu1 %v2838_v14  ;;  %v2828_v16 = vpop.xlane.xlu1 %2827  ;;  %v2511_v14 = vld [vmem:[#allocation2 + $0x250] sm:$0xff] }
0x16fa   :  { %v5219_v56 = vpop.permute.xlu0 %5218 }
0x16fb   :  { %v5221_v27 = vunpack.i.h.bf16 %v5219_v56  ;;  %v5220_v59 = vunpack.i.l.bf16 %v5219_v56 }
0x16fc   :  { %v5437_v36 = vpop.eup %5436 }
0x16fd   :  { %2884 = vmatpush.msrb.mxu1 %v5221_v27  ;;  %2936 = vmatpush.msra.mxu3 %v5220_v59  ;;  %v2844_v30 = vsel %vm151_vm5, %v5437_v36, 0.0 }
0x16fe   :  { %2842 = vadd.xlane.f32.xlu2 %v2841_v60 }
0x1701   :  { %2845 = vadd.xlane.f32.xlu1 %v2844_v30 }
0x1716   :  { %5223 = vrot.lane.b32.xlu2 %v5222_v2, %s5606_s27 }
0x171a   :  { %2993 = vrot.lane.b32.xlu1 %v6223_v57, %s5606_s27 }
0x1725   :  { %v2825_v5 = vpop.xlane.xlu0 %2824 }
0x1726   :  { %5438 = vrcp.f32 %v2825_v5 }
0x172c   :  { %v5439_v6 = vpop.eup %5438 }
0x172d   :  { %v2855_v8 = vmul.f32 %v5439_v6, %v5425_v3 }
0x172f   :  { %5079 = vmatmul.msk.f32.vlgmr.msrb.gmra.mxu1 %vm151_vm5, %v2855_v8 }
0x1738   :  { %v5229_v9 = vpop.permute.xlu0 %5228 }
0x1739   :  { %v5231_v12 = vunpack.i.h.bf16 %v5229_v9  ;;  %v5230_v10 = vunpack.i.l.bf16 %v5229_v9 }
0x173b   :  { %2962 = vmatpush.msra.mxu0 %v5231_v12  ;;  %2988 = vmatpush.msra.mxu1 %v5230_v10  ;;  %v5284_v10 = vld [vmem:[#allocation2 + $0x268] ss:$0 sm:$0xff] }
0x1740   :  { %v3046_v11 = vpop.permute.xlu0 %3045 }
0x1741   :  { %3066 = vmatpush.msrb.mxu0 %v3046_v11 }
0x1757   :  { %v2831_v62 = vpop.xlane.xlu2 %2830 }
0x1758   :  { %5440 = vrcp.f32 %v2831_v62 }
0x175e   :  { %v5441_v17 = vpop.eup %5440 }
0x175f   :  { %v2857_v1 = vmul.f32 %v5441_v17, %v5427_v22 }
0x1761   :  { %5081 = vmatmul.msk.f32.vlgmr.msra.gmra.mxu3 %vm151_vm5, %v2857_v1 }
0x1764   :  { %v2837_v15 = vpop.xlane.xlu1 %2836 }
0x1765   :  { %5442 = vrcp.f32 %v2837_v15 }
0x1769   :  { %v2834_v55 = vpop.xlane.xlu2 %2833 }
0x176a   :  { %5444 = vrcp.f32 %v2834_v55 }
0x176b   :  { %v5443_v3 = vpop.eup %5442  ;;  %5446 = vrcp.f32 %v2828_v16 }
0x176c   :  { %v2859_v23 = vmul.f32 %v5443_v3, %v5429_v46  ;;  %v2840_v25 = vpop.xlane.xlu1 %2839 }
0x176e   :  { %5083 = vmatmul.msk.f32.vlgmr.msra.gmra.mxu1 %vm151_vm5, %v2859_v23 }
0x1770   :  { %v5445_v28 = vpop.eup %5444 }
0x1771   :  { %v2858_v0 = vmul.f32 %v5445_v28, %v5431_v52  ;;  %v2843_v33 = vpop.xlane.xlu2 %2842  ;;  %v5447_v22 = vpop.eup %5446 }
0x1772   :  { %5448 = vrcp.f32 %v2843_v33  ;;  %v2856_v43 = vmul.f32 %v5447_v22, %v6277_v26 }
0x1773   :  { %5082 = vmatmul.msk.f32.vlgmr.msra.gmra.mxu0 %vm151_vm5, %v2858_v0 }
0x1774   :  { %v2846_v37 = vpop.xlane.xlu1 %2845 }
0x1775   :  { %5450 = vrcp.f32 %v2846_v37 }
0x1776   :  { %5452 = vrcp.f32 %v2840_v25 }
0x1778   :  { %v5449_v34 = vpop.eup %5448 }
0x1779   :  { %v5224_v18 = vpop.permute.xlu2 %5223  ;;  %v2861_v61 = vmul.f32 %v5449_v34, %v5435_v20  ;;  %v2510_v20 = vld [vmem:[#allocation2 + $0x248] sm:$0xff] }
0x177a   :  { %v5226_v40 = vunpack.i.h.bf16 %v5224_v18  ;;  %v5225_v41 = vunpack.i.l.bf16 %v5224_v18 }
0x177b   :  { %v5451_v24 = vpop.eup %5450 }
0x177c   :  { %v2862_v47 = vmul.f32 %v5451_v24, %v5437_v36  ;;  %2910 = vmatpush.msrb.mxu2 %v5225_v41  ;;  %3040 = vmatpush.msrb.mxu3 %v5226_v40  ;;  %v5453_v45 = vpop.eup %5452  ;;  %v3185_v40 = vld [vmem:[#allocation2 + $0x290] sm:$0xff]  ;;  %v3184_v41 = vld [vmem:[#allocation2 + $0x288] sm:$0xff]  ;;  %v3183_v24 = vld [vmem:[#allocation2 + $0x280] sm:$0xff] }
0x177d   :  { %5080 = vmatmul.msk.f32.vlgmr.msrb.gmra.mxu2 %vm151_vm5, %v2856_v43  ;;  %5085 = vmatmul.msk.f32.vlgmr.msrb.gmra.mxu3 %vm151_vm5, %v2861_v61  ;;  %v2860_v31 = vmul.f32 %v5453_v45, %v6292_v53  ;;  %v2513_v53 = vld [vmem:[#allocation2 + $0x260] sm:$0xff] }
0x177e   :  { %5086 = vmatmul.msk.f32.vlgmr.msrb.gmra.mxu0 %vm151_vm5, %v2862_v47  ;;  %3120 = vmatpush.msrb.mxu1 %v2513_v53 }
0x1780   :  { %3121 = vmatpush.msrb.mxu1 %v2512_v35  ;;  %v3195_v35 = vld [vmem:[#allocation2 + $0x2e0] sm:$0xff] }
0x1781   :  { %3246 = vmatpush.msra.mxu3 %v3195_v35 }
0x1782   :  { %3122 = vmatpush.msrb.mxu1 %v2511_v14  ;;  %v3194_v14 = vld [vmem:[#allocation2 + $0x2d8] sm:$0xff] }
0x1783   :  { %3247 = vmatpush.msra.mxu3 %v3194_v14 }
0x1784   :  { %3123 = vmatpush.msrb.mxu1 %v2510_v20  ;;  %v3193_v20 = vld [vmem:[#allocation2 + $0x2d0] sm:$0xff] }
0x1785   :  { %3248 = vmatpush.msra.mxu3 %v3193_v20 }
0x178c   :  { %v2994_v39 = vpop.permute.xlu1 %2993 }
0x178d   :  { %3014 = vmatpush.msra.mxu2 %v2994_v39 }
0x178e   :  { %5084 = vmatmul.msk.f32.vlgmr.msra.gmra.mxu2 %vm151_vm5, %v2860_v31 }
0x17ac   :  { %v2886_v46 = vpop.f32.mrf.mxu1 }
0x17e4   :  { %v2938_v26 = vpop.f32.mrf.mxu3 }
0x17e5   :  { %3073 = vrot.lane.b32.xlu2 %v2938_v26, %s5600_s21 }
0x17eb   :  { %v2990_v48 = vpop.f32.mrf.mxu1 }
0x17ec   :  { %3081 = vrot.lane.b32.xlu0 %v2990_v48, %s5609_s30 }
0x17f0   :  { %v2964_v44 = vpop.f32.mrf.mxu0 }
0x17f4   :  { %3075 = vrot.lane.b32.xlu0 %v2964_v44, %s5600_s21  ;;  %v5285_v44 = vld [vmem:[#allocation2 + $0x270] ss:$0 sm:$0xff] }
0x17fb   :  { %v3068_v51 = vpop.f32.mrf.mxu0 }
0x1800   :  { %v3042_v50 = vpop.f32.mrf.mxu3  ;;  %v2912_v52 = vpop.f32.mrf.mxu2 }
0x1801   :  { %3089 = vrot.lane.b32.xlu2 %v3042_v50, %s5608_s29 }
0x1809   :  { %3091 = vrot.lane.b32.xlu2 %v3068_v51, %s5608_s29  ;;  %v5286_v51 = vld [vmem:[#allocation2 + $0x278] ss:$0 sm:$0xff] }
0x1811   :  { %v3016_v54 = vpop.f32.mrf.mxu2 }
0x1812   :  { %3083 = vrot.lane.b32.xlu1 %v3016_v54, %s5609_s30 }
0x183f   :  { %v3074_v56 = vpop.permute.xlu2 %3073 }
0x1840   :  { %v3095_v27 = vsel %vm151_vm5, %v2886_v46, %v3074_v56 }
0x185b   :  { %v3090_v36 = vpop.permute.xlu2 %3089 }
0x185e   :  { %v3082_v59 = vpop.permute.xlu0 %3081 }
0x185f   :  { %v3097_v60 = vsel %vm688_vm6, %v3095_v27, %v3082_v59  ;;  %v3192_v59 = vld [vmem:[#allocation2 + $0x2c8] sm:$0xff] }
0x1860   :  { %v3099_v30 = vsel %vm691_vm7, %v3097_v60, %v3090_v36  ;;  %v3191_v60 = vld [vmem:[#allocation2 + $0x2c0] sm:$0xff]  ;;  %3249 = vmatpush.msra.mxu3 %v3192_v59 }
0x1861   :  { %5087 = vmatmul.msk.f32.vlgmr.msrb.gmra.mxu1 %vm105_vm4, %v3099_v30 }
0x1862   :  { %3250 = vmatpush.msra.mxu3 %v3191_v60  ;;  %v5289_v60 = vld [vmem:[#allocation2 + $0x2f0] ss:$0 sm:$0xff] }
0x1863   :  { %v3092_v8 = vpop.permute.xlu2 %3091 }
0x1866   :  { %v3076_v2 = vpop.permute.xlu0 %3075 }
0x1867   :  { %v3096_v5 = vsel %vm151_vm5, %v2912_v52, %v3076_v2 }
0x1884   :  { %v3084_v6 = vpop.permute.xlu1 %3083 }
0x1885   :  { %v3098_v9 = vsel %vm688_vm6, %v3096_v5, %v3084_v6 }
0x1886   :  { %v3100_v12 = vsel %vm691_vm7, %v3098_v9, %v3092_v8 }
0x1887   :  { %5088 = vmatmul.msk.f32.gmra.mxu1 %vm105_vm4, %v3100_v12 }
0x18de   :  { %v3125_v11 = vpop.f32.mrf.mxu1 }
0x18df   :  { %v3126_v62 = vadd.f32 %v5284_v10, %v3125_v11 }
0x18e1   :  { %v3131_v16 = vadd.f32 %v3126_v62, %v6233_v19 }
0x18e3   :  { %v3133_v17 = vsel %vm105_vm4, %v3131_v16, 0.0 }
0x18e4   :  { %3134 = vadd.xlane.f32.xlu0 %v3133_v17  ;;  %v3189_v17 = vld [vmem:[#allocation2 + $0x2b0] sm:$0xff] }
0x1904   :  { %v3128_v1 = vpop.f32.mrf.mxu1 }
0x1905   :  { %v3129_v15 = vadd.f32 %v5284_v10, %v3128_v1  ;;  %v3188_v1 = vld [vmem:[#allocation2 + $0x2a8] sm:$0xff] }
0x1907   :  { %v3132_v55 = vadd.f32 %v3129_v15, %v6237_v32  ;;  %v3186_v32 = vld [vmem:[#allocation2 + $0x298] sm:$0xff]  ;;  %v5287_v15 = vld [vmem:[#allocation2 + $0x2a0] ss:$0 sm:$0xff] }
0x1908   :  { %3218 = vmatpush.msrb.mxu2 %v3186_v32 }
0x1909   :  { %v3136_v3 = vsel %vm105_vm4, %v3132_v55, 0.0 }
0x190a   :  { %3137 = vadd.xlane.f32.xlu1 %v3136_v3  ;;  %3219 = vmatpush.msrb.mxu2 %v3185_v40 }
0x190c   :  { %3220 = vmatpush.msrb.mxu2 %v3184_v41 }
0x190e   :  { %3221 = vmatpush.msrb.mxu2 %v3183_v24 }
0x1957   :  { %v3135_v23 = vpop.xlane.xlu0 %3134 }
0x1958   :  { %v3139_v25 = vmul.f32 %v3135_v23, %v5816_v4 }
0x195a   :  { %v3141_v28 = vsub.f32 %v3131_v16, %v3139_v25  ;;  %v3190_v16 = vld [vmem:[#allocation2 + $0x2b8] sm:$0xff] }
0x195b   :  { %3251 = vmatpush.msra.mxu3 %v3190_v16 }
0x195c   :  { %v3143_v0 = vmul.f32 %v3141_v28, %v3141_v28 }
0x195d   :  { %3252 = vmatpush.msra.mxu3 %v3189_v17 }
0x195e   :  { %v3145_v33 = vsel %vm105_vm4, %v3143_v0, 0.0 }
0x195f   :  { %3146 = vadd.xlane.f32.xlu2 %v3145_v33  ;;  %3253 = vmatpush.msra.mxu3 %v3188_v1  ;;  %v5288_v33 = vld [vmem:[#allocation2 + $0x2e8] ss:$0 sm:$0xff] }
0x197d   :  { %v3138_v37 = vpop.xlane.xlu1 %3137 }
0x197e   :  { %v3140_v19 = vmul.f32 %v3138_v37, %v5816_v4 }
0x1980   :  { %v3142_v22 = vsub.f32 %v3132_v55, %v3140_v19 }
0x1982   :  { %v3144_v34 = vmul.f32 %v3142_v22, %v3142_v22 }
0x1984   :  { %v3148_v18 = vsel %vm105_vm4, %v3144_v34, 0.0 }
0x1985   :  { %3149 = vadd.xlane.f32.xlu0 %v3148_v18 }
0x19d2   :  { %v3147_v43 = vpop.xlane.xlu2 %3146 }
0x19d3   :  { %v3151_v61 = vmul.f32 %v3147_v43, %v5816_v4 }
0x19d5   :  { %v3153_v47 = vadd.f32 1e-05, %v3151_v61 }
0x19d7   :  { %5454 = vrsqrt.f32 %v3153_v47  ;;  %vm3161_vm12 = vweird.f32 %v3153_v47 }
0x19dd   :  { %v5455_v45 = vpop.eup %5454 }
0x19de   :  { %v3156_v31 = vmul.f32 %v5455_v45, %v3153_v47  ;;  %vm3162_vm11 = vweird.f32 %v5455_v45 }
0x19df   :  { %vm3163_vm13 = vmor %vm3161_vm12, %vm3162_vm11 }
0x19e0   :  { %v3157_v39 = vmul.f32 %v5455_v45, %v3156_v31 }
0x19e2   :  { %v3158_v46 = vmul.f32 0.5, %v3157_v39 }
0x19e4   :  { %v3159_v26 = vsub.f32 1.5, %v3158_v46 }
0x19e6   :  { %v3160_v48 = vmul.f32 %v5455_v45, %v3159_v26 }
0x19e8   :  { %v3164_v50 = vsel %vm3163_vm13, %v5455_v45, %v3160_v48 }
0x19e9   :  { %v3175_v52 = vmul.f32 %v3164_v50, %v3141_v28  ;;  %v3315_v50 = vld [vmem:[#allocation2 + $0x310] sm:$0xff] }
0x19eb   :  { %v3178_v54 = vmul.f32 %v5285_v44, %v3175_v52  ;;  %v3313_v52 = vld [vmem:[#allocation2 + $0x300] sm:$0xff] }
0x19ed   :  { %v3181_v53 = vadd.f32 %v5286_v51, %v3178_v54 }
0x19ef   :  { %5089 = vmatmul.msk.f32.vlgmr.msrb.gmra.mxu2 %vm105_vm4, %v3181_v53 }
0x19f8   :  { %v3150_v56 = vpop.xlane.xlu0 %3149 }
0x19f9   :  { %v3152_v27 = vmul.f32 %v3150_v56, %v5816_v4 }
0x19fb   :  { %v3154_v36 = vadd.f32 1e-05, %v3152_v27 }
0x19fd   :  { %5456 = vrsqrt.f32 %v3154_v36  ;;  %vm3171_vm1 = vweird.f32 %v3154_v36 }
0x1a03   :  { %v5457_v30 = vpop.eup %5456 }
0x1a04   :  { %v3166_v2 = vmul.f32 %v5457_v30, %v3154_v36  ;;  %vm3172_vm14 = vweird.f32 %v5457_v30 }
0x1a05   :  { %vm3173_vm2 = vmor %vm3171_vm1, %vm3172_vm14 }
0x1a06   :  { %v3167_v5 = vmul.f32 %v5457_v30, %v3166_v2 }
0x1a08   :  { %v3168_v6 = vmul.f32 0.5, %v3167_v5  ;;  %v5290_v5 = vld [vmem:[#allocation2 + $0x2f8] ss:$0 sm:$0xff] }
0x1a0a   :  { %v3169_v8 = vsub.f32 1.5, %v3168_v6 }
0x1a0c   :  { %v3170_v9 = vmul.f32 %v5457_v30, %v3169_v8 }
0x1a0e   :  { %v3174_v12 = vsel %vm3173_vm2, %v5457_v30, %v3170_v9 }
0x1a0f   :  { %v3176_v10 = vmul.f32 %v3174_v12, %v3142_v22 }
0x1a11   :  { %v3179_v11 = vmul.f32 %v5285_v44, %v3176_v10  ;;  %v3316_v44 = vld [vmem:[#allocation2 + $0x318] sm:$0xff] }
0x1a12   :  { %3344 = vmatpush.msra.mxu0 %v3316_v44 }
0x1a13   :  { %v3182_v62 = vadd.f32 %v5286_v51, %v3179_v11  ;;  %v3314_v51 = vld [vmem:[#allocation2 + $0x308] sm:$0xff] }
0x1a14   :  { %3345 = vmatpush.msra.mxu0 %v3315_v50 }
0x1a15   :  { %5090 = vmatmul.msk.f32.gmra.mxu2 %vm105_vm4, %v3182_v62 }
0x1a16   :  { %3346 = vmatpush.msra.mxu0 %v3314_v51 }
0x1a18   :  { %3347 = vmatpush.msra.mxu0 %v3313_v52 }
0x1a72   :  { %v3223_v55 = vpop.f32.mrf.mxu2 }
0x1a73   :  { %v3224_v3 = vadd.f32 %v5287_v15, %v3223_v55 }
0x1a75   :  { %v3229_v23 = vmax.f32 %v3224_v3, 0.0 }
0x1a77   :  { %5091 = vmatmul.msk.f32.vlgmr.msra.gmra.mxu3 %vm832_vm15, %v3229_v23 }
0x1a98   :  { %v3226_v25 = vpop.f32.mrf.mxu2 }
0x1a99   :  { %v3227_v28 = vadd.f32 %v5287_v15, %v3226_v25 }
0x1a9b   :  { %v3230_v0 = vmax.f32 %v3227_v28, 0.0  ;;  %v5291_v28 = vld [vmem:[#allocation2 + $0x320] ss:$0 sm:$0xff] }
0x1a9d   :  { %5092 = vmatmul.msk.f32.gmra.mxu3 %vm832_vm15, %v3230_v0 }
0x1afa   :  { %v3255_v37 = vpop.f32.mrf.mxu3 }
0x1afb   :  { %v3256_v19 = vadd.f32 %v5288_v33, %v3255_v37 }
0x1afd   :  { %v3261_v22 = vadd.f32 %v3256_v19, %v3181_v53 }
0x1aff   :  { %v3263_v34 = vsel %vm105_vm4, %v3261_v22, 0.0 }
0x1b00   :  { %3264 = vadd.xlane.f32.xlu1 %v3263_v34 }
0x1b20   :  { %v3258_v18 = vpop.f32.mrf.mxu3 }
0x1b21   :  { %v3259_v32 = vadd.f32 %v5288_v33, %v3258_v18 }
0x1b23   :  { %v3262_v40 = vadd.f32 %v3259_v32, %v3182_v62 }
0x1b25   :  { %v3266_v41 = vsel %vm105_vm4, %v3262_v40, 0.0 }
0x1b26   :  { %3267 = vadd.xlane.f32.xlu2 %v3266_v41 }
0x1b73   :  { %v3265_v24 = vpop.xlane.xlu1 %3264 }
0x1b74   :  { %v3269_v43 = vmul.f32 %v3265_v24, %v5816_v4 }
0x1b76   :  { %v3271_v61 = vsub.f32 %v3261_v22, %v3269_v43 }
0x1b78   :  { %v3273_v47 = vmul.f32 %v3271_v61, %v3271_v61 }
0x1b7a   :  { %v3275_v45 = vsel %vm105_vm4, %v3273_v47, 0.0 }
0x1b7b   :  { %3276 = vadd.xlane.f32.xlu0 %v3275_v45 }
0x1b99   :  { %v3268_v31 = vpop.xlane.xlu2 %3267 }
0x1b9a   :  { %v3270_v39 = vmul.f32 %v3268_v31, %v5816_v4 }
0x1b9c   :  { %v3272_v46 = vsub.f32 %v3262_v40, %v3270_v39 }
0x1b9e   :  { %v3274_v26 = vmul.f32 %v3272_v46, %v3272_v46 }
0x1ba0   :  { %v3278_v48 = vsel %vm105_vm4, %v3274_v26, 0.0 }
0x1ba1   :  { %3279 = vadd.xlane.f32.xlu1 %v3278_v48 }
0x1bee   :  { %v3277_v54 = vpop.xlane.xlu0 %3276 }
0x1bef   :  { %v3281_v53 = vmul.f32 %v3277_v54, %v5816_v4 }
0x1bf1   :  { %v3283_v35 = vadd.f32 1e-05, %v3281_v53 }
0x1bf3   :  { %5458 = vrsqrt.f32 %v3283_v35  ;;  %vm3291_vm8 = vweird.f32 %v3283_v35 }
0x1bf9   :  { %v5459_v14 = vpop.eup %5458 }
0x1bfa   :  { %v3286_v20 = vmul.f32 %v5459_v14, %v3283_v35  ;;  %vm3292_vm3 = vweird.f32 %v5459_v14 }
0x1bfb   :  { %vm3293_vm9 = vmor %vm3291_vm8, %vm3292_vm3 }
0x1bfc   :  { %v3287_v56 = vmul.f32 %v5459_v14, %v3286_v20 }
0x1bfe   :  { %v3288_v27 = vmul.f32 0.5, %v3287_v56 }
0x1c00   :  { %v3289_v59 = vsub.f32 1.5, %v3288_v27 }
0x1c02   :  { %v3290_v36 = vmul.f32 %v5459_v14, %v3289_v59 }
0x1c04   :  { %v3294_v30 = vsel %vm3293_vm9, %v5459_v14, %v3290_v36 }
0x1c05   :  { %v3305_v2 = vmul.f32 %v3294_v30, %v3271_v61 }
0x1c07   :  { %v3308_v6 = vmul.f32 %v5289_v60, %v3305_v2 }
0x1c09   :  { %v6349_v8 = vadd.f32 %v5290_v5, %v3308_v6 }
0x1c0b   :  { %5093 = vmatmul.msk.f32.vlgmr.msra.gmra.mxu0 %vm105_vm4, %v6349_v8 }
0x1c14   :  { %v3280_v9 = vpop.xlane.xlu1 %3279 }
0x1c15   :  { %v3282_v12 = vmul.f32 %v3280_v9, %v5816_v4 }
0x1c17   :  { %v3284_v10 = vadd.f32 1e-05, %v3282_v12 }
0x1c19   :  { %5460 = vrsqrt.f32 %v3284_v10  ;;  %vm3301_vm11 = vweird.f32 %v3284_v10 }
0x1c1f   :  { %v5461_v11 = vpop.eup %5460 }
0x1c20   :  { %v3296_v62 = vmul.f32 %v5461_v11, %v3284_v10  ;;  %vm3302_vm10 = vweird.f32 %v5461_v11 }
0x1c21   :  { %vm3303_vm12 = vmor %vm3301_vm11, %vm3302_vm10 }
0x1c22   :  { %v3297_v16 = vmul.f32 %v5461_v11, %v3296_v62 }
0x1c24   :  { %v3298_v17 = vmul.f32 0.5, %v3297_v16 }
0x1c26   :  { %v3299_v1 = vsub.f32 1.5, %v3298_v17 }
0x1c28   :  { %v3300_v15 = vmul.f32 %v5461_v11, %v3299_v1 }
0x1c2a   :  { %v3304_v55 = vsel %vm3303_vm12, %v5461_v11, %v3300_v15 }
0x1c2b   :  { %v3306_v3 = vmul.f32 %v3304_v55, %v3272_v46 }
0x1c2d   :  { %v3309_v23 = vmul.f32 %v5289_v60, %v3306_v3 }
0x1c2f   :  { %v6354_v25 = vadd.f32 %v5290_v5, %v3309_v23 }
0x1c31   :  { %5094 = vmatmul.msk.f32.gmra.mxu0 %vm105_vm4, %v6354_v25 }
0x1c88   :  { %v3349_v0 = vpop.f32.mrf.mxu0 }
0x1c89   :  { %v6358_v33 = vadd.f32 %v5291_v28, %v3349_v0 }
0x1c8b   :  { %3357 = vrot.lane.b32.xlu0 %v6358_v33, %s5604_s25  ;;  %3361 = vrot.lane.b32.xlu2 %v6358_v33, %s5605_s26 }
0x1c93   :  { %3365 = vrot.lane.b32.xlu2 %v6358_v33, %s5603_s0 }
0x1c9b   :  { %3369 = vrot.lane.b32.xlu2 %v6358_v33, %s5606_s27 }
0x1cae   :  { %v3352_v37 = vpop.f32.mrf.mxu0 }
0x1caf   :  { %v6368_v19 = vadd.f32 %v5291_v28, %v3352_v37 }
0x1cb1   :  { %3359 = vrot.lane.b32.xlu0 %v6368_v19, %s5604_s25  ;;  %3363 = vrot.lane.b32.xlu1 %v6368_v19, %s5605_s26 }
0x1cb9   :  { %3367 = vrot.lane.b32.xlu0 %v6368_v19, %s5603_s0  ;;  %3395 = vrot.lane.b32.xlu1 %v6368_v19, %s5606_s27 }
0x1ce5   :  { %v6378_v22 = vpop.permute.xlu2 %3361 }
0x1ce6   :  { %3473 = vrot.lane.b32.xlu0 %v6378_v22, %s5606_s27 }
0x1ced   :  { %v6382_v34 = vpop.permute.xlu2 %3365 }
0x1cf5   :  { %v3370_v18 = vpop.permute.xlu2 %3369 }
0x1cf6   :  { %5095 = vmatpush.xpose.msk.msra.mxu1 %vm151_vm5, %v3370_v18 }
0x1cf9   :  { %5096 = vmatmul.msk.f32.vlgmr.msra.gmra.mxu1 %vm151_vm5, %v6358_v33 }
0x1cfd   :  { %v6387_v32 = vpop.permute.xlu0 %3357 }
0x1cfe   :  { %3421 = vrot.lane.b32.xlu1 %v6387_v32, %s5606_s27  ;;  %v5232_v0 = vpack.i.bf16 %v6387_v32, %v6358_v33 }
0x1d06   :  { %3525 = vrot.lane.b32.xlu1 %v6382_v34, %s5606_s27 }
0x1d23   :  { %v6393_v40 = vpop.permute.xlu0 %3359  ;;  %v6395_v41 = vpop.permute.xlu1 %3363 }
0x1d24   :  { %3447 = vrot.lane.b32.xlu0 %v6393_v40, %s5606_s27  ;;  %3499 = vrot.lane.b32.xlu2 %v6395_v41, %s5606_s27 }
0x1d2b   :  { %v6401_v24 = vpop.permute.xlu0 %3367  ;;  %v3396_v43 = vpop.permute.xlu1 %3395 }
0x1d2c   :  { %3551 = vrot.lane.b32.xlu2 %v6401_v24, %s5606_s27  ;;  %5097 = vmatpush.xpose.msk.msra.mxu2 %vm151_vm5, %v3396_v43 }
0x1d2f   :  { %5098 = vmatmul.msk.f32.vlgmr.msra.gmra.mxu2 %vm151_vm5, %v6368_v19 }
0x1d58   :  { %v3474_v61 = vpop.permute.xlu0 %3473 }
0x1d59   :  { %5103 = vmatpush.xpose.msk.msrb.mxu2 %vm151_vm5, %v3474_v61 }
0x1d5c   :  { %5104 = vmatmul.msk.f32.vlgmr.msrb.gmra.mxu2 %vm151_vm5, %v6378_v22 }
0x1d70   :  { %v3422_v47 = vpop.permute.xlu1 %3421 }
0x1d71   :  { %5099 = vmatpush.xpose.msk.msrb.mxu0 %vm151_vm5, %v3422_v47 }
0x1d74   :  { %5100 = vmatmul.msk.f32.vlgmr.msrb.gmra.mxu0 %vm151_vm5, %v6387_v32 }
0x1d76   :  { %v3392_v45 = vpop.f32.mrf.mxu1 }
0x1d77   :  { %v3577_v31 = vmul.f32 0.35355338, %v3392_v45 }
0x1d78   :  { %v3526_v39 = vpop.permute.xlu1 %3525 }
0x1d79   :  { %v3585_v46 = vsel %vm6096_vm0, -1e+09, %v3577_v31  ;;  %5107 = vmatpush.xpose.msk.msra.mxu0 %vm151_vm5, %v3526_v39 }
0x1d7a   :  { %v3593_v26 = vsel %vm151_vm5, %v3585_v46, -inf }
0x1d7b   :  { %3594 = vmax.xlane.f32.xlu0 %v3593_v26 }
0x1d7c   :  { %5108 = vmatmul.msk.f32.vlgmr.msra.gmra.mxu0 %vm151_vm5, %v6382_v34 }
0x1d7e   :  { %v3500_v48 = vpop.permute.xlu2 %3499 }
0x1d7f   :  { %5105 = vmatpush.xpose.msk.msrb.mxu3 %vm151_vm5, %v3500_v48 }
0x1d82   :  { %5106 = vmatmul.msk.f32.vlgmr.msrb.gmra.mxu3 %vm151_vm5, %v6395_v41 }
0x1d86   :  { %v3552_v50 = vpop.permute.xlu2 %3551 }
0x1d96   :  { %v3448_v44 = vpop.permute.xlu0 %3447 }
0x1d97   :  { %5101 = vmatpush.xpose.msk.msrb.mxu1 %vm151_vm5, %v3448_v44 }
0x1d9a   :  { %5102 = vmatmul.msk.f32.vlgmr.msrb.gmra.mxu1 %vm151_vm5, %v6393_v40 }
0x1d9b   :  { %5109 = vmatpush.xpose.msk.msra.mxu1 %vm151_vm5, %v3552_v50 }
0x1da2   :  { %5110 = vmatmul.msk.f32.vlgmr.msra.gmra.mxu1 %vm151_vm5, %v6401_v24 }
0x1db2   :  { %v3418_v51 = vpop.f32.mrf.mxu2 }
0x1db3   :  { %v3578_v52 = vmul.f32 0.35355338, %v3418_v51 }
0x1db5   :  { %v3586_v54 = vsel %vm6096_vm0, -1e+09, %v3578_v52 }
0x1db6   :  { %v3596_v53 = vsel %vm151_vm5, %v3586_v54, -inf }
0x1db7   :  { %3597 = vmax.xlane.f32.xlu2 %v3596_v53 }
0x1ddf   :  { %v3496_v35 = vpop.f32.mrf.mxu2 }
0x1de0   :  { %v3581_v14 = vmul.f32 0.35355338, %v3496_v35 }
0x1de2   :  { %v3589_v20 = vsel %vm6096_vm0, -1e+09, %v3581_v14 }
0x1de3   :  { %v3605_v56 = vsel %vm151_vm5, %v3589_v20, -inf }
0x1de4   :  { %3606 = vmax.xlane.f32.xlu0 %v3605_v56 }
0x1dee   :  { %v3595_v27 = vpop.xlane.xlu0 %3594 }
0x1def   :  { %v3617_v60 = vsub.f32 %v3585_v46, %v3595_v27 }
0x1df1   :  { %v3444_v59 = vpop.f32.mrf.mxu0  ;;  %v3625_v5 = vmul.f32 1.442695, %v3617_v60 }
0x1df2   :  { %v3579_v36 = vmul.f32 0.35355338, %v3444_v59  ;;  %v5242_v59 = vpack.i.bf16 %v6382_v34, %v6393_v40  ;;  %v5237_v34 = vpack.i.bf16 %v6378_v22, %v6368_v19 }
0x1df3   :  { %5462 = vpow2.f32 %v3625_v5 }
0x1df4   :  { %v3587_v30 = vsel %vm6096_vm0, -1e+09, %v3579_v36 }
0x1df5   :  { %v3599_v2 = vsel %vm151_vm5, %v3587_v30, -inf }
0x1df6   :  { %3600 = vmax.xlane.f32.xlu1 %v3599_v2 }
0x1df9   :  { %v3548_v6 = vpop.f32.mrf.mxu0  ;;  %v5463_v11 = vpop.eup %5462 }
0x1dfa   :  { %v3583_v9 = vmul.f32 0.35355338, %v3548_v6  ;;  %v3641_v16 = vsel %vm151_vm5, %v5463_v11, 0.0 }
0x1dfc   :  { %v3591_v12 = vsel %vm6096_vm0, -1e+09, %v3583_v9 }
0x1dfd   :  { %v3611_v10 = vsel %vm151_vm5, %v3591_v12, -inf }
0x1dfe   :  { %3612 = vmax.xlane.f32.xlu1 %v3611_v10 }
0x1e05   :  { %v3522_v62 = vpop.f32.mrf.mxu3 }
0x1e06   :  { %v3582_v17 = vmul.f32 0.35355338, %v3522_v62  ;;  %3642 = vadd.xlane.f32.xlu1 %v3641_v16 }
0x1e08   :  { %v6444_v1 = vsel %vm6096_vm0, -1e+09, %v3582_v17 }
0x1e09   :  { %v3608_v15 = vsel %vm151_vm5, %v6444_v1, -inf }
0x1e0a   :  { %3609 = vmax.xlane.f32.xlu0 %v3608_v15 }
0x1e17   :  { %v3470_v55 = vpop.f32.mrf.mxu1 }
0x1e18   :  { %v3580_v3 = vmul.f32 0.35355338, %v3470_v55 }
0x1e1a   :  { %v3588_v23 = vsel %vm6096_vm0, -1e+09, %v3580_v3 }
0x1e1b   :  { %v3602_v28 = vsel %vm151_vm5, %v3588_v23, -inf }
0x1e1c   :  { %3603 = vmax.xlane.f32.xlu2 %v3602_v28 }
0x1e1e   :  { %5233 = vrot.lane.b32.xlu0 %v5232_v0, %s5607_s28 }
0x1e1f   :  { %v3574_v37 = vpop.f32.mrf.mxu1 }
0x1e20   :  { %v3584_v18 = vmul.f32 0.35355338, %v3574_v37 }
0x1e22   :  { %v3592_v43 = vsel %vm6096_vm0, -1e+09, %v3584_v18 }
0x1e23   :  { %v3614_v61 = vsel %vm151_vm5, %v3592_v43, -inf }
0x1e24   :  { %3615 = vmax.xlane.f32.xlu2 %v3614_v61 }
0x1e2a   :  { %v3598_v47 = vpop.xlane.xlu2 %3597 }
0x1e2b   :  { %v3618_v45 = vsub.f32 %v3586_v54, %v3598_v47 }
0x1e2d   :  { %v3627_v31 = vmul.f32 1.442695, %v3618_v45 }
0x1e2f   :  { %5464 = vpow2.f32 %v3627_v31 }
0x1e35   :  { %v6457_v39 = vpop.eup %5464 }
0x1e36   :  { %v3644_v33 = vsel %vm151_vm5, %v6457_v39, 0.0 }
0x1e37   :  { %3645 = vadd.xlane.f32.xlu2 %v3644_v33 }
0x1e57   :  { %v3607_v32 = vpop.xlane.xlu0 %3606 }
0x1e58   :  { %v3621_v46 = vsub.f32 %v3589_v20, %v3607_v32 }
0x1e5a   :  { %v3633_v26 = vmul.f32 1.442695, %v3621_v46 }
0x1e5c   :  { %5466 = vpow2.f32 %v3633_v26 }
0x1e62   :  { %v6461_v48 = vpop.eup %5466 }
0x1e63   :  { %v3653_v7 = vsel %vm151_vm5, %v6461_v48, 0.0 }
0x1e64   :  { %3654 = vadd.xlane.f32.xlu1 %v3653_v7 }
0x1e69   :  { %v3601_v44 = vpop.xlane.xlu1 %3600 }
0x1e6a   :  { %v3619_v50 = vsub.f32 %v3587_v30, %v3601_v44 }
0x1e6c   :  { %v3629_v51 = vmul.f32 1.442695, %v3619_v50 }
0x1e6e   :  { %5468 = vpow2.f32 %v3629_v51 }
0x1e71   :  { %v3613_v52 = vpop.xlane.xlu1 %3612 }
0x1e72   :  { %v3623_v54 = vsub.f32 %v3591_v12, %v3613_v52 }
0x1e74   :  { %v5469_v53 = vpop.eup %5468  ;;  %v3637_v35 = vmul.f32 1.442695, %v3623_v54 }
0x1e75   :  { %v3647_v14 = vsel %vm151_vm5, %v5469_v53, 0.0 }
0x1e76   :  { %5470 = vpow2.f32 %v3637_v35  ;;  %3648 = vadd.xlane.f32.xlu0 %v3647_v14 }
0x1e79   :  { %v3643_v27 = vpop.xlane.xlu1 %3642 }
0x1e7a   :  { %5472 = vrcp.f32 %v3643_v27 }
0x1e7c   :  { %v5471_v20 = vpop.eup %5470 }
0x1e7d   :  { %v3659_v56 = vsel %vm151_vm5, %v5471_v20, 0.0  ;;  %v3610_v36 = vpop.xlane.xlu0 %3609 }
0x1e7e   :  { %3660 = vadd.xlane.f32.xlu1 %v3659_v56  ;;  %v3622_v10 = vsub.f32 %v6444_v1, %v3610_v36 }
0x1e80   :  { %v5473_v60 = vpop.eup %5472  ;;  %v3635_v40 = vmul.f32 1.442695, %v3622_v10  ;;  %v3319_v10 = vld [vmem:[#allocation2 + $0x330] sm:$0xff] }
0x1e81   :  { %v3673_v12 = vmul.f32 %v5473_v60, %v5463_v11 }
0x1e8a   :  { %5243 = vrot.lane.b32.xlu0 %v5242_v59, %s5607_s28 }
0x1e8f   :  { %v3604_v30 = vpop.xlane.xlu2 %3603 }
0x1e90   :  { %v3620_v2 = vsub.f32 %v3588_v23, %v3604_v30  ;;  %v5234_v5 = vpop.permute.xlu0 %5233 }
0x1e91   :  { %v5236_v6 = vunpack.i.h.bf16 %v5234_v5  ;;  %v5235_v9 = vunpack.i.l.bf16 %v5234_v5 }
0x1e92   :  { %v3631_v62 = vmul.f32 1.442695, %v3620_v2  ;;  %3863 = vrot.lane.b32.xlu0 %v6401_v24, %s5607_s28 }
0x1e93   :  { %3702 = vmatpush.msra.mxu2 %v5235_v9  ;;  %3754 = vmatpush.msrb.mxu0 %v5236_v6  ;;  %v3321_v9 = vld [vmem:[#allocation2 + $0x340] sm:$0xff] }
0x1e94   :  { %5474 = vpow2.f32 %v3631_v62  ;;  %5111 = vmatmul.msk.f32.vlgmr.msra.gmra.mxu2 %vm151_vm5, %v3673_v12  ;;  %v3320_v12 = vld [vmem:[#allocation2 + $0x338] sm:$0xff]  ;;  %v3318_v62 = vld [vmem:[#allocation2 + $0x328] sm:$0xff] }
0x1e95   :  { %5476 = vpow2.f32 %v3635_v40 }
0x1e97   :  { %v3616_v16 = vpop.xlane.xlu2 %3615  ;;  %5238 = vrot.lane.b32.xlu1 %v5237_v34, %s5607_s28 }
0x1e98   :  { %v3624_v11 = vsub.f32 %v3592_v43, %v3616_v16 }
0x1e9a   :  { %v5475_v17 = vpop.eup %5474  ;;  %v3639_v15 = vmul.f32 1.442695, %v3624_v11 }
0x1e9b   :  { %v3650_v1 = vsel %vm151_vm5, %v5475_v17, 0.0  ;;  %v5477_v24 = vpop.eup %5476 }
0x1e9c   :  { %3651 = vadd.xlane.f32.xlu2 %v3650_v1  ;;  %5478 = vpow2.f32 %v3639_v15  ;;  %v3656_v55 = vsel %vm151_vm5, %v5477_v24, 0.0 }
0x1ea2   :  { %v5479_v3 = vpop.eup %5478 }
0x1ea3   :  { %v3662_v23 = vsel %vm151_vm5, %v5479_v3, 0.0 }
0x1ea4   :  { %3657 = vadd.xlane.f32.xlu2 %v3656_v55 }
0x1eaa   :  { %v3646_v45 = vpop.xlane.xlu2 %3645 }
0x1eac   :  { %3663 = vadd.xlane.f32.xlu2 %v3662_v23 }
0x1ec4   :  { %3811 = vrot.lane.b32.xlu2 %v6395_v41, %s5607_s28 }
0x1ed7   :  { %v3655_v22 = vpop.xlane.xlu1 %3654 }
0x1ee9   :  { %v3649_v19 = vpop.xlane.xlu0 %3648 }
0x1eea   :  { %5480 = vrcp.f32 %v3649_v19 }
0x1ef0   :  { %v5481_v28 = vpop.eup %5480 }
0x1ef1   :  { %v3675_v0 = vmul.f32 %v5481_v28, %v5469_v53  ;;  %v3661_v37 = vpop.xlane.xlu1 %3660 }
0x1ef2   :  { %5482 = vrcp.f32 %v3661_v37 }
0x1ef3   :  { %5113 = vmatmul.msk.f32.vlgmr.msrb.gmra.mxu0 %vm151_vm5, %v3675_v0  ;;  %5484 = vrcp.f32 %v3646_v45 }
0x1ef4   :  { %5486 = vrcp.f32 %v3655_v22  ;;  %v5292_v22 = vld [vmem:[#allocation2 + $0x348] ss:$0 sm:$0xff] }
0x1ef8   :  { %v5483_v18 = vpop.eup %5482 }
0x1ef9   :  { %v3679_v31 = vmul.f32 %v5483_v18, %v5471_v20  ;;  %v5485_v33 = vpop.eup %5484 }
0x1efa   :  { %v5487_v32 = vpop.eup %5486  ;;  %v3674_v44 = vmul.f32 %v5485_v33, %v6457_v39 }
0x1efb   :  { %v3677_v50 = vmul.f32 %v5487_v32, %v6461_v48 }
0x1efc   :  { %v5244_v43 = vpop.permute.xlu0 %5243 }
0x1efd   :  { %v5246_v61 = vunpack.i.h.bf16 %v5244_v43  ;;  %v5245_v47 = vunpack.i.l.bf16 %v5244_v43 }
0x1eff   :  { %3780 = vmatpush.msrb.mxu1 %v5245_v47  ;;  %3858 = vmatpush.msra.mxu0 %v5246_v61 }
0x1f00   :  { %5117 = vmatmul.msk.f32.vlgmr.msra.gmra.mxu0 %vm151_vm5, %v3679_v31 }
0x1f04   :  { %v3864_v41 = vpop.permute.xlu0 %3863 }
0x1f05   :  { %3884 = vmatpush.msra.mxu1 %v3864_v41 }
0x1f09   :  { %v5239_v46 = vpop.permute.xlu1 %5238 }
0x1f0a   :  { %v5241_v26 = vunpack.i.h.bf16 %v5239_v46  ;;  %v5240_v7 = vunpack.i.l.bf16 %v5239_v46 }
0x1f0c   :  { %3728 = vmatpush.msra.mxu3 %v5240_v7  ;;  %3806 = vmatpush.msrb.mxu2 %v5241_v26 }
0x1f0d   :  { %5112 = vmatmul.msk.f32.vlgmr.msra.gmra.mxu3 %vm151_vm5, %v3674_v44  ;;  %5115 = vmatmul.msk.f32.vlgmr.msrb.gmra.mxu2 %vm151_vm5, %v3677_v50 }
0x1f0e   :  { %3938 = vmatpush.msra.mxu2 %v3321_v9  ;;  %v5294_v9 = vld [vmem:[#allocation2 + $0x358] ss:$0 sm:$0xff] }
0x1f0f   :  { %v3652_v51 = vpop.xlane.xlu2 %3651 }
0x1f10   :  { %5488 = vrcp.f32 %v3652_v51  ;;  %3939 = vmatpush.msra.mxu2 %v3320_v12 }
0x1f12   :  { %3940 = vmatpush.msra.mxu2 %v3319_v10 }
0x1f14   :  { %3941 = vmatpush.msra.mxu2 %v3318_v62 }
0x1f16   :  { %v5489_v52 = vpop.eup %5488 }
0x1f17   :  { %v3676_v54 = vmul.f32 %v5489_v52, %v5475_v17  ;;  %v3658_v53 = vpop.xlane.xlu2 %3657  ;;  %v3704_v36 = vpop.f32.mrf.mxu2  ;;  %v4004_v52 = vld [vmem:[#allocation2 + $0x378] sm:$0xff] }
0x1f18   :  { %5490 = vrcp.f32 %v3658_v53  ;;  %v4002_v53 = vld [vmem:[#allocation2 + $0x368] sm:$0xff] }
0x1f19   :  { %5114 = vmatmul.msk.f32.vlgmr.msrb.gmra.mxu1 %vm151_vm5, %v3676_v54  ;;  %v4003_v54 = vld [vmem:[#allocation2 + $0x370] sm:$0xff] }
0x1f1e   :  { %v5491_v14 = vpop.eup %5490 }
0x1f1f   :  { %v3664_v35 = vpop.xlane.xlu2 %3663  ;;  %v3678_v20 = vmul.f32 %v5491_v14, %v5477_v24 }
0x1f20   :  { %5492 = vrcp.f32 %v3664_v35  ;;  %v4001_v35 = vld [vmem:[#allocation2 + $0x360] sm:$0xff] }
0x1f26   :  { %v5493_v39 = vpop.eup %5492 }
0x1f27   :  { %v3680_v48 = vmul.f32 %v5493_v39, %v5479_v3  ;;  %v3812_v56 = vpop.permute.xlu2 %3811 }
0x1f28   :  { %3832 = vmatpush.msrb.mxu3 %v3812_v56 }
0x1f29   :  { %5116 = vmatmul.msk.f32.vlgmr.msrb.gmra.mxu3 %vm151_vm5, %v3678_v20  ;;  %5118 = vmatmul.msk.f32.vlgmr.msra.gmra.mxu1 %vm151_vm5, %v3680_v48 }
0x1f2a   :  { %4032 = vmatpush.msra.mxu3 %v4004_v52 }
0x1f2c   :  { %4033 = vmatpush.msra.mxu3 %v4003_v54 }
0x1f2e   :  { %4034 = vmatpush.msra.mxu3 %v4002_v53 }
0x1f30   :  { %4035 = vmatpush.msra.mxu3 %v4001_v35 }
0x1f70   :  { %v3756_v27 = vpop.f32.mrf.mxu0 }
0x1f71   :  { %3891 = vrot.lane.b32.xlu1 %v3756_v27, %s5600_s21 }
0x1f7d   :  { %v3860_v59 = vpop.f32.mrf.mxu0 }
0x1f7e   :  { %3907 = vrot.lane.b32.xlu1 %v3860_v59, %s5608_s29 }
0x1f90   :  { %v3808_v60 = vpop.f32.mrf.mxu2  ;;  %v3730_v2 = vpop.f32.mrf.mxu3 }
0x1f91   :  { %3899 = vrot.lane.b32.xlu0 %v3808_v60, %s5609_s30 }
0x1f96   :  { %v3782_v30 = vpop.f32.mrf.mxu1 }
0x1f99   :  { %3893 = vrot.lane.b32.xlu0 %v3782_v30, %s5600_s21  ;;  %v5293_v30 = vld [vmem:[#allocation2 + $0x350] ss:$0 sm:$0xff] }
0x1fa6   :  { %v3886_v5 = vpop.f32.mrf.mxu1 }
0x1fa7   :  { %3909 = vrot.lane.b32.xlu1 %v3886_v5, %s5608_s29 }
0x1fac   :  { %v3834_v6 = vpop.f32.mrf.mxu3 }
0x1fad   :  { %3901 = vrot.lane.b32.xlu2 %v3834_v6, %s5609_s30 }
0x1fe3   :  { %v3892_v34 = vpop.permute.xlu1 %3891 }
0x1fe4   :  { %v3913_v40 = vsel %vm151_vm5, %v3704_v36, %v3892_v34 }
0x1ff0   :  { %v3908_v17 = vpop.permute.xlu1 %3907 }
0x2003   :  { %v3900_v16 = vpop.permute.xlu0 %3899 }
0x2004   :  { %v3915_v11 = vsel %vm688_vm6, %v3913_v40, %v3900_v16 }
0x2005   :  { %v3917_v1 = vsel %vm691_vm7, %v3915_v11, %v3908_v17 }
0x2006   :  { %5119 = vmatmul.msk.f32.vlgmr.msra.gmra.mxu2 %vm105_vm4, %v3917_v1 }
0x2007   :  { %v3902_v55 = vpop.permute.xlu2 %3901 }
0x200b   :  { %v3894_v15 = vpop.permute.xlu0 %3893 }
0x200c   :  { %v3914_v24 = vsel %vm151_vm5, %v3730_v2, %v3894_v15 }
0x200d   :  { %v3916_v23 = vsel %vm688_vm6, %v3914_v24, %v3902_v55 }
0x2019   :  { %v3910_v3 = vpop.permute.xlu1 %3909 }
0x201a   :  { %v3918_v19 = vsel %vm691_vm7, %v3916_v23, %v3910_v3 }
0x201b   :  { %5120 = vmatmul.msk.f32.gmra.mxu2 %vm105_vm4, %v3918_v19 }
0x2089   :  { %v3943_v28 = vpop.f32.mrf.mxu2 }
0x208a   :  { %v3944_v0 = vadd.f32 %v5292_v22, %v3943_v28 }
0x208c   :  { %v3949_v37 = vadd.f32 %v3944_v0, %v6349_v8  ;;  %v5295_v0 = vld [vmem:[#allocation2 + $0x380] ss:$0 sm:$0xff] }
0x208e   :  { %v3951_v18 = vsel %vm105_vm4, %v3949_v37, 0.0 }
0x208f   :  { %3952 = vadd.xlane.f32.xlu0 %v3951_v18 }
0x209e   :  { %v3946_v43 = vpop.f32.mrf.mxu2 }
0x209f   :  { %v3947_v61 = vadd.f32 %v5292_v22, %v3946_v43 }
0x20a1   :  { %v3950_v47 = vadd.f32 %v3947_v61, %v6354_v25 }
0x20a3   :  { %v3954_v45 = vsel %vm105_vm4, %v3950_v47, 0.0 }
0x20a4   :  { %3955 = vadd.xlane.f32.xlu2 %v3954_v45 }
0x20bc   :  { %4057 = vrot.lane.b32.xlu2 %v6172_v49, %s5607_s28 }
0x20c4   :  { %4109 = vrot.lane.b32.xlu2 %v6217_v29, %s5607_s28 }
0x2102   :  { %v3953_v31 = vpop.xlane.xlu0 %3952 }
0x2103   :  { %v3957_v41 = vmul.f32 %v3953_v31, %v5816_v4 }
0x2105   :  { %v3959_v8 = vsub.f32 %v3949_v37, %v3957_v41 }
0x2107   :  { %v3961_v33 = vmul.f32 %v3959_v8, %v3959_v8 }
0x2109   :  { %v3963_v32 = vsel %vm105_vm4, %v3961_v33, 0.0 }
0x210a   :  { %3964 = vadd.xlane.f32.xlu1 %v3963_v32 }
0x2117   :  { %v3956_v46 = vpop.xlane.xlu2 %3955 }
0x2118   :  { %v3958_v25 = vmul.f32 %v3956_v46, %v5816_v4 }
0x211a   :  { %v3960_v26 = vsub.f32 %v3950_v47, %v3958_v25 }
0x211c   :  { %v3962_v7 = vmul.f32 %v3960_v26, %v3960_v26 }
0x211e   :  { %v3966_v44 = vsel %vm105_vm4, %v3962_v7, 0.0 }
0x211f   :  { %3967 = vadd.xlane.f32.xlu0 %v3966_v44  ;;  %v4058_v50 = vpop.permute.xlu2 %4057 }
0x2120   :  { %5123 = vmatpush.xpose.msk.msrb.mxu0 %vm151_vm5, %v4058_v50 }
0x2123   :  { %4161 = vrot.lane.b32.xlu1 %v6262_v63, %s5607_s28 }
0x2127   :  { %v4110_v51 = vpop.permute.xlu2 %4109 }
0x2128   :  { %5127 = vmatpush.xpose.msk.msra.mxu0 %vm151_vm5, %v4110_v51 }
0x212b   :  { %4135 = vrot.lane.b32.xlu1 %v6227_v58, %s5607_s28 }
0x2133   :  { %4083 = vrot.lane.b32.xlu0 %v6123_v21, %s5607_s28 }
0x217d   :  { %v3965_v14 = vpop.xlane.xlu1 %3964 }
0x217e   :  { %v3969_v39 = vmul.f32 %v3965_v14, %v5816_v4 }
0x2180   :  { %v3971_v20 = vadd.f32 1e-05, %v3969_v39 }
0x2182   :  { %5494 = vrsqrt.f32 %v3971_v20  ;;  %vm3979_vm13 = vweird.f32 %v3971_v20 }
0x2188   :  { %v5495_v48 = vpop.eup %5494 }
0x2189   :  { %v3974_v56 = vmul.f32 %v5495_v48, %v3971_v20  ;;  %vm3980_vm0 = vweird.f32 %v5495_v48 }
0x218a   :  { %vm3981_vm14 = vmor %vm3979_vm13, %vm3980_vm0 }
0x218b   :  { %v3975_v27 = vmul.f32 %v5495_v48, %v3974_v56 }
0x218d   :  { %v3976_v59 = vmul.f32 0.5, %v3975_v27 }
0x218f   :  { %v3977_v36 = vsub.f32 1.5, %v3976_v59 }
0x2191   :  { %v3978_v60 = vmul.f32 %v5495_v48, %v3977_v36 }
0x2192   :  { %v3968_v2 = vpop.xlane.xlu0 %3967 }
0x2193   :  { %v3982_v5 = vsel %vm3981_vm14, %v5495_v48, %v3978_v60  ;;  %v3970_v6 = vmul.f32 %v3968_v2, %v5816_v4 }
0x2194   :  { %v3993_v12 = vmul.f32 %v3982_v5, %v3959_v8 }
0x2195   :  { %v3972_v10 = vadd.f32 1e-05, %v3970_v6  ;;  %v4162_v62 = vpop.permute.xlu1 %4161 }
0x2196   :  { %v3996_v34 = vmul.f32 %v5293_v30, %v3993_v12  ;;  %5131 = vmatpush.xpose.msk.msrb.mxu2 %vm151_vm5, %v4162_v62 }
0x2197   :  { %5496 = vrsqrt.f32 %v3972_v10  ;;  %vm3989_vm2 = vweird.f32 %v3972_v10 }
0x2198   :  { %v6528_v40 = vadd.f32 %v5294_v9, %v3996_v34 }
0x219a   :  { %5121 = vmatmul.msk.f32.vlgmr.msra.gmra.mxu3 %vm105_vm4, %v6528_v40 }
0x219d   :  { %v5497_v16 = vpop.eup %5496  ;;  %v4136_v3 = vpop.permute.xlu1 %4135 }
0x219e   :  { %v3984_v17 = vmul.f32 %v5497_v16, %v3972_v10  ;;  %vm3990_vm1 = vweird.f32 %v5497_v16 }
0x219f   :  { %vm3991_vm3 = vmor %vm3989_vm2, %vm3990_vm1  ;;  %vm4846_vm1 = vcmask 80896  }
0x21a0   :  { %v3985_v11 = vmul.f32 %v5497_v16, %v3984_v17 }
0x21a2   :  { %v3986_v1 = vmul.f32 0.5, %v3985_v11 }
0x21a4   :  { %v3987_v15 = vsub.f32 1.5, %v3986_v1 }
0x21a5   :  { %v4084_v24 = vpop.permute.xlu0 %4083 }
0x21a6   :  { %v3988_v55 = vmul.f32 %v5497_v16, %v3987_v15  ;;  %5125 = vmatpush.xpose.msk.msrb.mxu1 %vm151_vm5, %v4084_v24 }
0x21a8   :  { %v3992_v23 = vsel %vm3991_vm3, %v5497_v16, %v3988_v55 }
0x21a9   :  { %v3994_v19 = vmul.f32 %v3992_v23, %v3960_v26  ;;  %v5252_v23 = vpack.i.bf16 %v6262_v63, %v6123_v21 }
0x21aa   :  { %5129 = vmatpush.xpose.msk.msra.mxu1 %vm151_vm5, %v4136_v3  ;;  %v5247_v3 = vpack.i.bf16 %v6217_v29, %v6172_v49 }
0x21ab   :  { %v3997_v22 = vmul.f32 %v5293_v30, %v3994_v19 }
0x21ad   :  { %v6534_v28 = vadd.f32 %v5294_v9, %v3997_v22 }
0x21af   :  { %5122 = vmatmul.msk.f32.gmra.mxu3 %vm105_vm4, %v6534_v28 }
0x221d   :  { %v4037_v37 = vpop.f32.mrf.mxu3 }
0x221e   :  { %v4038_v18 = vadd.f32 %v5295_v0, %v4037_v37 }
0x2220   :  { %4045 = vrot.lane.b32.xlu1 %v4038_v18, %s5604_s25  ;;  %4049 = vrot.lane.b32.xlu0 %v4038_v18, %s5605_s26 }
0x2221   :  { %5124 = vmatmul.msk.f32.vlgmr.msrb.gmra.mxu0 %vm151_vm5, %v4038_v18 }
0x2228   :  { %4053 = vrot.lane.b32.xlu1 %v4038_v18, %s5603_s0  ;;  %4187 = vrot.lane.b32.xlu0 %v6223_v57, %s5607_s28 }
0x2230   :  { %4213 = vrot.lane.b32.xlu0 %v6241_v38, %s5607_s28 }
0x2232   :  { %v4040_v43 = vpop.f32.mrf.mxu3 }
0x2233   :  { %v4041_v61 = vadd.f32 %v5295_v0, %v4040_v43 }
0x2235   :  { %4051 = vrot.lane.b32.xlu2 %v4041_v61, %s5605_s26  ;;  %5126 = vmatmul.msk.f32.vlgmr.msrb.gmra.mxu1 %vm151_vm5, %v4041_v61 }
0x2238   :  { %4239 = vrot.lane.b32.xlu0 %v6250_v42, %s5607_s28 }
0x223d   :  { %4047 = vrot.lane.b32.xlu2 %v4041_v61, %s5604_s25 }
0x2245   :  { %4055 = vrot.lane.b32.xlu2 %v4041_v61, %s5603_s0 }
0x228f   :  { %v4052_v47 = vpop.permute.xlu2 %4051 }
0x2292   :  { %v4046_v45 = vpop.permute.xlu1 %4045  ;;  %v4050_v31 = vpop.permute.xlu0 %4049 }
0x2293   :  { %5128 = vmatmul.msk.f32.vlgmr.msra.gmra.mxu0 %vm151_vm5, %v4046_v45  ;;  %5132 = vmatmul.msk.f32.vlgmr.msrb.gmra.mxu2 %vm151_vm5, %v4050_v31 }
0x2297   :  { %v4048_v41 = vpop.permute.xlu2 %4047 }
0x2298   :  { %5130 = vmatmul.msk.f32.vlgmr.msra.gmra.mxu1 %vm151_vm5, %v4048_v41 }
0x229a   :  { %v4188_v8 = vpop.permute.xlu0 %4187  ;;  %v4054_v26 = vpop.permute.xlu1 %4053 }
0x229b   :  { %5133 = vmatpush.xpose.msk.msrb.mxu3 %vm151_vm5, %v4188_v8 }
0x229e   :  { %v4080_v33 = vpop.f32.mrf.mxu0  ;;  %5134 = vmatmul.msk.f32.vlgmr.msrb.gmra.mxu3 %vm151_vm5, %v4052_v47 }
0x229f   :  { %v4265_v32 = vmul.f32 0.35355338, %v4080_v33  ;;  %v4056_v44 = vpop.permute.xlu2 %4055 }
0x22a1   :  { %v4273_v46 = vsel %vm151_vm5, %v4265_v32, -inf }
0x22a2   :  { %4274 = vmax.xlane.f32.xlu1 %v4273_v46  ;;  %v4214_v25 = vpop.permute.xlu0 %4213 }
0x22a3   :  { %5135 = vmatpush.xpose.msk.msrb.mxu0 %vm151_vm5, %v4214_v25 }
0x22a6   :  { %5136 = vmatmul.msk.f32.vlgmr.msrb.gmra.mxu0 %vm151_vm5, %v4054_v26 }
0x22aa   :  { %v4240_v7 = vpop.permute.xlu0 %4239 }
0x22ab   :  { %5137 = vmatpush.xpose.msk.msrb.mxu1 %vm151_vm5, %v4240_v7 }
0x22ae   :  { %5138 = vmatmul.msk.f32.vlgmr.msrb.gmra.mxu1 %vm151_vm5, %v4056_v44 }
0x22b2   :  { %v4106_v50 = vpop.f32.mrf.mxu1 }
0x22b3   :  { %v4266_v51 = vmul.f32 0.35355338, %v4106_v50 }
0x22b5   :  { %v4276_v52 = vsel %vm151_vm5, %v4266_v51, -inf }
0x22b6   :  { %4277 = vmax.xlane.f32.xlu2 %v4276_v52 }
0x2310   :  { %v4132_v54 = vpop.f32.mrf.mxu0 }
0x2311   :  { %v4267_v53 = vmul.f32 0.35355338, %v4132_v54 }
0x2313   :  { %v4279_v35 = vsel %vm151_vm5, %v4267_v53, -inf }
0x2314   :  { %4280 = vmax.xlane.f32.xlu0 %v4279_v35 }
0x2315   :  { %v4158_v14 = vpop.f32.mrf.mxu1  ;;  %v4275_v59 = vpop.xlane.xlu1 %4274 }
0x2316   :  { %v4268_v39 = vmul.f32 0.35355338, %v4158_v14  ;;  %v4184_v20 = vpop.f32.mrf.mxu2  ;;  %v4297_v36 = vsub.f32 %v4265_v32, %v4275_v59  ;;  %v5257_v14 = vpack.i.bf16 %v6241_v38, %v6227_v58 }
0x2317   :  { %v4269_v48 = vmul.f32 0.35355338, %v4184_v20 }
0x2318   :  { %v4282_v56 = vsel %vm151_vm5, %v4268_v39, -inf  ;;  %v4305_v60 = vmul.f32 1.442695, %v4297_v36 }
0x2319   :  { %4283 = vmax.xlane.f32.xlu2 %v4282_v56  ;;  %v4285_v27 = vsel %vm151_vm5, %v4269_v48, -inf }
0x231a   :  { %4286 = vmax.xlane.f32.xlu1 %v4285_v27  ;;  %5498 = vpow2.f32 %v4305_v60 }
0x2320   :  { %v6568_v34 = vpop.eup %5498 }
0x2321   :  { %v4210_v30 = vpop.f32.mrf.mxu3  ;;  %v4321_v15 = vsel %vm151_vm5, %v6568_v34, 0.0 }
0x2322   :  { %v4270_v2 = vmul.f32 0.35355338, %v4210_v30 }
0x2323   :  { %v4236_v5 = vpop.f32.mrf.mxu0 }
0x2324   :  { %v4271_v6 = vmul.f32 0.35355338, %v4236_v5  ;;  %v4288_v9 = vsel %vm151_vm5, %v4270_v2, -inf }
0x2325   :  { %4289 = vmax.xlane.f32.xlu1 %v4288_v9 }
0x2326   :  { %v4291_v12 = vsel %vm151_vm5, %v4271_v6, -inf }
0x2327   :  { %4292 = vmax.xlane.f32.xlu0 %v4291_v12 }
0x2329   :  { %v4278_v10 = vpop.xlane.xlu2 %4277 }
0x232a   :  { %v4298_v62 = vsub.f32 %v4266_v51, %v4278_v10 }
0x232b   :  { %v4262_v16 = vpop.f32.mrf.mxu1 }
0x232c   :  { %v4307_v17 = vmul.f32 1.442695, %v4298_v62  ;;  %v4272_v11 = vmul.f32 0.35355338, %v4262_v16 }
0x232e   :  { %5500 = vpow2.f32 %v4307_v17  ;;  %v4294_v1 = vsel %vm151_vm5, %v4272_v11, -inf }
0x232f   :  { %4295 = vmax.xlane.f32.xlu2 %v4294_v1  ;;  %4322 = vadd.xlane.f32.xlu0 %v4321_v15 }
0x2334   :  { %v6573_v24 = vpop.eup %5500 }
0x2335   :  { %v4324_v55 = vsel %vm151_vm5, %v6573_v24, 0.0 }
0x2337   :  { %4325 = vadd.xlane.f32.xlu2 %v4324_v55 }
0x233e   :  { %5248 = vrot.lane.b32.xlu1 %v5247_v3, %s5611_s1 }
0x2343   :  { %5253 = vrot.lane.b32.xlu0 %v5252_v23, %s5611_s1 }
0x2387   :  { %v4281_v19 = vpop.xlane.xlu0 %4280 }
0x2388   :  { %v4299_v22 = vsub.f32 %v4267_v53, %v4281_v19 }
0x238a   :  { %v4309_v0 = vmul.f32 1.442695, %v4299_v22 }
0x238c   :  { %5502 = vpow2.f32 %v4309_v0  ;;  %v4284_v37 = vpop.xlane.xlu2 %4283 }
0x238d   :  { %v4300_v18 = vsub.f32 %v4268_v39, %v4284_v37  ;;  %v4287_v43 = vpop.xlane.xlu1 %4286 }
0x238e   :  { %v4301_v61 = vsub.f32 %v4269_v48, %v4287_v43 }
0x238f   :  { %v4311_v47 = vmul.f32 1.442695, %v4300_v18 }
0x2390   :  { %v4313_v45 = vmul.f32 1.442695, %v4301_v61 }
0x2391   :  { %5504 = vpow2.f32 %v4311_v47 }
0x2392   :  { %v5503_v49 = vpop.eup %5502  ;;  %5506 = vpow2.f32 %v4313_v45 }
0x2393   :  { %v4327_v29 = vsel %vm151_vm5, %v5503_v49, 0.0 }
0x2394   :  { %4328 = vadd.xlane.f32.xlu1 %v4327_v29 }
0x2397   :  { %v6584_v31 = vpop.eup %5504 }
0x2398   :  { %v5507_v21 = vpop.eup %5506  ;;  %v4290_v63 = vpop.xlane.xlu1 %4289  ;;  %v4330_v41 = vsel %vm151_vm5, %v6584_v31, 0.0 }
0x2399   :  { %v4302_v8 = vsub.f32 %v4270_v2, %v4290_v63  ;;  %4331 = vadd.xlane.f32.xlu2 %v4330_v41  ;;  %v4333_v33 = vsel %vm151_vm5, %v5507_v21, 0.0  ;;  %v4009_v41 = vld [vmem:[#allocation2 + $0x3a0] sm:$0xff] }
0x239a   :  { %4334 = vadd.xlane.f32.xlu0 %v4333_v33  ;;  %v4293_v32 = vpop.xlane.xlu0 %4292  ;;  %v4007_v33 = vld [vmem:[#allocation2 + $0x390] sm:$0xff] }
0x239b   :  { %v4315_v46 = vmul.f32 1.442695, %v4302_v8  ;;  %v4303_v25 = vsub.f32 %v4271_v6, %v4293_v32  ;;  %v4008_v8 = vld [vmem:[#allocation2 + $0x398] sm:$0xff]  ;;  %v4006_v32 = vld [vmem:[#allocation2 + $0x388] sm:$0xff] }
0x239d   :  { %5508 = vpow2.f32 %v4315_v46  ;;  %v4317_v26 = vmul.f32 1.442695, %v4303_v25 }
0x239f   :  { %5510 = vpow2.f32 %v4317_v26 }
0x23a2   :  { %v4296_v7 = vpop.xlane.xlu2 %4295  ;;  %v4323_v53 = vpop.xlane.xlu0 %4322 }
0x23a3   :  { %v6589_v44 = vpop.eup %5508  ;;  %v4304_v50 = vsub.f32 %v4272_v11, %v4296_v7 }
0x23a4   :  { %v4336_v51 = vsel %vm151_vm5, %v6589_v44, 0.0 }
0x23a5   :  { %v5511_v52 = vpop.eup %5510  ;;  %v4319_v54 = vmul.f32 1.442695, %v4304_v50  ;;  %4337 = vadd.xlane.f32.xlu2 %v4336_v51 }
0x23a6   :  { %v4339_v35 = vsel %vm151_vm5, %v5511_v52, 0.0 }
0x23a7   :  { %5512 = vpow2.f32 %v4319_v54  ;;  %4340 = vadd.xlane.f32.xlu0 %v4339_v35 }
0x23a8   :  { %5514 = vrcp.f32 %v4323_v53 }
0x23aa   :  { %v4326_v39 = vpop.xlane.xlu2 %4325 }
0x23ab   :  { %5516 = vrcp.f32 %v4326_v39  ;;  %v5296_v39 = vld [vmem:[#allocation2 + $0x3a8] ss:$0 sm:$0xff] }
0x23ad   :  { %v5513_v20 = vpop.eup %5512  ;;  %5258 = vrot.lane.b32.xlu1 %v5257_v14, %s5611_s1 }
0x23ae   :  { %v4342_v48 = vsel %vm151_vm5, %v5513_v20, 0.0  ;;  %v5515_v56 = vpop.eup %5514 }
0x23af   :  { %4343 = vadd.xlane.f32.xlu2 %v4342_v48  ;;  %v4353_v60 = vmul.f32 %v5515_v56, %v6568_v34 }
0x23b0   :  { %v5249_v27 = vpop.permute.xlu1 %5248 }
0x23b1   :  { %v5251_v59 = vunpack.i.h.bf16 %v5249_v27  ;;  %v5250_v36 = vunpack.i.l.bf16 %v5249_v27  ;;  %v5517_v30 = vpop.eup %5516 }
0x23b2   :  { %v4354_v5 = vmul.f32 %v5517_v30, %v6573_v24 }
0x23b3   :  { %4382 = vmatpush.msra.mxu2 %v5250_v36  ;;  %4434 = vmatpush.msra.mxu0 %v5251_v59 }
0x23b4   :  { %5139 = vmatmul.msk.f32.vlgmr.msra.gmra.mxu2 %vm151_vm5, %v4353_v60 }
0x23b5   :  { %v5254_v58 = vpop.permute.xlu0 %5253 }
0x23b6   :  { %v5256_v38 = vunpack.i.h.bf16 %v5254_v58  ;;  %v5255_v2 = vunpack.i.l.bf16 %v5254_v58 }
0x23b8   :  { %4408 = vmatpush.msra.mxu3 %v5255_v2  ;;  %4486 = vmatpush.msrb.mxu2 %v5256_v38 }
0x23b9   :  { %5140 = vmatmul.msk.f32.vlgmr.msra.gmra.mxu3 %vm151_vm5, %v4354_v5 }
0x23ba   :  { %4618 = vmatpush.msra.mxu2 %v4009_v41 }
0x23bb   :  { %4543 = vrot.lane.b32.xlu0 %v6250_v42, %s5611_s1 }
0x23bc   :  { %4619 = vmatpush.msra.mxu2 %v4008_v8 }
0x23be   :  { %4620 = vmatpush.msra.mxu2 %v4007_v33 }
0x23c0   :  { %4621 = vmatpush.msra.mxu2 %v4006_v32 }
0x23c7   :  { %4491 = vrot.lane.b32.xlu2 %v6223_v57, %s5611_s1 }
0x2407   :  { %v4329_v6 = vpop.xlane.xlu1 %4328 }
0x2408   :  { %5518 = vrcp.f32 %v4329_v6 }
0x240c   :  { %v4332_v62 = vpop.xlane.xlu2 %4331 }
0x240d   :  { %v4335_v9 = vpop.xlane.xlu0 %4334 }
0x240e   :  { %v5519_v12 = vpop.eup %5518  ;;  %5520 = vrcp.f32 %v4335_v9 }
0x240f   :  { %v4355_v10 = vmul.f32 %v5519_v12, %v5503_v49  ;;  %5522 = vrcp.f32 %v4332_v62 }
0x2411   :  { %5141 = vmatmul.msk.f32.vlgmr.msra.gmra.mxu0 %vm151_vm5, %v4355_v10 }
0x2414   :  { %v5521_v34 = vpop.eup %5520 }
0x2415   :  { %v4357_v16 = vmul.f32 %v5521_v34, %v5507_v21  ;;  %v5523_v42 = vpop.eup %5522  ;;  %v4683_v34 = vld [vmem:[#allocation2 + $0x3d0] sm:$0xff] }
0x2416   :  { %v4356_v55 = vmul.f32 %v5523_v42, %v6584_v31 }
0x2417   :  { %5143 = vmatmul.msk.f32.vlgmr.msrb.gmra.mxu2 %vm151_vm5, %v4357_v16  ;;  %v4682_v16 = vld [vmem:[#allocation2 + $0x3c8] sm:$0xff] }
0x2418   :  { %v4338_v17 = vpop.xlane.xlu2 %4337 }
0x241a   :  { %v4341_v11 = vpop.xlane.xlu0 %4340 }
0x241b   :  { %5524 = vrcp.f32 %v4341_v11 }
0x241c   :  { %5526 = vrcp.f32 %v4338_v17  ;;  %v4681_v17 = vld [vmem:[#allocation2 + $0x3c0] sm:$0xff] }
0x241f   :  { %v5259_v1 = vpop.permute.xlu1 %5258 }
0x2420   :  { %v5261_v57 = vunpack.i.h.bf16 %v5259_v1  ;;  %v5260_v15 = vunpack.i.l.bf16 %v5259_v1 }
0x2421   :  { %v5525_v24 = vpop.eup %5524 }
0x2422   :  { %v4359_v3 = vmul.f32 %v5525_v24, %v5511_v52  ;;  %v4344_v23 = vpop.xlane.xlu2 %4343  ;;  %4460 = vmatpush.msra.mxu1 %v5260_v15  ;;  %4538 = vmatpush.msrb.mxu0 %v5261_v57  ;;  %v5527_v19 = vpop.eup %5526  ;;  %v4693_v24 = vld [vmem:[#allocation2 + $0x420] sm:$0xff] }
0x2423   :  { %5142 = vmatmul.msk.f32.vlgmr.msra.gmra.mxu1 %vm151_vm5, %v4356_v55  ;;  %5528 = vrcp.f32 %v4344_v23  ;;  %v4358_v0 = vmul.f32 %v5527_v19, %v6589_v44  ;;  %v4692_v55 = vld [vmem:[#allocation2 + $0x418] sm:$0xff]  ;;  %v4691_v23 = vld [vmem:[#allocation2 + $0x410] sm:$0xff] }
0x2424   :  { %5145 = vmatmul.msk.f32.vlgmr.msrb.gmra.mxu0 %vm151_vm5, %v4359_v3 }
0x2425   :  { %4744 = vmatpush.msra.mxu0 %v4693_v24 }
0x2427   :  { %4745 = vmatpush.msra.mxu0 %v4692_v55 }
0x2429   :  { %v5529_v22 = vpop.eup %5528  ;;  %4746 = vmatpush.msra.mxu0 %v4691_v23 }
0x242a   :  { %v4492_v37 = vpop.permute.xlu2 %4491  ;;  %v4360_v18 = vmul.f32 %v5529_v22, %v5513_v20 }
0x242b   :  { %4512 = vmatpush.msrb.mxu3 %v4492_v37  ;;  %v4690_v37 = vld [vmem:[#allocation2 + $0x408] sm:$0xff] }
0x242c   :  { %5144 = vmatmul.msk.f32.vlgmr.msrb.gmra.mxu3 %vm151_vm5, %v4358_v0  ;;  %4747 = vmatpush.msra.mxu0 %v4690_v37 }
0x242d   :  { %v4544_v43 = vpop.permute.xlu0 %4543 }
0x242e   :  { %4564 = vmatpush.msrb.mxu1 %v4544_v43 }
0x242f   :  { %5146 = vmatmul.msk.f32.vlgmr.msrb.gmra.mxu1 %vm151_vm5, %v4360_v18 }
0x2437   :  { %v4384_v47 = vpop.f32.mrf.mxu2 }
0x243c   :  { %v4410_v31 = vpop.f32.mrf.mxu3 }
0x248e   :  { %v4436_v61 = vpop.f32.mrf.mxu0 }
0x248f   :  { %4571 = vrot.lane.b32.xlu1 %v4436_v61, %s5600_s21  ;;  %v4689_v61 = vld [vmem:[#allocation2 + $0x400] sm:$0xff] }
0x2490   :  { %4748 = vmatpush.msra.mxu0 %v4689_v61 }
0x249a   :  { %v4488_v45 = vpop.f32.mrf.mxu2 }
0x249b   :  { %4579 = vrot.lane.b32.xlu0 %v4488_v45, %s5609_s30  ;;  %v5297_v45 = vld [vmem:[#allocation2 + $0x3b0] ss:$0 sm:$0xff] }
0x24a0   :  { %v4462_v29 = vpop.f32.mrf.mxu1 }
0x24a1   :  { %v4540_v49 = vpop.f32.mrf.mxu0 }
0x24a2   :  { %4587 = vrot.lane.b32.xlu1 %v4540_v49, %s5608_s29 }
0x24a3   :  { %4573 = vrot.lane.b32.xlu0 %v4462_v29, %s5600_s21  ;;  %v5298_v29 = vld [vmem:[#allocation2 + $0x3b8] ss:$0 sm:$0xff] }
0x24ac   :  { %v4566_v21 = vpop.f32.mrf.mxu1 }
0x24ad   :  { %4589 = vrot.lane.b32.xlu2 %v4566_v21, %s5608_s29 }
0x24af   :  { %v4514_v63 = vpop.f32.mrf.mxu3 }
0x24b0   :  { %4581 = vrot.lane.b32.xlu1 %v4514_v63, %s5609_s30 }
0x2501   :  { %v4572_v46 = vpop.permute.xlu1 %4571 }
0x2502   :  { %v4593_v26 = vsel %vm151_vm5, %v4384_v47, %v4572_v46 }
0x2507   :  { %v4590_v53 = vpop.permute.xlu2 %4589 }
0x250d   :  { %v4580_v25 = vpop.permute.xlu0 %4579 }
0x250e   :  { %v4595_v7 = vsel %vm688_vm6, %v4593_v26, %v4580_v25 }
0x2514   :  { %v4588_v44 = vpop.permute.xlu1 %4587 }
0x2515   :  { %v4597_v50 = vsel %vm691_vm7, %v4595_v7, %v4588_v44  ;;  %v4574_v51 = vpop.permute.xlu0 %4573 }
0x2516   :  { %5147 = vmatmul.msk.f32.vlgmr.msra.gmra.mxu2 %vm105_vm4, %v4597_v50  ;;  %v4594_v52 = vsel %vm151_vm5, %v4410_v31, %v4574_v51  ;;  %v4688_v51 = vld [vmem:[#allocation2 + $0x3f8] sm:$0xff] }
0x2517   :  { %4749 = vmatpush.msra.mxu0 %v4688_v51 }
0x2522   :  { %v4582_v54 = vpop.permute.xlu1 %4581 }
0x2523   :  { %v4596_v35 = vsel %vm688_vm6, %v4594_v52, %v4582_v54  ;;  %v4687_v52 = vld [vmem:[#allocation2 + $0x3f0] sm:$0xff]  ;;  %v4686_v54 = vld [vmem:[#allocation2 + $0x3e8] sm:$0xff] }
0x2524   :  { %v4598_v14 = vsel %vm691_vm7, %v4596_v35, %v4590_v53  ;;  %4750 = vmatpush.msra.mxu0 %v4687_v52  ;;  %v5299_v53 = vld [vmem:[#allocation2 + $0x3e0] ss:$0 sm:$0xff] }
0x2525   :  { %5148 = vmatmul.msk.f32.gmra.mxu2 %vm105_vm4, %v4598_v14 }
0x2526   :  { %4751 = vmatpush.msra.mxu0 %v4686_v54 }
0x2599   :  { %v4623_v20 = vpop.f32.mrf.mxu2 }
0x259a   :  { %v4624_v48 = vadd.f32 %v5296_v39, %v4623_v20 }
0x259c   :  { %v4629_v56 = vadd.f32 %v4624_v48, %v6528_v40 }
0x259e   :  { %v4631_v27 = vsel %vm105_vm4, %v4629_v56, 0.0 }
0x259f   :  { %4632 = vadd.xlane.f32.xlu0 %v4631_v27  ;;  %v5300_v27 = vld [vmem:[#allocation2 + $0x428] ss:$0 sm:$0xff] }
0x25a8   :  { %v4626_v59 = vpop.f32.mrf.mxu2 }
0x25a9   :  { %v4627_v36 = vadd.f32 %v5296_v39, %v4626_v59 }
0x25ab   :  { %v4630_v60 = vadd.f32 %v4627_v36, %v6534_v28  ;;  %v4684_v28 = vld [vmem:[#allocation2 + $0x3d8] sm:$0xff] }
0x25ac   :  { %4716 = vmatpush.msra.mxu3 %v4684_v28 }
0x25ad   :  { %v4634_v30 = vsel %vm105_vm4, %v4630_v60, 0.0 }
0x25ae   :  { %4635 = vadd.xlane.f32.xlu1 %v4634_v30  ;;  %4717 = vmatpush.msra.mxu3 %v4683_v34 }
0x25b0   :  { %4718 = vmatpush.msra.mxu3 %v4682_v16 }
0x25b2   :  { %4719 = vmatpush.msra.mxu3 %v4681_v17 }
0x2612   :  { %v4633_v58 = vpop.xlane.xlu0 %4632 }
0x2613   :  { %v4637_v38 = vmul.f32 %v4633_v58, %v5816_v4 }
0x2615   :  { %v4639_v2 = vsub.f32 %v4629_v56, %v4637_v38 }
0x2617   :  { %v4641_v5 = vmul.f32 %v4639_v2, %v4639_v2 }
0x2619   :  { %v4643_v6 = vsel %vm105_vm4, %v4641_v5, 0.0 }
0x261a   :  { %4644 = vadd.xlane.f32.xlu2 %v4643_v6 }
0x2621   :  { %v4636_v9 = vpop.xlane.xlu1 %4635 }
0x2622   :  { %v4638_v40 = vmul.f32 %v4636_v9, %v5816_v4 }
0x2624   :  { %v4640_v12 = vsub.f32 %v4630_v60, %v4638_v40 }
0x2626   :  { %v4642_v10 = vmul.f32 %v4640_v12, %v4640_v12 }
0x2628   :  { %v4646_v62 = vsel %vm105_vm4, %v4642_v10, 0.0 }
0x2629   :  { %4647 = vadd.xlane.f32.xlu0 %v4646_v62 }
0x268d   :  { %v4645_v11 = vpop.xlane.xlu2 %4644 }
0x268e   :  { %v4649_v42 = vmul.f32 %v4645_v11, %v5816_v4  ;;  %v4814_v11 = vld [vmem:[#allocation2 + $0x480] sm:$0xff] }
0x268f   :  { %4835 = vmatpush.msra.mxu1 %v4814_v11 }
0x2690   :  { %v4651_v1 = vadd.f32 1e-05, %v4649_v42  ;;  %v4813_v42 = vld [vmem:[#allocation2 + $0x478] sm:$0xff] }
0x2691   :  { %4836 = vmatpush.msra.mxu1 %v4813_v42 }
0x2692   :  { %5530 = vrsqrt.f32 %v4651_v1  ;;  %vm4659_vm6 = vweird.f32 %v4651_v1 }
0x2698   :  { %v5531_v57 = vpop.eup %5530 }
0x2699   :  { %v4654_v15 = vmul.f32 %v5531_v57, %v4651_v1  ;;  %vm4660_vm5 = vweird.f32 %v5531_v57  ;;  %v4812_v1 = vld [vmem:[#allocation2 + $0x470] sm:$0xff] }
0x269a   :  { %vm4661_vm7 = vmor %vm4659_vm6, %vm4660_vm5  ;;  %4837 = vmatpush.msra.mxu1 %v4812_v1 }
0x269b   :  { %v4655_v3 = vmul.f32 %v5531_v57, %v4654_v15 }
0x269c   :  { %v4648_v19 = vpop.xlane.xlu0 %4647 }
0x269d   :  { %v4656_v22 = vmul.f32 0.5, %v4655_v3  ;;  %v4650_v0 = vmul.f32 %v4648_v19, %v5816_v4 }
0x269f   :  { %v4657_v18 = vsub.f32 1.5, %v4656_v22  ;;  %v4652_v43 = vadd.f32 1e-05, %v4650_v0 }
0x26a1   :  { %v4658_v47 = vmul.f32 %v5531_v57, %v4657_v18  ;;  %5532 = vrsqrt.f32 %v4652_v43  ;;  %vm4669_vm9 = vweird.f32 %v4652_v43 }
0x26a3   :  { %v4662_v49 = vsel %vm4661_vm7, %v5531_v57, %v4658_v47  ;;  %v4811_v57 = vld [vmem:[#allocation2 + $0x468] sm:$0xff]  ;;  %v5301_v47 = vld [vmem:[#allocation2 + $0x430] ss:$0 sm:$0xff] }
0x26a4   :  { %v4673_v31 = vmul.f32 %v4662_v49, %v4639_v2  ;;  %4838 = vmatpush.msra.mxu1 %v4811_v57  ;;  %v5302_v49 = vld [vmem:[#allocation2 + $0x438] ss:$0 sm:$0xff] }
0x26a6   :  { %v4676_v21 = vmul.f32 %v5297_v45, %v4673_v31 }
0x26a7   :  { %v5533_v63 = vpop.eup %5532 }
0x26a8   :  { %v4679_v41 = vadd.f32 %v5298_v29, %v4676_v21  ;;  %v4664_v8 = vmul.f32 %v5533_v63, %v4652_v43  ;;  %vm4670_vm8 = vweird.f32 %v5533_v63 }
0x26a9   :  { %vm4671_vm10 = vmor %vm4669_vm9, %vm4670_vm8 }
0x26aa   :  { %v4665_v33 = vmul.f32 %v5533_v63, %v4664_v8  ;;  %5149 = vmatmul.msk.f32.vlgmr.msra.gmra.mxu3 %vm105_vm4, %v4679_v41 }
0x26ac   :  { %v4666_v32 = vmul.f32 0.5, %v4665_v33 }
0x26ae   :  { %v4667_v46 = vsub.f32 1.5, %v4666_v32 }
0x26b0   :  { %v4668_v25 = vmul.f32 %v5533_v63, %v4667_v46 }
0x26b2   :  { %v4672_v26 = vsel %vm4671_vm10, %v5533_v63, %v4668_v25 }
0x26b3   :  { %v4674_v7 = vmul.f32 %v4672_v26, %v4640_v12 }
0x26b5   :  { %v4677_v44 = vmul.f32 %v5297_v45, %v4674_v7 }
0x26b7   :  { %v4680_v50 = vadd.f32 %v5298_v29, %v4677_v44  ;;  %v5303_v44 = vld [vmem:[#allocation2 + $0x488] ss:$0 sm:$0xff] }
0x26b9   :  { %5150 = vmatmul.msk.f32.gmra.mxu3 %vm105_vm4, %v4680_v50 }
0x272d   :  { %v4721_v35 = vpop.f32.mrf.mxu3 }
0x272e   :  { %v4722_v14 = vadd.f32 %v5299_v53, %v4721_v35 }
0x2730   :  { %v4727_v39 = vmax.f32 %v4722_v14, 0.0 }
0x2732   :  { %5151 = vmatmul.msk.f32.vlgmr.msra.gmra.mxu0 %vm832_vm15, %v4727_v39 }
0x273c   :  { %v4724_v20 = vpop.f32.mrf.mxu3 }
0x273d   :  { %v4725_v48 = vadd.f32 %v5299_v53, %v4724_v20 }
0x273f   :  { %v4728_v56 = vmax.f32 %v4725_v48, 0.0 }
0x2741   :  { %5152 = vmatmul.msk.f32.gmra.mxu0 %vm832_vm15, %v4728_v56 }
0x27af   :  { %v4753_v59 = vpop.f32.mrf.mxu0 }
0x27b0   :  { %v4754_v36 = vadd.f32 %v5300_v27, %v4753_v59 }
0x27b2   :  { %v4759_v60 = vadd.f32 %v4754_v36, %v4679_v41 }
0x27b4   :  { %v4761_v30 = vsel %vm105_vm4, %v4759_v60, 0.0 }
0x27b5   :  { %4762 = vadd.xlane.f32.xlu1 %v4761_v30 }
0x27be   :  { %v4756_v58 = vpop.f32.mrf.mxu0 }
0x27bf   :  { %v4757_v38 = vadd.f32 %v5300_v27, %v4756_v58 }
0x27c1   :  { %v4760_v2 = vadd.f32 %v4757_v38, %v4680_v50 }
0x27c3   :  { %v4764_v5 = vsel %vm105_vm4, %v4760_v2, 0.0 }
0x27c4   :  { %4765 = vadd.xlane.f32.xlu2 %v4764_v5 }
0x2828   :  { %v4763_v6 = vpop.xlane.xlu1 %4762 }
0x2829   :  { %v4767_v9 = vmul.f32 %v4763_v6, %v5816_v4 }
0x282b   :  { %v4769_v40 = vsub.f32 %v4759_v60, %v4767_v9 }
0x282d   :  { %v4771_v12 = vmul.f32 %v4769_v40, %v4769_v40 }
0x282f   :  { %v4773_v10 = vsel %vm105_vm4, %v4771_v12, 0.0 }
0x2830   :  { %4774 = vadd.xlane.f32.xlu0 %v4773_v10 }
0x2837   :  { %v4766_v62 = vpop.xlane.xlu2 %4765 }
0x2838   :  { %v4768_v28 = vmul.f32 %v4766_v62, %v5816_v4 }
0x283a   :  { %v4770_v34 = vsub.f32 %v4760_v2, %v4768_v28 }
0x283c   :  { %v4772_v16 = vmul.f32 %v4770_v34, %v4770_v34 }
0x283e   :  { %v4776_v17 = vsel %vm105_vm4, %v4772_v16, 0.0 }
0x283f   :  { %4777 = vadd.xlane.f32.xlu1 %v4776_v17 }
0x28a3   :  { %v4775_v15 = vpop.xlane.xlu0 %4774 }
0x28a4   :  { %v4779_v24 = vmul.f32 %v4775_v15, %v5816_v4 }
0x28a6   :  { %v4781_v55 = vadd.f32 1e-05, %v4779_v24 }
0x28a8   :  { %5534 = vrsqrt.f32 %v4781_v55  ;;  %vm4789_vm11 = vweird.f32 %v4781_v55 }
0x28ae   :  { %v5535_v3 = vpop.eup %5534 }
0x28af   :  { %v4784_v23 = vmul.f32 %v5535_v3, %v4781_v55  ;;  %vm4790_vm15 = vweird.f32 %v5535_v3 }
0x28b0   :  { %vm4791_vm12 = vmor %vm4789_vm11, %vm4790_vm15 }
0x28b1   :  { %v4785_v19 = vmul.f32 %v5535_v3, %v4784_v23 }
0x28b2   :  { %v4778_v22 = vpop.xlane.xlu1 %4777 }
0x28b3   :  { %v4786_v0 = vmul.f32 0.5, %v4785_v19  ;;  %v4780_v37 = vmul.f32 %v4778_v22, %v5816_v4 }
0x28b5   :  { %v4787_v18 = vsub.f32 1.5, %v4786_v0  ;;  %v4782_v43 = vadd.f32 1e-05, %v4780_v37 }
0x28b7   :  { %v4788_v61 = vmul.f32 %v5535_v3, %v4787_v18  ;;  %5536 = vrsqrt.f32 %v4782_v43  ;;  %vm4799_vm13 = vweird.f32 %v4782_v43 }
0x28b9   :  { %v4792_v45 = vsel %vm4791_vm12, %v5535_v3, %v4788_v61 }
0x28ba   :  { %v4803_v29 = vmul.f32 %v4792_v45, %v4769_v40 }
0x28bc   :  { %v4806_v31 = vmul.f32 %v5301_v47, %v4803_v29 }
0x28bd   :  { %v5537_v21 = vpop.eup %5536 }
0x28be   :  { %v4809_v63 = vadd.f32 %v5302_v49, %v4806_v31  ;;  %v4794_v41 = vmul.f32 %v5537_v21, %v4782_v43  ;;  %vm4800_vm0 = vweird.f32 %v5537_v21 }
0x28bf   :  { %vm4801_vm14 = vmor %vm4799_vm13, %vm4800_vm0  ;;  %vm4931_vm0 = vcmask 7168  }
0x28c0   :  { %v4795_v8 = vmul.f32 %v5537_v21, %v4794_v41  ;;  %5153 = vmatmul.msk.f32.vlgmr.msra.gmra.mxu1 %vm105_vm4, %v4809_v63 }
0x28c2   :  { %v4796_v33 = vmul.f32 0.5, %v4795_v8 }
0x28c4   :  { %v4797_v4 = vsub.f32 1.5, %v4796_v33 }
0x28c6   :  { %v4798_v32 = vmul.f32 %v5537_v21, %v4797_v4 }
0x28c8   :  { %v4802_v46 = vsel %vm4801_vm14, %v5537_v21, %v4798_v32 }
0x28c9   :  { %v4804_v25 = vmul.f32 %v4802_v46, %v4770_v34 }
0x28cb   :  { %v4807_v26 = vmul.f32 %v5301_v47, %v4804_v25 }
0x28cd   :  { %v4810_v7 = vadd.f32 %v5302_v49, %v4807_v26 }
0x28cf   :  { %5154 = vmatmul.msk.f32.gmra.mxu1 %vm105_vm4, %v4810_v7 }
0x293d   :  { %v4840_v50 = vpop.f32.mrf.mxu1 }
0x293e   :  { %v4841_v51 = vadd.f32 %v5303_v44, %v4840_v50 }
0x2940   :  { %v4847_v52 = vsel %vm4846_vm1, %v4841_v51, -inf }
0x2941   :  { %4848 = vmax.xlane.f32.xlu2 %v4847_v52 }
0x294c   :  { %v4843_v54 = vpop.f32.mrf.mxu1 }
0x294d   :  { %v4844_v53 = vadd.f32 %v5303_v44, %v4843_v54 }
0x294f   :  { %v4850_v35 = vsel %vm4846_vm1, %v4844_v53, -inf }
0x2950   :  { %4851 = vmax.xlane.f32.xlu0 %v4850_v35 }
0x29b4   :  { %v4849_v14 = vpop.xlane.xlu2 %4848 }
0x29b5   :  { %v4853_v39 = vsub.f32 %v4841_v51, %v4849_v14  ;;  %vm4897_vm2 = vcmp.eq.f32.partialorder %v4841_v51, %v4849_v14 }
0x29b6   :  { %v4899_v20 = vsel %vm4897_vm2, %v5651_v13, 10 }
0x29b7   :  { %v4855_v48 = vmul.f32 1.442695, %v4853_v39  ;;  %v4901_v56 = vsel %vm4846_vm1, %v4899_v20, 2147483647 }
0x29b8   :  { %v4903_v27 = vshra.s32 %v4901_v56, 16  ;;  %v4902_v10 = vand.u32 65535, %v4901_v56 }
0x29b9   :  { %5538 = vpow2.f32 %v4855_v48 }
0x29ba   :  { %v4905_v59 = vcvt.s32.f32 %v4903_v27  ;;  %v4904_v28 = vcvt.s32.f32 %v4902_v10 }
0x29bc   :  { %4906 = vmin.xlane.f32.xlu1 %v4905_v59 }
0x29bf   :  { %v5539_v36 = vpop.eup %5538 }
0x29c0   :  { %v4859_v60 = vsel %vm4846_vm1, %v5539_v36, 0.0 }
0x29c1   :  { %4860 = vadd.xlane.f32.xlu0 %v4859_v60 }
0x29c3   :  { %v4852_v30 = vpop.xlane.xlu0 %4851 }
0x29c4   :  { %v4854_v58 = vsub.f32 %v4844_v53, %v4852_v30  ;;  %vm4898_vm4 = vcmp.eq.f32.partialorder %v4844_v53, %v4852_v30 }
0x29c5   :  { %v4900_v38 = vsel %vm4898_vm4, %v5651_v13, 10 }
0x29c6   :  { %v4857_v2 = vmul.f32 1.442695, %v4854_v58  ;;  %v4916_v5 = vsel %vm4846_vm1, %v4900_v38, 2147483647 }
0x29c7   :  { %v4918_v6 = vshra.s32 %v4916_v5, 16  ;;  %v4917_v13 = vand.u32 65535, %v4916_v5 }
0x29c8   :  { %5540 = vpow2.f32 %v4857_v2 }
0x29c9   :  { %v4920_v9 = vcvt.s32.f32 %v4918_v6  ;;  %v4919_v57 = vcvt.s32.f32 %v4917_v13 }
0x29cb   :  { %4921 = vmin.xlane.f32.xlu2 %v4920_v9 }
0x29ce   :  { %v5541_v40 = vpop.eup %5540 }
0x29cf   :  { %v4862_v12 = vsel %vm4846_vm1, %v5541_v40, 0.0 }
0x29d0   :  { %4863 = vadd.xlane.f32.xlu1 %v4862_v12 }
0x2a2f   :  { %v4907_v62 = vpop.xlane.xlu1 %4906 }
0x2a30   :  { %vm4908_vm3 = vcmp.eq.f32.partialorder %v4905_v59, %v4907_v62  ;;  %v4913_v33 = vcvt.f32.s32 %v4907_v62 }
0x2a31   :  { %v4909_v34 = vsel %vm4908_vm3, %v4904_v28, inf }
0x2a32   :  { %4910 = vmin.xlane.f32.xlu2 %v4909_v34  ;;  %v4914_v32 = vshll.u32 %v4913_v33, 16 }
0x2a34   :  { %v4861_v16 = vpop.xlane.xlu0 %4860 }
0x2a35   :  { %5542 = vrcp.f32 %v4861_v16  ;;  %v4876_v15 = vand.u32 2147483648, %v4861_v16  ;;  %v4874_v55 = vand.u32 2147483647, %v4861_v16  ;;  %vm4870_vm7 = vweird.f32 %v4861_v16 }
0x2a37   :  { %v4877_v19 = vor.u32 1.1754944e-38, %v4876_v15  ;;  %vm4875_vm9 = vcmp.eq.f32.partialorder %v4874_v55, 8.507059e+37 }
0x2a3b   :  { %v5543_v17 = vpop.eup %5542 }
0x2a3c   :  { %v4866_v11 = vmul.f32 %v5543_v17, %v4861_v16  ;;  %vm4871_vm6 = vweird.f32 %v5543_v17 }
0x2a3d   :  { %vm4872_vm8 = vmor %vm4870_vm7, %vm4871_vm6 }
0x2a3e   :  { %v4867_v42 = vsub.f32 1.0, %v4866_v11  ;;  %v4922_v1 = vpop.xlane.xlu2 %4921 }
0x2a3f   :  { %vm4923_vm5 = vcmp.eq.f32.partialorder %v4920_v9, %v4922_v1  ;;  %v4928_v26 = vcvt.f32.s32 %v4922_v1 }
0x2a40   :  { %v4868_v24 = vmul.f32 %v5543_v17, %v4867_v42  ;;  %v4924_v3 = vsel %vm4923_vm5, %v4919_v57, inf }
0x2a41   :  { %4925 = vmin.xlane.f32.xlu0 %v4924_v3  ;;  %v4929_v44 = vshll.u32 %v4928_v26, 16 }
0x2a42   :  { %v4869_v23 = vadd.f32 %v5543_v17, %v4868_v24 }
0x2a43   :  { %v4864_v22 = vpop.xlane.xlu1 %4863 }
0x2a44   :  { %v4873_v0 = vsel %vm4872_vm8, %v5543_v17, %v4869_v23  ;;  %5544 = vrcp.f32 %v4864_v22  ;;  %v4891_v45 = vand.u32 2147483648, %v4864_v22  ;;  %v4889_v29 = vand.u32 2147483647, %v4864_v22 }
0x2a45   :  { %v4878_v37 = vsel %vm4875_vm9, %v4877_v19, %v4873_v0  ;;  %vm4885_vm15 = vweird.f32 %v4864_v22 }
0x2a46   :  { %v4879_v18 = vmul.f32 %v5539_v36, %v4878_v37  ;;  %v4892_v21 = vor.u32 1.1754944e-38, %v4891_v45  ;;  %vm4890_vm12 = vcmp.eq.f32.partialorder %v4889_v29, 8.507059e+37 }
0x2a48   :  { %4895 = vst.msk [vmem:[#allocation5] sm:$0xff] %vm4846_vm1, %v4879_v18 }
0x2a4a   :  { %v5545_v43 = vpop.eup %5544 }
0x2a4b   :  { %v4881_v61 = vmul.f32 %v5545_v43, %v4864_v22  ;;  %vm4886_vm10 = vweird.f32 %v5545_v43 }
0x2a4c   :  { %vm4887_vm11 = vmor %vm4885_vm15, %vm4886_vm10 }
0x2a4d   :  { %v4882_v47 = vsub.f32 1.0, %v4881_v61 }
0x2a4f   :  { %v4883_v49 = vmul.f32 %v5545_v43, %v4882_v47 }
0x2a51   :  { %v4884_v31 = vadd.f32 %v5545_v43, %v4883_v49 }
0x2a53   :  { %v4888_v63 = vsel %vm4887_vm11, %v5545_v43, %v4884_v31 }
0x2a54   :  { %v4893_v41 = vsel %vm4890_vm12, %v4892_v21, %v4888_v63 }
0x2a55   :  { %v4894_v8 = vmul.f32 %v5541_v40, %v4893_v41 }
0x2a57   :  { %4896 = vst.msk [vmem:[#allocation5 + $0x8] sm:$0xff] %vm4846_vm1, %v4894_v8 }
0x2a58   :  { %4946 = dma.vmem_to_hbm [thread:$0]  %s4939_s10, 256, %s4941_s13, [#allocation4], %s5599_s20, %s5599_s20, %s5600_s21  }
0x2aa5   :  { %v4911_v4 = vpop.xlane.xlu2 %4910 }
0x2aa6   :  { %v4912_v46 = vcvt.f32.s32 %v4911_v4 }
0x2aa8   :  { %v4915_v25 = vadd.s32 %v4914_v32, %v4912_v46 }
0x2aaa   :  { %4932 = vst.msk [vmem:[%s6678_s4] sm:$0xff] %vm4931_vm0, %v4915_v25 }
0x2ab4   :  { %v4926_v7 = vpop.xlane.xlu0 %4925 }
0x2ab5   :  { %v4927_v50 = vcvt.f32.s32 %v4926_v7 }
0x2ab7   :  { %v4930_v51 = vadd.s32 %v4929_v44, %v4927_v50 }
0x2ab9   :  { %4933 = vst.msk [vmem:[%s6678_s4 + $0x8] sm:$0xff] %vm4931_vm0, %v4930_v51 }
0x2aba   :  { %5596 = dma.done.wait [#allocation4], 256  }
0x2abb   :  { %5597 = vsyncadd [#allocation4], 4294967040 }
0x2abc   :  { %4955 = vsyncpa [#allocation3], 1 }
0x2abd   :  { %4956 = vsyncpa [#allocation4], 1 }

</bundles_post_ra>
